<compile_context>
chip_gen: v7x
topology: tpu7x:2x2x1
jax: 0.10.0
libtpu: 0.0.40
codegen_flags: <defaults>
</compile_context>

<pallas_src>
import numpy as np
import jax
import jax.numpy as jnp
from jax import lax
from jax.experimental import pallas as pl
from jax.experimental.pallas import tpu as pltpu

NEG_SLOPE = 0.01   # nn.LeakyReLU default
BN_EPS = 1e-5      # nn.BatchNorm2d default

_CP = pltpu.CompilerParams(dimension_semantics=("arbitrary",))


def _full_spec(shape):
    # Whole array as a single block (everything easily fits in VMEM).
    return pl.BlockSpec(shape, lambda i: (0,) * len(shape))


# --------------------------------------------------------------------------
# Fully fused Block kernel (factory closes over the static geometry).
# --------------------------------------------------------------------------
def _make_block_kernel(N, H, W, cin, cout):
    Ho, Wo = H // 2, W // 2
    Lin = W * cin      # stage-1 lane width   (128)
    Lmid = W * cout    # stage-2 lane width   (256)
    Lout = Wo * cout   # output lane width    (128)

    def kernel(x_ref, w1_ref, g1_ref, b1_ref, w2_ref, g2_ref, b2_ref,
               sel_ref, ws_ref, gs_ref, bs_ref, mf_ref, ms_ref,
               o_ref, padA_ref, padB_ref, padP_ref):

        def leaky(v):
            return jnp.maximum(v, NEG_SLOPE * v)        # 2 VALU ops

        def bn(y, m_ref, g_row, b_row):
            # Training-mode batch statistics; per-channel reduce+broadcast
            # across the w-groups is one small MXU matmul against m_ref
            # (m_ref already carries the 1/count factor).
            s = jnp.sum(y, axis=0, keepdims=True)                    # (1, L)
            q = jnp.sum(y * y, axis=0, keepdims=True)                # (1, L)
            mean = jnp.dot(s, m_ref[...], preferred_element_type=jnp.float32)
            msq = jnp.dot(q, m_ref[...], preferred_element_type=jnp.float32)
            var = jnp.maximum(msq - mean * mean, 0.0)
            return (y - mean) * lax.rsqrt(var + BN_EPS) * g_row + b_row

        def sepconv(act3d, pad_ref, w_ref):
            # act3d: (N, H, L); pad_ref: (N, H+2, L); w_ref: (3, L, Lo).
            # dx shifts + pointwise mix are folded into w_ref; only the three
            # dy row offsets remain -> 3 accumulated matmuls.
            L = act3d.shape[-1]
            pad_ref[:, 0:1, :] = jnp.zeros((N, 1, L), jnp.float32)       # top border
            pad_ref[:, H + 1:H + 2, :] = jnp.zeros((N, 1, L), jnp.float32)  # bottom border
            pad_ref[:, 1:H + 1, :] = act3d
            acc = jnp.dot(pad_ref[:, 0:H, :].reshape(N * H, L), w_ref[0],
                          preferred_element_type=jnp.float32)
            for dy in (1, 2):
                acc = acc + jnp.dot(
                    pad_ref[:, dy:dy + H, :].reshape(N * H, L), w_ref[dy],
                    preferred_element_type=jnp.float32)
            return acc                                    # (N*H, Lo)

        x = x_ref[...]                                    # (N, H, W*Cin)

        # ---- rep stage 1: LeakyReLU -> SepConv(Cin->Cout) -> BN ----------
        y1 = bn(sepconv(leaky(x), padA_ref, w1_ref),
                mf_ref, g1_ref[...], b1_ref[...])         # (N*H, W*Cout)

        # ---- rep stage 2: LeakyReLU -> SepConv(Cout->Cout) -> BN ---------
        y2 = bn(sepconv(leaky(y1).reshape(N, H, Lmid), padB_ref, w2_ref),
                mf_ref, g2_ref[...], b2_ref[...])         # (N*H, W*Cout)

        # ---- MaxPool2d(3, stride=2, pad=1), produced in output layout ----
        # dx direction + column subsample: selection matmuls pick w = 2wo,
        # 2wo+1, 2wo-1 (the wo=0 / w=-1 tap has no source -> mask to -inf).
        col_c = jnp.dot(y2, sel_ref[0], preferred_element_type=jnp.float32)
        col_r = jnp.dot(y2, sel_ref[1], preferred_element_type=jnp.float32)
        col_l = jnp.dot(y2, sel_ref[2], preferred_element_type=jnp.float32)
        lane = lax.broadcasted_iota(jnp.int32, col_l.shape, 1)
        col_l = jnp.where(lane < cout, -jnp.inf, col_l)
        mx = jnp.maximum(jnp.maximum(col_c, col_r), col_l)   # (N*H, Wo*Cout)

        # dy direction: -inf bordered scratch, three sublane-offset reads.
        padP_ref[:, 0:1, :] = jnp.full((N, 1, Lout), -jnp.inf, jnp.float32)
        padP_ref[:, H + 1:H + 2, :] = jnp.full((N, 1, Lout), -jnp.inf, jnp.float32)
        padP_ref[:, 1:H + 1, :] = mx.reshape(N, H, Lout)
        mdy = jnp.maximum(jnp.maximum(padP_ref[:, 0:H, :],
                                      padP_ref[:, 1:H + 1, :]),
                          padP_ref[:, 2:H + 2, :])            # (N, H, Lout)
        pooled = mdy.reshape(N, Ho, 2, Lout)[:, :, 0, :].reshape(N * Ho, Lout)

        # ---- skip: Conv1x1(stride=2) on the ORIGINAL input, then BN ------
        # Column subsample + channel mix are folded into ws_ref; only the
        # even-row select remains.
        x_even = x.reshape(N, Ho, 2, Lin)[:, :, 0, :].reshape(N * Ho, Lin)
        skip = bn(jnp.dot(x_even, ws_ref[...], preferred_element_type=jnp.float32),
                  ms_ref, gs_ref[...], bs_ref[...])           # (N*Ho, Wo*Cout)

        # ---- residual add; single unmasked lane-dense store --------------
        o_ref[...] = pooled + skip

    return kernel


# --------------------------------------------------------------------------
# Wrapper: layout plumbing + tiny structured-weight construction (XLA glue).
# --------------------------------------------------------------------------
def block_forward(x_nchw, params):
    """Fused forward for Block(8->16, reps=2, strides=2, grow_first=True)."""
    f32 = jnp.float32
    x_nhwc = jnp.transpose(x_nchw, (0, 2, 3, 1)).astype(f32)   # NCHW -> NHWC
    N, H, W, cin = x_nhwc.shape
    assert H % 2 == 0 and W % 2 == 0
    (dw1, pw1, g1, b1), (dw2, pw2, g2, b2) = params["reps"]
    cout = pw1.shape[1]
    Ho, Wo = H // 2, W // 2
    Lin, Lmid, Lout = W * cin, W * cout, Wo * cout

    def conv_weights(dw, pw):
        # W[dy, w_in*ci + c, w_out*co + d] = dw[dy, dx, c] * pw[c, d],
        # dx = w_in - w_out + 1 in {0,1,2} (zero elsewhere = conv zero-pad).
        ci, co = pw.shape
        wf = dw[:, :, :, None] * pw[None, None, :, :]            # (3,3,ci,co)
        w_in = jnp.arange(W)[:, None]
        w_out = jnp.arange(W)[None, :]
        dx = w_in - w_out + 1
        valid = ((dx >= 0) & (dx <= 2)).astype(f32)              # (W, W)
        dxc = jnp.clip(dx, 0, 2)
        blocks = wf[:, dxc, :, :] * valid[None, :, :, None, None]  # (3,W,W,ci,co)
        return jnp.transpose(blocks, (0, 1, 3, 2, 4)).reshape(3, W * ci, W * co)

    w1 = conv_weights(dw1, pw1)              # (3, W*Cin, W*Cout)
    w2 = conv_weights(dw2, pw2)              # (3, W*Cout, W*Cout)

    # Pool column-selection matrices: pick w = 2wo, 2wo+1, 2wo-1.
    eye_c = jnp.eye(cout, dtype=f32)
    w_idx = jnp.arange(W)[:, None]
    wo_idx = jnp.arange(Wo)[None, :]
    sels = []
    for off in (0, 1, -1):
        hit = (w_idx == 2 * wo_idx + off).astype(f32)            # (W, Wo)
        sels.append((hit[:, None, :, None] * eye_c[None, :, None, :]
                     ).reshape(Lmid, Lout))
    sel = jnp.stack(sels)                    # (3, W*Cout, Wo*Cout)

    # Skip 1x1 stride-2 conv: column subsample + channel mix in one matrix.
    hit_e = (w_idx == 2 * wo_idx).astype(f32)                    # (W, Wo)
    ws = (hit_e[:, None, :, None] * params["skip_w"][None, :, None, :]
          ).reshape(Lin, Lout)

    # BN per-channel mean/broadcast matrices (carry the 1/count factor).
    def mean_mat(L, count):
        l = jnp.arange(L)
        return ((l[:, None] % cout) == (l[None, :] % cout)).astype(f32) / count
    mf = mean_mat(Lmid, N * H * W)           # rep-stage BNs
    ms = mean_mat(Lout, N * Ho * Wo)         # skip BN

    def tile_row(v, reps):                   # (1,cout) -> (1, reps*cout)
        return jnp.tile(v.reshape(1, cout).astype(f32), (1, reps))

    g1t, b1t = tile_row(g1, W), tile_row(b1, W)
    g2t, b2t = tile_row(g2, W), tile_row(b2, W)
    gst, bst = tile_row(params["skip_g"], Wo), tile_row(params["skip_b"], Wo)

    x_ld = x_nhwc.reshape(N, H, Lin)         # lane-dense (w-major, c-minor)

    kernel = _make_block_kernel(N, H, W, cin, cout)
    operands = (x_ld, w1, g1t, b1t, w2, g2t, b2t, sel, ws, gst, bst, mf, ms)

    out2d = pl.pallas_call(
        kernel,
        out_shape=jax.ShapeDtypeStruct((N * Ho, Lout), f32),
        grid=(1,),
        in_specs=[_full_spec(a.shape) for a in operands],
        out_specs=_full_spec((N * Ho, Lout)),
        scratch_shapes=[pltpu.VMEM((N, H + 2, Lin), f32),    # stage-1 pad
                        pltpu.VMEM((N, H + 2, Lmid), f32),   # stage-2 pad
                        pltpu.VMEM((N, H + 2, Lout), f32)],  # pool pad
        compiler_params=_CP,
    )(*operands)

    out = out2d.reshape(N, Ho, Wo, cout)
    return jnp.transpose(out, (0, 3, 1, 2))                  # NHWC -> NCHW


# --------------------------------------------------------------------------
# Pure-JAX reference for verification.
# --------------------------------------------------------------------------
def ref_forward(x_nchw, params, *, strides):
    x = jnp.transpose(x_nchw, (0, 2, 3, 1)).astype(jnp.float32)
    inp = x

    def bn(y, g, b):
        mean = jnp.mean(y, axis=(0, 1, 2))
        var = jnp.mean((y - mean) ** 2, axis=(0, 1, 2))
        return (y - mean) * lax.rsqrt(var + BN_EPS) * g.reshape(-1) + b.reshape(-1)

    for (dw, pw, g, b) in params["reps"]:
        x = jnp.where(x >= 0, x, NEG_SLOPE * x)
        cin = x.shape[-1]
        x = lax.conv_general_dilated(
            x, dw[:, :, None, :], window_strides=(1, 1),
            padding=((1, 1), (1, 1)),
            dimension_numbers=("NHWC", "HWIO", "NHWC"),
            feature_group_count=cin)
        x = jnp.einsum("nhwc,cd->nhwd", x, pw)
        x = bn(x, g, b)
    if strides != 1:
        x = lax.reduce_window(x, -jnp.inf, lax.max,
                              (1, 3, 3, 1), (1, strides, strides, 1),
                              ((0, 0), (1, 1), (1, 1), (0, 0)))
    if params["skip_w"] is not None:
        s = inp[:, ::strides, ::strides, :]
        y = jnp.einsum("nhwc,cd->nhwd", s, params["skip_w"])
        out = x + bn(y, params["skip_g"], params["skip_b"])
    else:
        out = x + inp
    return jnp.transpose(out, (0, 3, 1, 2))


if __name__ == "__main__":
    # Block(in_filters=8, out_filters=16, reps=2, strides=2,
    #       start_with_relu=True, grow_first=True)
    N, C_IN, H, W = 2, 8, 16, 16
    C_OUT, REPS, STRIDES = 16, 2, 2

    key = jax.random.PRNGKey(0)
    ks = jax.random.split(key, 10)
    x = jax.random.normal(ks[0], (N, C_IN, H, W), jnp.float32)

    def sep_params(k, cin, cout):
        k1, k2, k3, k4 = jax.random.split(k, 4)
        dw = 0.2 * jax.random.normal(k1, (3, 3, cin), jnp.float32)   # depthwise taps
        pw = 0.2 * jax.random.normal(k2, (cin, cout), jnp.float32)   # pointwise 1x1
        gamma = (1.0 + 0.1 * jax.random.normal(k3, (1, cout), jnp.float32))
        beta = 0.1 * jax.random.normal(k4, (1, cout), jnp.float32)
        return dw, pw, gamma, beta

    # grow_first=True: first sepconv 8->16, then (reps-1) sepconvs 16->16.
    reps_params = [sep_params(ks[1], C_IN, C_OUT)]
    for i in range(REPS - 1):
        reps_params.append(sep_params(ks[2 + i], C_OUT, C_OUT))

    params = {
        "reps": reps_params,
        "skip_w": 0.2 * jax.random.normal(ks[5], (C_IN, C_OUT), jnp.float32),
        "skip_g": 1.0 + 0.1 * jax.random.normal(ks[6], (1, C_OUT), jnp.float32),
        "skip_b": 0.1 * jax.random.normal(ks[7], (1, C_OUT), jnp.float32),
    }

    fwd = jax.jit(block_forward)
    out = jax.block_until_ready(fwd(x, params))
    assert out.shape == (N, C_OUT, H // STRIDES, W // STRIDES), out.shape

    ref = jax.block_until_ready(ref_forward(x, params, strides=STRIDES))
    np.testing.assert_allclose(np.asarray(out), np.asarray(ref),
                               rtol=2e-2, atol=2e-2)
    print("KERNEL_OK")
</pallas_src>

<mosaic_0001>
module attributes {stable_mosaic.version = 11 : i64} {
  func.func @kernel(%arg0: i32, %arg1: memref<2x16x128xf32, #tpu.memory_space<vmem>>, %arg2: memref<3x128x256xf32, #tpu.memory_space<vmem>>, %arg3: memref<1x256xf32, #tpu.memory_space<vmem>>, %arg4: memref<1x256xf32, #tpu.memory_space<vmem>>, %arg5: memref<3x256x256xf32, #tpu.memory_space<vmem>>, %arg6: memref<1x256xf32, #tpu.memory_space<vmem>>, %arg7: memref<1x256xf32, #tpu.memory_space<vmem>>, %arg8: memref<3x256x128xf32, #tpu.memory_space<vmem>>, %arg9: memref<128x128xf32, #tpu.memory_space<vmem>>, %arg10: memref<1x128xf32, #tpu.memory_space<vmem>>, %arg11: memref<1x128xf32, #tpu.memory_space<vmem>>, %arg12: memref<256x256xf32, #tpu.memory_space<vmem>>, %arg13: memref<128x128xf32, #tpu.memory_space<vmem>>, %arg14: memref<16x128xf32, #tpu.memory_space<vmem>>, %arg15: memref<2x18x128xf32, #tpu.memory_space<vmem>>, %arg16: memref<2x18x256xf32, #tpu.memory_space<vmem>>, %arg17: memref<2x18x128xf32, #tpu.memory_space<vmem>>) attributes {dimension_semantics = [#tpu.dimension_semantics<arbitrary>], iteration_bounds = array<i64: 1>, scalar_prefetch = 0 : i64, scratch_operands = 3 : i64, tpu.core_type = #tpu.core_type<tc>, window_params = [{pipeline_mode = #tpu.pipeline_mode<synchronous>, transform_indices = @transform_0, window_bounds = array<i64: 2, 16, 128>}, {pipeline_mode = #tpu.pipeline_mode<synchronous>, transform_indices = @transform_1, window_bounds = array<i64: 3, 128, 256>}, {pipeline_mode = #tpu.pipeline_mode<synchronous>, transform_indices = @transform_2, window_bounds = array<i64: 1, 256>}, {pipeline_mode = #tpu.pipeline_mode<synchronous>, transform_indices = @transform_3, window_bounds = array<i64: 1, 256>}, {pipeline_mode = #tpu.pipeline_mode<synchronous>, transform_indices = @transform_4, window_bounds = array<i64: 3, 256, 256>}, {pipeline_mode = #tpu.pipeline_mode<synchronous>, transform_indices = @transform_5, window_bounds = array<i64: 1, 256>}, {pipeline_mode = #tpu.pipeline_mode<synchronous>, transform_indices = @transform_6, window_bounds = array<i64: 1, 256>}, {pipeline_mode = #tpu.pipeline_mode<synchronous>, transform_indices = @transform_7, window_bounds = array<i64: 3, 256, 128>}, {pipeline_mode = #tpu.pipeline_mode<synchronous>, transform_indices = @transform_8, window_bounds = array<i64: 128, 128>}, {pipeline_mode = #tpu.pipeline_mode<synchronous>, transform_indices = @transform_9, window_bounds = array<i64: 1, 128>}, {pipeline_mode = #tpu.pipeline_mode<synchronous>, transform_indices = @transform_10, window_bounds = array<i64: 1, 128>}, {pipeline_mode = #tpu.pipeline_mode<synchronous>, transform_indices = @transform_11, window_bounds = array<i64: 256, 256>}, {pipeline_mode = #tpu.pipeline_mode<synchronous>, transform_indices = @transform_12, window_bounds = array<i64: 128, 128>}, {pipeline_mode = #tpu.pipeline_mode<synchronous>, transform_indices = @transform_13, window_bounds = array<i64: 16, 128>}]} {
    %c0 = arith.constant 0 : index
    %c0_0 = arith.constant 0 : index
    %c0_1 = arith.constant 0 : index
    %0 = vector.load %arg1[%c0, %c0_0, %c0_1] : memref<2x16x128xf32, #tpu.memory_space<vmem>>, vector<2x16x128xf32>
    %cst = arith.constant 0.00999999977 : f32
    %1 = vector.broadcast %cst : f32 to vector<2x16x128xf32>
    %2 = arith.mulf %1, %0 : vector<2x16x128xf32>
    %3 = arith.maximumf %0, %2 : vector<2x16x128xf32>
    %cst_2 = arith.constant 0.000000e+00 : f32
    %4 = vector.broadcast %cst_2 : f32 to vector<2x1x128xf32>
    %c0_3 = arith.constant 0 : index
    %c0_4 = arith.constant 0 : index
    %c0_5 = arith.constant 0 : index
    %5 = vector.load %arg15[%c0_3, %c0_4, %c0_5] : memref<2x18x128xf32, #tpu.memory_space<vmem>>, vector<2x1x128xf32>
    tpu.vector_store %arg15[%c0_3, %c0_4, %c0_5], %4 {strides = array<i32>} : memref<2x18x128xf32, #tpu.memory_space<vmem>>, vector<2x1x128xf32>,
    %cst_6 = arith.constant 0.000000e+00 : f32
    %6 = vector.broadcast %cst_6 : f32 to vector<2x1x128xf32>
    %c0_7 = arith.constant 0 : index
    %c17 = arith.constant 17 : index
    %c0_8 = arith.constant 0 : index
    %7 = vector.load %arg15[%c0_7, %c17, %c0_8] : memref<2x18x128xf32, #tpu.memory_space<vmem>>, vector<2x1x128xf32>
    tpu.vector_store %arg15[%c0_7, %c17, %c0_8], %6 {strides = array<i32>} : memref<2x18x128xf32, #tpu.memory_space<vmem>>, vector<2x1x128xf32>,
    %c0_9 = arith.constant 0 : index
    %c1 = arith.constant 1 : index
    %c0_10 = arith.constant 0 : index
    %8 = vector.load %arg15[%c0_9, %c1, %c0_10] : memref<2x18x128xf32, #tpu.memory_space<vmem>>, vector<2x16x128xf32>
    tpu.vector_store %arg15[%c0_9, %c1, %c0_10], %3 {strides = array<i32>} : memref<2x18x128xf32, #tpu.memory_space<vmem>>, vector<2x16x128xf32>,
    %c0_11 = arith.constant 0 : index
    %c0_12 = arith.constant 0 : index
    %c0_13 = arith.constant 0 : index
    %9 = vector.load %arg15[%c0_11, %c0_12, %c0_13] : memref<2x18x128xf32, #tpu.memory_space<vmem>>, vector<2x16x128xf32>
    %10 = vector.shape_cast %9 : vector<2x16x128xf32> to vector<32x128xf32>
    %c0_14 = arith.constant 0 : index
    %c0_15 = arith.constant 0 : index
    %c0_16 = arith.constant 0 : index
    %11 = vector.load %arg2[%c0_14, %c0_15, %c0_16] : memref<3x128x256xf32, #tpu.memory_space<vmem>>, vector<1x128x256xf32>
    %12 = vector.shape_cast %11 : vector<1x128x256xf32> to vector<128x256xf32>
    %cst_17 = arith.constant dense<0.000000e+00> : vector<32x256xf32>
    %13 = tpu.matmul %10, %12, %cst_17 {dimension_numbers = #tpu.dot_dimension_numbers<[1], [0], [0], [1], [0, 0, 1, 1], [], []>} : vector<32x128xf32>, vector<128x256xf32>, vector<32x256xf32> -> vector<32x256xf32>
    %c0_18 = arith.constant 0 : index
    %c1_19 = arith.constant 1 : index
    %c0_20 = arith.constant 0 : index
    %14 = vector.load %arg15[%c0_18, %c1_19, %c0_20] : memref<2x18x128xf32, #tpu.memory_space<vmem>>, vector<2x16x128xf32>
    %15 = vector.shape_cast %14 : vector<2x16x128xf32> to vector<32x128xf32>
    %c1_21 = arith.constant 1 : index
    %c0_22 = arith.constant 0 : index
    %c0_23 = arith.constant 0 : index
    %16 = vector.load %arg2[%c1_21, %c0_22, %c0_23] : memref<3x128x256xf32, #tpu.memory_space<vmem>>, vector<1x128x256xf32>
    %17 = vector.shape_cast %16 : vector<1x128x256xf32> to vector<128x256xf32>
    %cst_24 = arith.constant dense<0.000000e+00> : vector<32x256xf32>
    %18 = tpu.matmul %15, %17, %cst_24 {dimension_numbers = #tpu.dot_dimension_numbers<[1], [0], [0], [1], [0, 0, 1, 1], [], []>} : vector<32x128xf32>, vector<128x256xf32>, vector<32x256xf32> -> vector<32x256xf32>
    %19 = arith.addf %13, %18 : vector<32x256xf32>
    %c0_25 = arith.constant 0 : index
    %c2 = arith.constant 2 : index
    %c0_26 = arith.constant 0 : index
    %20 = vector.load %arg15[%c0_25, %c2, %c0_26] : memref<2x18x128xf32, #tpu.memory_space<vmem>>, vector<2x16x128xf32>
    %21 = vector.shape_cast %20 : vector<2x16x128xf32> to vector<32x128xf32>
    %c2_27 = arith.constant 2 : index
    %c0_28 = arith.constant 0 : index
    %c0_29 = arith.constant 0 : index
    %22 = vector.load %arg2[%c2_27, %c0_28, %c0_29] : memref<3x128x256xf32, #tpu.memory_space<vmem>>, vector<1x128x256xf32>
    %23 = vector.shape_cast %22 : vector<1x128x256xf32> to vector<128x256xf32>
    %cst_30 = arith.constant dense<0.000000e+00> : vector<32x256xf32>
    %24 = tpu.matmul %21, %23, %cst_30 {dimension_numbers = #tpu.dot_dimension_numbers<[1], [0], [0], [1], [0, 0, 1, 1], [], []>} : vector<32x128xf32>, vector<128x256xf32>, vector<32x256xf32> -> vector<32x256xf32>
    %25 = arith.addf %19, %24 : vector<32x256xf32>
    %c0_31 = arith.constant 0 : index
    %c0_32 = arith.constant 0 : index
    %26 = vector.load %arg3[%c0_31, %c0_32] : memref<1x256xf32, #tpu.memory_space<vmem>>, vector<1x256xf32>
    %c0_33 = arith.constant 0 : index
    %c0_34 = arith.constant 0 : index
    %27 = vector.load %arg4[%c0_33, %c0_34] : memref<1x256xf32, #tpu.memory_space<vmem>>, vector<1x256xf32>
    %cst_35 = arith.constant dense<0.000000e+00> : vector<256xf32>
    %28 = vector.multi_reduction <add>, %25, %cst_35 [0] : vector<32x256xf32> to vector<256xf32>
    %29 = vector.shape_cast %28 : vector<256xf32> to vector<1x256xf32>
    %30 = arith.mulf %25, %25 : vector<32x256xf32>
    %cst_36 = arith.constant dense<0.000000e+00> : vector<256xf32>
    %31 = vector.multi_reduction <add>, %30, %cst_36 [0] : vector<32x256xf32> to vector<256xf32>
    %32 = vector.shape_cast %31 : vector<256xf32> to vector<1x256xf32>
    %c0_37 = arith.constant 0 : index
    %c0_38 = arith.constant 0 : index
    %33 = vector.load %arg12[%c0_37, %c0_38] : memref<256x256xf32, #tpu.memory_space<vmem>>, vector<256x256xf32>
    %cst_39 = arith.constant dense<0.000000e+00> : vector<1x256xf32>
    %34 = tpu.matmul %29, %33, %cst_39 {dimension_numbers = #tpu.dot_dimension_numbers<[1], [0], [0], [1], [0, 0, 1, 1], [], []>} : vector<1x256xf32>, vector<256x256xf32>, vector<1x256xf32> -> vector<1x256xf32>
    %c0_40 = arith.constant 0 : index
    %c0_41 = arith.constant 0 : index
    %35 = vector.load %arg12[%c0_40, %c0_41] : memref<256x256xf32, #tpu.memory_space<vmem>>, vector<256x256xf32>
    %cst_42 = arith.constant dense<0.000000e+00> : vector<1x256xf32>
    %36 = tpu.matmul %32, %35, %cst_42 {dimension_numbers = #tpu.dot_dimension_numbers<[1], [0], [0], [1], [0, 0, 1, 1], [], []>} : vector<1x256xf32>, vector<256x256xf32>, vector<1x256xf32> -> vector<1x256xf32>
    %37 = arith.mulf %34, %34 : vector<1x256xf32>
    %38 = arith.subf %36, %37 : vector<1x256xf32>
    %cst_43 = arith.constant 0.000000e+00 : f32
    %39 = vector.broadcast %cst_43 : f32 to vector<1x256xf32>
    %40 = arith.maximumf %38, %39 : vector<1x256xf32>
    %41 = vector.broadcast %34 : vector<1x256xf32> to vector<32x256xf32>
    %42 = arith.subf %25, %41 : vector<32x256xf32>
    %cst_44 = arith.constant 9.99999974E-6 : f32
    %43 = vector.broadcast %cst_44 : f32 to vector<1x256xf32>
    %44 = arith.addf %40, %43 : vector<1x256xf32>
    %45 = math.rsqrt %44 : vector<1x256xf32>
    %46 = vector.broadcast %45 : vector<1x256xf32> to vector<32x256xf32>
    %47 = arith.mulf %42, %46 : vector<32x256xf32>
    %48 = vector.broadcast %26 : vector<1x256xf32> to vector<32x256xf32>
    %49 = arith.mulf %47, %48 : vector<32x256xf32>
    %50 = vector.broadcast %27 : vector<1x256xf32> to vector<32x256xf32>
    %51 = arith.addf %49, %50 : vector<32x256xf32>
    %cst_45 = arith.constant 0.00999999977 : f32
    %52 = vector.broadcast %cst_45 : f32 to vector<32x256xf32>
    %53 = arith.mulf %52, %51 : vector<32x256xf32>
    %54 = arith.maximumf %51, %53 : vector<32x256xf32>
    %55 = vector.shape_cast %54 : vector<32x256xf32> to vector<2x16x256xf32>
    %cst_46 = arith.constant 0.000000e+00 : f32
    %56 = vector.broadcast %cst_46 : f32 to vector<2x1x256xf32>
    %c0_47 = arith.constant 0 : index
    %c0_48 = arith.constant 0 : index
    %c0_49 = arith.constant 0 : index
    %57 = vector.load %arg16[%c0_47, %c0_48, %c0_49] : memref<2x18x256xf32, #tpu.memory_space<vmem>>, vector<2x1x256xf32>
    tpu.vector_store %arg16[%c0_47, %c0_48, %c0_49], %56 {strides = array<i32>} : memref<2x18x256xf32, #tpu.memory_space<vmem>>, vector<2x1x256xf32>,
    %cst_50 = arith.constant 0.000000e+00 : f32
    %58 = vector.broadcast %cst_50 : f32 to vector<2x1x256xf32>
    %c0_51 = arith.constant 0 : index
    %c17_52 = arith.constant 17 : index
    %c0_53 = arith.constant 0 : index
    %59 = vector.load %arg16[%c0_51, %c17_52, %c0_53] : memref<2x18x256xf32, #tpu.memory_space<vmem>>, vector<2x1x256xf32>
    tpu.vector_store %arg16[%c0_51, %c17_52, %c0_53], %58 {strides = array<i32>} : memref<2x18x256xf32, #tpu.memory_space<vmem>>, vector<2x1x256xf32>,
    %c0_54 = arith.constant 0 : index
    %c1_55 = arith.constant 1 : index
    %c0_56 = arith.constant 0 : index
    %60 = vector.load %arg16[%c0_54, %c1_55, %c0_56] : memref<2x18x256xf32, #tpu.memory_space<vmem>>, vector<2x16x256xf32>
    tpu.vector_store %arg16[%c0_54, %c1_55, %c0_56], %55 {strides = array<i32>} : memref<2x18x256xf32, #tpu.memory_space<vmem>>, vector<2x16x256xf32>,
    %c0_57 = arith.constant 0 : index
    %c0_58 = arith.constant 0 : index
    %c0_59 = arith.constant 0 : index
    %61 = vector.load %arg16[%c0_57, %c0_58, %c0_59] : memref<2x18x256xf32, #tpu.memory_space<vmem>>, vector<2x16x256xf32>
    %62 = vector.shape_cast %61 : vector<2x16x256xf32> to vector<32x256xf32>
    %c0_60 = arith.constant 0 : index
    %c0_61 = arith.constant 0 : index
    %c0_62 = arith.constant 0 : index
    %63 = vector.load %arg5[%c0_60, %c0_61, %c0_62] : memref<3x256x256xf32, #tpu.memory_space<vmem>>, vector<1x256x256xf32>
    %64 = vector.shape_cast %63 : vector<1x256x256xf32> to vector<256x256xf32>
    %cst_63 = arith.constant dense<0.000000e+00> : vector<32x256xf32>
    %65 = tpu.matmul %62, %64, %cst_63 {dimension_numbers = #tpu.dot_dimension_numbers<[1], [0], [0], [1], [0, 0, 1, 1], [], []>} : vector<32x256xf32>, vector<256x256xf32>, vector<32x256xf32> -> vector<32x256xf32>
    %c0_64 = arith.constant 0 : index
    %c1_65 = arith.constant 1 : index
    %c0_66 = arith.constant 0 : index
    %66 = vector.load %arg16[%c0_64, %c1_65, %c0_66] : memref<2x18x256xf32, #tpu.memory_space<vmem>>, vector<2x16x256xf32>
    %67 = vector.shape_cast %66 : vector<2x16x256xf32> to vector<32x256xf32>
    %c1_67 = arith.constant 1 : index
    %c0_68 = arith.constant 0 : index
    %c0_69 = arith.constant 0 : index
    %68 = vector.load %arg5[%c1_67, %c0_68, %c0_69] : memref<3x256x256xf32, #tpu.memory_space<vmem>>, vector<1x256x256xf32>
    %69 = vector.shape_cast %68 : vector<1x256x256xf32> to vector<256x256xf32>
    %cst_70 = arith.constant dense<0.000000e+00> : vector<32x256xf32>
    %70 = tpu.matmul %67, %69, %cst_70 {dimension_numbers = #tpu.dot_dimension_numbers<[1], [0], [0], [1], [0, 0, 1, 1], [], []>} : vector<32x256xf32>, vector<256x256xf32>, vector<32x256xf32> -> vector<32x256xf32>
    %71 = arith.addf %65, %70 : vector<32x256xf32>
    %c0_71 = arith.constant 0 : index
    %c2_72 = arith.constant 2 : index
    %c0_73 = arith.constant 0 : index
    %72 = vector.load %arg16[%c0_71, %c2_72, %c0_73] : memref<2x18x256xf32, #tpu.memory_space<vmem>>, vector<2x16x256xf32>
    %73 = vector.shape_cast %72 : vector<2x16x256xf32> to vector<32x256xf32>
    %c2_74 = arith.constant 2 : index
    %c0_75 = arith.constant 0 : index
    %c0_76 = arith.constant 0 : index
    %74 = vector.load %arg5[%c2_74, %c0_75, %c0_76] : memref<3x256x256xf32, #tpu.memory_space<vmem>>, vector<1x256x256xf32>
    %75 = vector.shape_cast %74 : vector<1x256x256xf32> to vector<256x256xf32>
    %cst_77 = arith.constant dense<0.000000e+00> : vector<32x256xf32>
    %76 = tpu.matmul %73, %75, %cst_77 {dimension_numbers = #tpu.dot_dimension_numbers<[1], [0], [0], [1], [0, 0, 1, 1], [], []>} : vector<32x256xf32>, vector<256x256xf32>, vector<32x256xf32> -> vector<32x256xf32>
    %77 = arith.addf %71, %76 : vector<32x256xf32>
    %c0_78 = arith.constant 0 : index
    %c0_79 = arith.constant 0 : index
    %78 = vector.load %arg6[%c0_78, %c0_79] : memref<1x256xf32, #tpu.memory_space<vmem>>, vector<1x256xf32>
    %c0_80 = arith.constant 0 : index
    %c0_81 = arith.constant 0 : index
    %79 = vector.load %arg7[%c0_80, %c0_81] : memref<1x256xf32, #tpu.memory_space<vmem>>, vector<1x256xf32>
    %cst_82 = arith.constant dense<0.000000e+00> : vector<256xf32>
    %80 = vector.multi_reduction <add>, %77, %cst_82 [0] : vector<32x256xf32> to vector<256xf32>
    %81 = vector.shape_cast %80 : vector<256xf32> to vector<1x256xf32>
    %82 = arith.mulf %77, %77 : vector<32x256xf32>
    %cst_83 = arith.constant dense<0.000000e+00> : vector<256xf32>
    %83 = vector.multi_reduction <add>, %82, %cst_83 [0] : vector<32x256xf32> to vector<256xf32>
    %84 = vector.shape_cast %83 : vector<256xf32> to vector<1x256xf32>
    %c0_84 = arith.constant 0 : index
    %c0_85 = arith.constant 0 : index
    %85 = vector.load %arg12[%c0_84, %c0_85] : memref<256x256xf32, #tpu.memory_space<vmem>>, vector<256x256xf32>
    %cst_86 = arith.constant dense<0.000000e+00> : vector<1x256xf32>
    %86 = tpu.matmul %81, %85, %cst_86 {dimension_numbers = #tpu.dot_dimension_numbers<[1], [0], [0], [1], [0, 0, 1, 1], [], []>} : vector<1x256xf32>, vector<256x256xf32>, vector<1x256xf32> -> vector<1x256xf32>
    %c0_87 = arith.constant 0 : index
    %c0_88 = arith.constant 0 : index
    %87 = vector.load %arg12[%c0_87, %c0_88] : memref<256x256xf32, #tpu.memory_space<vmem>>, vector<256x256xf32>
    %cst_89 = arith.constant dense<0.000000e+00> : vector<1x256xf32>
    %88 = tpu.matmul %84, %87, %cst_89 {dimension_numbers = #tpu.dot_dimension_numbers<[1], [0], [0], [1], [0, 0, 1, 1], [], []>} : vector<1x256xf32>, vector<256x256xf32>, vector<1x256xf32> -> vector<1x256xf32>
    %89 = arith.mulf %86, %86 : vector<1x256xf32>
    %90 = arith.subf %88, %89 : vector<1x256xf32>
    %cst_90 = arith.constant 0.000000e+00 : f32
    %91 = vector.broadcast %cst_90 : f32 to vector<1x256xf32>
    %92 = arith.maximumf %90, %91 : vector<1x256xf32>
    %93 = vector.broadcast %86 : vector<1x256xf32> to vector<32x256xf32>
    %94 = arith.subf %77, %93 : vector<32x256xf32>
    %cst_91 = arith.constant 9.99999974E-6 : f32
    %95 = vector.broadcast %cst_91 : f32 to vector<1x256xf32>
    %96 = arith.addf %92, %95 : vector<1x256xf32>
    %97 = math.rsqrt %96 : vector<1x256xf32>
    %98 = vector.broadcast %97 : vector<1x256xf32> to vector<32x256xf32>
    %99 = arith.mulf %94, %98 : vector<32x256xf32>
    %100 = vector.broadcast %78 : vector<1x256xf32> to vector<32x256xf32>
    %101 = arith.mulf %99, %100 : vector<32x256xf32>
    %102 = vector.broadcast %79 : vector<1x256xf32> to vector<32x256xf32>
    %103 = arith.addf %101, %102 : vector<32x256xf32>
    %c0_92 = arith.constant 0 : index
    %c0_93 = arith.constant 0 : index
    %c0_94 = arith.constant 0 : index
    %104 = vector.load %arg8[%c0_92, %c0_93, %c0_94] : memref<3x256x128xf32, #tpu.memory_space<vmem>>, vector<1x256x128xf32>
    %105 = vector.shape_cast %104 : vector<1x256x128xf32> to vector<256x128xf32>
    %cst_95 = arith.constant dense<0.000000e+00> : vector<32x128xf32>
    %106 = tpu.matmul %103, %105, %cst_95 {dimension_numbers = #tpu.dot_dimension_numbers<[1], [0], [0], [1], [0, 0, 1, 1], [], []>} : vector<32x256xf32>, vector<256x128xf32>, vector<32x128xf32> -> vector<32x128xf32>
    %c1_96 = arith.constant 1 : index
    %c0_97 = arith.constant 0 : index
    %c0_98 = arith.constant 0 : index
    %107 = vector.load %arg8[%c1_96, %c0_97, %c0_98] : memref<3x256x128xf32, #tpu.memory_space<vmem>>, vector<1x256x128xf32>
    %108 = vector.shape_cast %107 : vector<1x256x128xf32> to vector<256x128xf32>
    %cst_99 = arith.constant dense<0.000000e+00> : vector<32x128xf32>
    %109 = tpu.matmul %103, %108, %cst_99 {dimension_numbers = #tpu.dot_dimension_numbers<[1], [0], [0], [1], [0, 0, 1, 1], [], []>} : vector<32x256xf32>, vector<256x128xf32>, vector<32x128xf32> -> vector<32x128xf32>
    %c2_100 = arith.constant 2 : index
    %c0_101 = arith.constant 0 : index
    %c0_102 = arith.constant 0 : index
    %110 = vector.load %arg8[%c2_100, %c0_101, %c0_102] : memref<3x256x128xf32, #tpu.memory_space<vmem>>, vector<1x256x128xf32>
    %111 = vector.shape_cast %110 : vector<1x256x128xf32> to vector<256x128xf32>
    %cst_103 = arith.constant dense<0.000000e+00> : vector<32x128xf32>
    %112 = tpu.matmul %103, %111, %cst_103 {dimension_numbers = #tpu.dot_dimension_numbers<[1], [0], [0], [1], [0, 0, 1, 1], [], []>} : vector<32x256xf32>, vector<256x128xf32>, vector<32x128xf32> -> vector<32x128xf32>
    %113 = tpu.iota {dimensions = array<i32: 1>} : vector<32x128xi32>
    %c16_i32 = arith.constant 16 : i32
    %114 = vector.broadcast %c16_i32 : i32 to vector<32x128xi32>
    %115 = arith.cmpi slt, %113, %114 : vector<32x128xi32>
    %cst_104 = arith.constant 0xFF800000 : f32
    %116 = vector.broadcast %cst_104 : f32 to vector<32x128xf32>
    %117 = arith.select %115, %116, %112 : vector<32x128xi1>, vector<32x128xf32>
    %118 = arith.maximumf %106, %109 : vector<32x128xf32>
    %119 = arith.maximumf %118, %117 : vector<32x128xf32>
    %cst_105 = arith.constant 0xFF800000 : f32
    %120 = vector.broadcast %cst_105 : f32 to vector<2x1x128xf32>
    %c0_106 = arith.constant 0 : index
    %c0_107 = arith.constant 0 : index
    %c0_108 = arith.constant 0 : index
    %121 = vector.load %arg17[%c0_106, %c0_107, %c0_108] : memref<2x18x128xf32, #tpu.memory_space<vmem>>, vector<2x1x128xf32>
    tpu.vector_store %arg17[%c0_106, %c0_107, %c0_108], %120 {strides = array<i32>} : memref<2x18x128xf32, #tpu.memory_space<vmem>>, vector<2x1x128xf32>,
    %cst_109 = arith.constant 0xFF800000 : f32
    %122 = vector.broadcast %cst_109 : f32 to vector<2x1x128xf32>
    %c0_110 = arith.constant 0 : index
    %c17_111 = arith.constant 17 : index
    %c0_112 = arith.constant 0 : index
    %123 = vector.load %arg17[%c0_110, %c17_111, %c0_112] : memref<2x18x128xf32, #tpu.memory_space<vmem>>, vector<2x1x128xf32>
    tpu.vector_store %arg17[%c0_110, %c17_111, %c0_112], %122 {strides = array<i32>} : memref<2x18x128xf32, #tpu.memory_space<vmem>>, vector<2x1x128xf32>,
    %124 = vector.shape_cast %119 : vector<32x128xf32> to vector<2x16x128xf32>
    %c0_113 = arith.constant 0 : index
    %c1_114 = arith.constant 1 : index
    %c0_115 = arith.constant 0 : index
    %125 = vector.load %arg17[%c0_113, %c1_114, %c0_115] : memref<2x18x128xf32, #tpu.memory_space<vmem>>, vector<2x16x128xf32>
    tpu.vector_store %arg17[%c0_113, %c1_114, %c0_115], %124 {strides = array<i32>} : memref<2x18x128xf32, #tpu.memory_space<vmem>>, vector<2x16x128xf32>,
    %c0_116 = arith.constant 0 : index
    %c0_117 = arith.constant 0 : index
    %c0_118 = arith.constant 0 : index
    %126 = vector.load %arg17[%c0_116, %c0_117, %c0_118] : memref<2x18x128xf32, #tpu.memory_space<vmem>>, vector<2x16x128xf32>
    %c0_119 = arith.constant 0 : index
    %c1_120 = arith.constant 1 : index
    %c0_121 = arith.constant 0 : index
    %127 = vector.load %arg17[%c0_119, %c1_120, %c0_121] : memref<2x18x128xf32, #tpu.memory_space<vmem>>, vector<2x16x128xf32>
    %128 = arith.maximumf %126, %127 : vector<2x16x128xf32>
    %c0_122 = arith.constant 0 : index
    %c2_123 = arith.constant 2 : index
    %c0_124 = arith.constant 0 : index
    %129 = vector.load %arg17[%c0_122, %c2_123, %c0_124] : memref<2x18x128xf32, #tpu.memory_space<vmem>>, vector<2x16x128xf32>
    %130 = arith.maximumf %128, %129 : vector<2x16x128xf32>
    %131 = vector.shape_cast %130 : vector<2x16x128xf32> to vector<2x8x2x128xf32>
    %132 = vector.extract_strided_slice %131 {offsets = [0, 0, 0, 0], sizes = [2, 8, 1, 128], strides = [1, 1, 1, 1]} : vector<2x8x2x128xf32> to vector<2x8x1x128xf32>
    %133 = vector.shape_cast %132 : vector<2x8x1x128xf32> to vector<2x8x128xf32>
    %134 = vector.shape_cast %133 : vector<2x8x128xf32> to vector<16x128xf32>
    %135 = vector.shape_cast %0 : vector<2x16x128xf32> to vector<2x8x2x128xf32>
    %136 = vector.extract_strided_slice %135 {offsets = [0, 0, 0, 0], sizes = [2, 8, 1, 128], strides = [1, 1, 1, 1]} : vector<2x8x2x128xf32> to vector<2x8x1x128xf32>
    %137 = vector.shape_cast %136 : vector<2x8x1x128xf32> to vector<2x8x128xf32>
    %138 = vector.shape_cast %137 : vector<2x8x128xf32> to vector<16x128xf32>
    %c0_125 = arith.constant 0 : index
    %c0_126 = arith.constant 0 : index
    %139 = vector.load %arg9[%c0_125, %c0_126] : memref<128x128xf32, #tpu.memory_space<vmem>>, vector<128x128xf32>
    %cst_127 = arith.constant dense<0.000000e+00> : vector<16x128xf32>
    %140 = tpu.matmul %138, %139, %cst_127 {dimension_numbers = #tpu.dot_dimension_numbers<[1], [0], [0], [1], [0, 0, 1, 1], [], []>} : vector<16x128xf32>, vector<128x128xf32>, vector<16x128xf32> -> vector<16x128xf32>
    %c0_128 = arith.constant 0 : index
    %c0_129 = arith.constant 0 : index
    %141 = vector.load %arg10[%c0_128, %c0_129] : memref<1x128xf32, #tpu.memory_space<vmem>>, vector<1x128xf32>
    %c0_130 = arith.constant 0 : index
    %c0_131 = arith.constant 0 : index
    %142 = vector.load %arg11[%c0_130, %c0_131] : memref<1x128xf32, #tpu.memory_space<vmem>>, vector<1x128xf32>
    %cst_132 = arith.constant dense<0.000000e+00> : vector<128xf32>
    %143 = vector.multi_reduction <add>, %140, %cst_132 [0] : vector<16x128xf32> to vector<128xf32>
    %144 = vector.shape_cast %143 : vector<128xf32> to vector<1x128xf32>
    %145 = arith.mulf %140, %140 : vector<16x128xf32>
    %cst_133 = arith.constant dense<0.000000e+00> : vector<128xf32>
    %146 = vector.multi_reduction <add>, %145, %cst_133 [0] : vector<16x128xf32> to vector<128xf32>
    %147 = vector.shape_cast %146 : vector<128xf32> to vector<1x128xf32>
    %c0_134 = arith.constant 0 : index
    %c0_135 = arith.constant 0 : index
    %148 = vector.load %arg13[%c0_134, %c0_135] : memref<128x128xf32, #tpu.memory_space<vmem>>, vector<128x128xf32>
    %cst_136 = arith.constant dense<0.000000e+00> : vector<1x128xf32>
    %149 = tpu.matmul %144, %148, %cst_136 {dimension_numbers = #tpu.dot_dimension_numbers<[1], [0], [0], [1], [0, 0, 1, 1], [], []>} : vector<1x128xf32>, vector<128x128xf32>, vector<1x128xf32> -> vector<1x128xf32>
    %c0_137 = arith.constant 0 : index
    %c0_138 = arith.constant 0 : index
    %150 = vector.load %arg13[%c0_137, %c0_138] : memref<128x128xf32, #tpu.memory_space<vmem>>, vector<128x128xf32>
    %cst_139 = arith.constant dense<0.000000e+00> : vector<1x128xf32>
    %151 = tpu.matmul %147, %150, %cst_139 {dimension_numbers = #tpu.dot_dimension_numbers<[1], [0], [0], [1], [0, 0, 1, 1], [], []>} : vector<1x128xf32>, vector<128x128xf32>, vector<1x128xf32> -> vector<1x128xf32>
    %152 = arith.mulf %149, %149 : vector<1x128xf32>
    %153 = arith.subf %151, %152 : vector<1x128xf32>
    %cst_140 = arith.constant 0.000000e+00 : f32
    %154 = vector.broadcast %cst_140 : f32 to vector<1x128xf32>
    %155 = arith.maximumf %153, %154 : vector<1x128xf32>
    %156 = vector.broadcast %149 : vector<1x128xf32> to vector<16x128xf32>
    %157 = arith.subf %140, %156 : vector<16x128xf32>
    %cst_141 = arith.constant 9.99999974E-6 : f32
    %158 = vector.broadcast %cst_141 : f32 to vector<1x128xf32>
    %159 = arith.addf %155, %158 : vector<1x128xf32>
    %160 = math.rsqrt %159 : vector<1x128xf32>
    %161 = vector.broadcast %160 : vector<1x128xf32> to vector<16x128xf32>
    %162 = arith.mulf %157, %161 : vector<16x128xf32>
    %163 = vector.broadcast %141 : vector<1x128xf32> to vector<16x128xf32>
    %164 = arith.mulf %162, %163 : vector<16x128xf32>
    %165 = vector.broadcast %142 : vector<1x128xf32> to vector<16x128xf32>
    %166 = arith.addf %164, %165 : vector<16x128xf32>
    %167 = arith.addf %134, %166 : vector<16x128xf32>
    %c0_142 = arith.constant 0 : index
    %c0_143 = arith.constant 0 : index
    %168 = vector.load %arg14[%c0_142, %c0_143] : memref<16x128xf32, #tpu.memory_space<vmem>>, vector<16x128xf32>
    tpu.vector_store %arg14[%c0_142, %c0_143], %167 {strides = array<i32>} : memref<16x128xf32, #tpu.memory_space<vmem>>, vector<16x128xf32>,
    return
  }
  func.func @transform_0(%arg0: i32) -> (i32, i32, i32) {
    %c0_i32 = arith.constant 0 : i32
    %c0_i32_0 = arith.constant 0 : i32
    %c0_i32_1 = arith.constant 0 : i32
    %c0_i32_2 = arith.constant 0 : i32
    return %c0_i32, %c0_i32_0, %c0_i32_1 : i32, i32, i32
  }
  func.func @transform_1(%arg0: i32) -> (i32, i32, i32) {
    %c0_i32 = arith.constant 0 : i32
    %c0_i32_0 = arith.constant 0 : i32
    %c0_i32_1 = arith.constant 0 : i32
    %c0_i32_2 = arith.constant 0 : i32
    return %c0_i32, %c0_i32_0, %c0_i32_1 : i32, i32, i32
  }
  func.func @transform_2(%arg0: i32) -> (i32, i32) {
    %c0_i32 = arith.constant 0 : i32
    %c0_i32_0 = arith.constant 0 : i32
    %c0_i32_1 = arith.constant 0 : i32
    return %c0_i32, %c0_i32_0 : i32, i32
  }
  func.func @transform_3(%arg0: i32) -> (i32, i32) {
    %c0_i32 = arith.constant 0 : i32
    %c0_i32_0 = arith.constant 0 : i32
    %c0_i32_1 = arith.constant 0 : i32
    return %c0_i32, %c0_i32_0 : i32, i32
  }
  func.func @transform_4(%arg0: i32) -> (i32, i32, i32) {
    %c0_i32 = arith.constant 0 : i32
    %c0_i32_0 = arith.constant 0 : i32
    %c0_i32_1 = arith.constant 0 : i32
    %c0_i32_2 = arith.constant 0 : i32
    return %c0_i32, %c0_i32_0, %c0_i32_1 : i32, i32, i32
  }
  func.func @transform_5(%arg0: i32) -> (i32, i32) {
    %c0_i32 = arith.constant 0 : i32
    %c0_i32_0 = arith.constant 0 : i32
    %c0_i32_1 = arith.constant 0 : i32
    return %c0_i32, %c0_i32_0 : i32, i32
  }
  func.func @transform_6(%arg0: i32) -> (i32, i32) {
    %c0_i32 = arith.constant 0 : i32
    %c0_i32_0 = arith.constant 0 : i32
    %c0_i32_1 = arith.constant 0 : i32
    return %c0_i32, %c0_i32_0 : i32, i32
  }
  func.func @transform_7(%arg0: i32) -> (i32, i32, i32) {
    %c0_i32 = arith.constant 0 : i32
    %c0_i32_0 = arith.constant 0 : i32
    %c0_i32_1 = arith.constant 0 : i32
    %c0_i32_2 = arith.constant 0 : i32
    return %c0_i32, %c0_i32_0, %c0_i32_1 : i32, i32, i32
  }
  func.func @transform_8(%arg0: i32) -> (i32, i32) {
    %c0_i32 = arith.constant 0 : i32
    %c0_i32_0 = arith.constant 0 : i32
    %c0_i32_1 = arith.constant 0 : i32
    return %c0_i32, %c0_i32_0 : i32, i32
  }
  func.func @transform_9(%arg0: i32) -> (i32, i32) {
    %c0_i32 = arith.constant 0 : i32
    %c0_i32_0 = arith.constant 0 : i32
    %c0_i32_1 = arith.constant 0 : i32
    return %c0_i32, %c0_i32_0 : i32, i32
  }
  func.func @transform_10(%arg0: i32) -> (i32, i32) {
    %c0_i32 = arith.constant 0 : i32
    %c0_i32_0 = arith.constant 0 : i32
    %c0_i32_1 = arith.constant 0 : i32
    return %c0_i32, %c0_i32_0 : i32, i32
  }
  func.func @transform_11(%arg0: i32) -> (i32, i32) {
    %c0_i32 = arith.constant 0 : i32
    %c0_i32_0 = arith.constant 0 : i32
    %c0_i32_1 = arith.constant 0 : i32
    return %c0_i32, %c0_i32_0 : i32, i32
  }
  func.func @transform_12(%arg0: i32) -> (i32, i32) {
    %c0_i32 = arith.constant 0 : i32
    %c0_i32_0 = arith.constant 0 : i32
    %c0_i32_1 = arith.constant 0 : i32
    return %c0_i32, %c0_i32_0 : i32, i32
  }
  func.func @transform_13(%arg0: i32) -> (i32, i32) {
    %c0_i32 = arith.constant 0 : i32
    %c0_i32_0 = arith.constant 0 : i32
    %c0_i32_1 = arith.constant 0 : i32
    return %c0_i32, %c0_i32_0 : i32, i32
  }
}

</mosaic_0001>

<bundles_post_ra>
// kernel: block_forward.1
= control target key start
LH: loop header
LB: loop body
LE: loop exit
PB: predicated region body
PF: predicated region fallthrough
CT: control target
= control target key end

     0   :  { %v6604_v3 = vmov 0.0   ;;  %vm820_vm1 = vcmask 1040384   ;;  %vm949_vm2 = vcmask 1046528   ;;  %vm1237_vm3 = vcmask 1045504   ;;  %s6590_s1 = inlined_call_operand.vmem [shape: f32[3,128,256], index: 1, kind: input, shape index: {}]   ;;  %s6591_s0 = inlined_call_operand.vmem [shape: f32[2,16,128], index: 0, kind: input, shape index: {}]   ;;  %s6592_s11 = inlined_call_operand.vmem [shape: f32[256,256], index: 11, kind: input, shape index: {}]   ;;  %s6593_s4 = inlined_call_operand.vmem [shape: f32[3,256,256], index: 4, kind: input, shape index: {}]   ;;  %s6594_s2 = inlined_call_operand.vmem [shape: f32[1,256], index: 2, kind: input, shape index: {}]   ;;  %s6595_s3 = inlined_call_operand.vmem [shape: f32[1,256], index: 3, kind: input, shape index: {}]   ;;  %s6596_s7 = inlined_call_operand.vmem [shape: f32[3,256,128], index: 7, kind: input, shape index: {}]   ;;  %s6597_s8 = inlined_call_operand.vmem [shape: f32[128,128], index: 8, kind: input, shape index: {}]   ;;  %s6598_s5 = inlined_call_operand.vmem [shape: f32[1,256], index: 5, kind: input, shape index: {}]   ;;  %s6599_s6 = inlined_call_operand.vmem [shape: f32[1,256], index: 6, kind: input, shape index: {}]   ;;  %s6600_s12 = inlined_call_operand.vmem [shape: f32[128,128], index: 12, kind: input, shape index: {}]   ;;  %s6601_s9 = inlined_call_operand.vmem [shape: f32[1,128], index: 9, kind: input, shape index: {}]   ;;  %s6602_s10 = inlined_call_operand.vmem [shape: f32[1,128], index: 10, kind: input, shape index: {}]   ;;  %s6603_s13 = inlined_call_operand.vmem [shape: f32[16,128], index: 13, kind: output, shape index: {}]  }
   0x1   :  { %v2880_v0 = vld [vmem:[%s6590_s1 + $0x108] sm:$0xff]  ;;  %v2882_v1 = vld [vmem:[%s6590_s1 + $0x118] sm:$0xff]  ;;  %v2879_v2 = vld [vmem:[%s6590_s1 + $0x100] sm:$0xff]  ;;  %201 = vmatprep.mubr.f32.mxu0 %v6604_v3  ;;  %56 = vst [vmem:[#allocation2] sm:$0x1] %v6604_v3  ;;  %vm2396_vm4 = vcmask 1041409  }
   0x2   :  { %57 = vst [vmem:[#allocation2 + $0x18] sm:$0x1] %v6604_v3  ;;  %58 = vst [vmem:[#allocation2 + $0x11] sm:$0x1] %v6604_v3  ;;  %v3426_v4 = vpack.c.bf16 %v2882_v1, %v2880_v0  ;;  %v2881_v5 = vld [vmem:[%s6590_s1 + $0x110] sm:$0xff]  ;;  %v2884_v6 = vld [vmem:[%s6590_s1 + $0x128] sm:$0xff] }
   0x3   :  { %59 = vst [vmem:[#allocation2 + $0x29] sm:$0x1] %v6604_v3  ;;  %v2886_v7 = vld [vmem:[%s6590_s1 + $0x138] sm:$0xff]  ;;  %v3428_v8 = vpack.c.bf16 %v2881_v5, %v2879_v2  ;;  %v2883_v10 = vld [vmem:[%s6590_s1 + $0x120] sm:$0xff]  ;;  %v2885_v11 = vld [vmem:[%s6590_s1 + $0x130] sm:$0xff]  ;;  %vm2398_vm5 = vcmask 1042434  }
   0x4   :  { %v3430_v9 = vpack.c.bf16 %v2886_v7, %v2884_v6  ;;  %v2888_v12 = vld [vmem:[%s6590_s1 + $0x148] sm:$0xff]  ;;  %3427 = vmatprep.subr.bf16.mxu0 %v3426_v4  ;;  %v2890_v13 = vld [vmem:[%s6590_s1 + $0x158] sm:$0xff]  ;;  %v3432_v14 = vpack.c.bf16 %v2885_v11, %v2883_v10  ;;  %v2887_v16 = vld [vmem:[%s6590_s1 + $0x140] sm:$0xff]  ;;  %vm2400_vm6 = vcmask 1043459   ;;  %vm2402_vm7 = vcmask 1044484  }
   0x5   :  { %3429 = vmatpush1.bf16.msra.mxu0 %v3428_v8  ;;  %v3434_v15 = vpack.c.bf16 %v2890_v13, %v2888_v12  ;;  %v2889_v17 = vld [vmem:[%s6590_s1 + $0x150] sm:$0xff]  ;;  %v2892_v18 = vld [vmem:[%s6590_s1 + $0x168] sm:$0xff]  ;;  %v2894_v19 = vld [vmem:[%s6590_s1 + $0x178] sm:$0xff]  ;;  %vm2404_vm8 = vcmask 1045509   ;;  %vm2406_vm9 = vcmask 1046534   ;;  %vm2408_vm10 = vcmask 1047559  }
   0x6   :  { %3431 = vmatprep.subr.bf16.mxu0 %v3430_v9  ;;  %v3436_v20 = vpack.c.bf16 %v2889_v17, %v2887_v16  ;;  %v3438_v21 = vpack.c.bf16 %v2894_v19, %v2892_v18  ;;  %v2891_v22 = vld [vmem:[%s6590_s1 + $0x160] sm:$0xff]  ;;  %v2893_v23 = vld [vmem:[%s6590_s1 + $0x170] sm:$0xff]  ;;  %v2896_v24 = vld [vmem:[%s6590_s1 + $0x188] sm:$0xff]  ;;  %vm4201_vm11 = vmmov 0  }
   0x7   :  { %v2898_v25 = vld [vmem:[%s6590_s1 + $0x198] sm:$0xff]  ;;  %v44_v26 = vld [vmem:[%s6591_s0] sm:$0xff]  ;;  %v3440_v27 = vpack.c.bf16 %v2893_v23, %v2891_v22  ;;  %v2897_v31 = vld [vmem:[%s6590_s1 + $0x190] sm:$0xff] }
   0x8   :  { %v48_v28 = vmul.f32 0.01, %v44_v26  ;;  %v3442_v29 = vpack.c.bf16 %v2898_v25, %v2896_v24  ;;  %v2895_v30 = vld [vmem:[%s6590_s1 + $0x180] sm:$0xff]  ;;  %v2900_v32 = vld [vmem:[%s6590_s1 + $0x1a8] sm:$0xff]  ;;  %v2902_v33 = vld [vmem:[%s6590_s1 + $0x1b8] sm:$0xff] }
   0x9   :  { %3433 = vmatpush1.bf16.msra.mxu0 %v3432_v14  ;;  %v3444_v35 = vpack.c.bf16 %v2897_v31, %v2895_v30  ;;  %v3446_v36 = vpack.c.bf16 %v2902_v33, %v2900_v32  ;;  %v2899_v37 = vld [vmem:[%s6590_s1 + $0x1a0] sm:$0xff]  ;;  %v2901_v38 = vld [vmem:[%s6590_s1 + $0x1b0] sm:$0xff]  ;;  %v2904_v39 = vld [vmem:[%s6590_s1 + $0x1c8] sm:$0xff] }
   0xa   :  { %3435 = vmatprep.subr.bf16.mxu0 %v3434_v15  ;;  %v52_v34 = vmax.f32 %v44_v26, %v48_v28  ;;  %v2906_v40 = vld [vmem:[%s6590_s1 + $0x1d8] sm:$0xff]  ;;  %v45_v41 = vld [vmem:[%s6591_s0 + $0x8] sm:$0xff]  ;;  %v3448_v43 = vpack.c.bf16 %v2901_v38, %v2899_v37  ;;  %v46_v44 = vld [vmem:[%s6591_s0 + $0x10] sm:$0xff] }
   0xb   :  { %v49_v42 = vmul.f32 0.01, %v45_v41  ;;  %v3450_v45 = vpack.c.bf16 %v2906_v40, %v2904_v39  ;;  %v2903_v46 = vld [vmem:[%s6590_s1 + $0x1c0] sm:$0xff]  ;;  %v2905_v47 = vld [vmem:[%s6590_s1 + $0x1d0] sm:$0xff]  ;;  %v50_v49 = vmul.f32 0.01, %v46_v44 }
   0xc   :  { %60 = vst [vmem:[#allocation2 + $0x1] sm:$0xff] %v52_v34  ;;  %v47_v50 = vld [vmem:[%s6591_s0 + $0x18] sm:$0xff]  ;;  %v2908_v51 = vld [vmem:[%s6590_s1 + $0x1e8] sm:$0xff]  ;;  %v3452_v55 = vpack.c.bf16 %v2905_v47, %v2903_v46  ;;  %v2907_v58 = vld [vmem:[%s6590_s1 + $0x1e0] sm:$0xff] }
   0xd   :  { %3437 = vmatpush1.bf16.msra.mxu0 %v3436_v20  ;;  %v53_v48 = vmax.f32 %v45_v41, %v49_v42  ;;  %v2910_v52 = vld [vmem:[%s6590_s1 + $0x1f8] sm:$0xff]  ;;  %v51_v53 = vmul.f32 0.01, %v47_v50  ;;  %v4379_v54 = vmax.f32 %v46_v44, %v50_v49  ;;  %v2909_v59 = vld [vmem:[%s6590_s1 + $0x1f0] sm:$0xff]  ;;  %v69_v60 = vld [vmem:[%s6590_s1 + $0x8] sm:$0xff] }
   0xe   :  { %3439 = vmatprep.subr.bf16.mxu0 %v3438_v21  ;;  %v3454_v57 = vpack.c.bf16 %v2910_v52, %v2908_v51  ;;  %v71_v61 = vld [vmem:[%s6590_s1 + $0x18] sm:$0xff]  ;;  %v3456_v62 = vpack.c.bf16 %v2909_v59, %v2907_v58  ;;  %v68_v0 = vld [vmem:[%s6590_s1] sm:$0xff]  ;;  %v70_v1 = vld [vmem:[%s6590_s1 + $0x10] sm:$0xff] }
   0xf   :  { %61 = vst [vmem:[#allocation2 + $0x9] sm:$0xff] %v53_v48  ;;  %v4381_v56 = vmax.f32 %v47_v50, %v51_v53  ;;  %62 = vst [vmem:[#allocation2 + $0x19] sm:$0xff] %v4379_v54  ;;  %v3458_v63 = vpack.c.bf16 %v71_v61, %v69_v60  ;;  %v73_v2 = vld [vmem:[%s6590_s1 + $0x28] sm:$0xff]  ;;  %v75_v4 = vld [vmem:[%s6590_s1 + $0x38] sm:$0xff]  ;;  %v3460_v5 = vpack.c.bf16 %v70_v1, %v68_v0 }
  0x10   :  { %v3462_v6 = vpack.c.bf16 %v75_v4, %v73_v2  ;;  %v72_v7 = vld [vmem:[%s6590_s1 + $0x20] sm:$0xff]  ;;  %v74_v8 = vld [vmem:[%s6590_s1 + $0x30] sm:$0xff]  ;;  %v77_v9 = vld [vmem:[%s6590_s1 + $0x48] sm:$0xff] }
  0x11   :  { %3441 = vmatpush1.bf16.msra.mxu0 %v3440_v27  ;;  %63 = vst [vmem:[#allocation2 + $0x21] sm:$0xff] %v4381_v56  ;;  %v79_v10 = vld [vmem:[%s6590_s1 + $0x58] sm:$0xff]  ;;  %v76_v11 = vld [vmem:[%s6590_s1 + $0x40] sm:$0xff]  ;;  %v78_v12 = vld [vmem:[%s6590_s1 + $0x50] sm:$0xff]  ;;  %v3464_v13 = vpack.c.bf16 %v74_v8, %v72_v7 }
  0x12   :  { %3443 = vmatprep.subr.bf16.mxu0 %v3442_v29  ;;  %v81_v14 = vld [vmem:[%s6590_s1 + $0x68] sm:$0xff]  ;;  %v498_v16 = vld [vmem:[%s6592_s11 + $0x18] sm:$0xff]  ;;  %v495_v17 = vld [vmem:[%s6592_s11] sm:$0xff]  ;;  %v3466_v18 = vpack.c.bf16 %v79_v10, %v77_v9  ;;  %v3468_v30 = vpack.c.bf16 %v78_v12, %v76_v11 }
  0x13   :  { %v496_v15 = vld [vmem:[%s6592_s11 + $0x8] sm:$0xff]  ;;  %v497_v20 = vld [vmem:[%s6592_s11 + $0x10] sm:$0xff]  ;;  %v502_v22 = vld [vmem:[%s6592_s11 + $0x38] sm:$0xff] }
  0x14   :  { %v4440_v19 = vpack.c.bf16 %v498_v16, %v496_v15  ;;  %v500_v21 = vld [vmem:[%s6592_s11 + $0x28] sm:$0xff]  ;;  %v83_v23 = vld [vmem:[%s6590_s1 + $0x78] sm:$0xff]  ;;  %v4454_v24 = vpack.c.bf16 %v497_v20, %v495_v17  ;;  %v499_v26 = vld [vmem:[%s6592_s11 + $0x20] sm:$0xff] }
  0x15   :  { %3445 = vmatpush1.bf16.msra.mxu0 %v3444_v35  ;;  %v4456_v25 = vpack.c.bf16 %v502_v22, %v500_v21  ;;  %v501_v27 = vld [vmem:[%s6592_s11 + $0x30] sm:$0xff]  ;;  %v504_v28 = vld [vmem:[%s6592_s11 + $0x48] sm:$0xff]  ;;  %v506_v29 = vld [vmem:[%s6592_s11 + $0x58] sm:$0xff]  ;;  %v3470_v31 = vpack.c.bf16 %v83_v23, %v81_v14 }
  0x16   :  { %3447 = vmatprep.subr.bf16.mxu0 %v3446_v36  ;;  %3523 = vmatprep.subr.bf16.mxu1 %v4440_v19  ;;  %v80_v32 = vld [vmem:[%s6590_s1 + $0x60] sm:$0xff]  ;;  %v82_v33 = vld [vmem:[%s6590_s1 + $0x70] sm:$0xff]  ;;  %v4482_v35 = vpack.c.bf16 %v501_v27, %v499_v26  ;;  %v87_v36 = vld [vmem:[%s6590_s1 + $0x98] sm:$0xff]  ;;  %v4488_v37 = vpack.c.bf16 %v506_v29, %v504_v28 }
  0x17   :  { %3525 = vmatpush1.bf16.msra.mxu1 %v4454_v24  ;;  %v503_v38 = vld [vmem:[%s6592_s11 + $0x40] sm:$0xff]  ;;  %v505_v39 = vld [vmem:[%s6592_s11 + $0x50] sm:$0xff]  ;;  %v508_v40 = vld [vmem:[%s6592_s11 + $0x68] sm:$0xff]  ;;  %v3472_v42 = vpack.c.bf16 %v82_v33, %v80_v32 }
  0x18   :  { %3527 = vmatprep.subr.bf16.mxu1 %v4456_v25  ;;  %v510_v41 = vld [vmem:[%s6592_s11 + $0x78] sm:$0xff]  ;;  %v84_v44 = vld [vmem:[%s6590_s1 + $0x80] sm:$0xff]  ;;  %v89_v46 = vld [vmem:[%s6590_s1 + $0xa8] sm:$0xff]  ;;  %v4514_v47 = vpack.c.bf16 %v505_v39, %v503_v38 }
  0x19   :  { %3449 = vmatpush1.bf16.msra.mxu0 %v3448_v43  ;;  %v4520_v49 = vpack.c.bf16 %v510_v41, %v508_v40  ;;  %v507_v50 = vld [vmem:[%s6592_s11 + $0x60] sm:$0xff]  ;;  %v509_v51 = vld [vmem:[%s6592_s11 + $0x70] sm:$0xff]  ;;  %v512_v52 = vld [vmem:[%s6592_s11 + $0x88] sm:$0xff] }
  0x1a   :  { %3451 = vmatprep.subr.bf16.mxu0 %v3450_v45  ;;  %v86_v45 = vld [vmem:[%s6590_s1 + $0x90] sm:$0xff]  ;;  %v514_v53 = vld [vmem:[%s6592_s11 + $0x98] sm:$0xff]  ;;  %v93_v58 = vld [vmem:[%s6590_s1 + $0xc8] sm:$0xff]  ;;  %v4546_v59 = vpack.c.bf16 %v509_v51, %v507_v50 }
  0x1b   :  { %3529 = vmatpush1.bf16.msra.mxu1 %v4482_v35  ;;  %v95_v60 = vld [vmem:[%s6590_s1 + $0xd8] sm:$0xff]  ;;  %v4552_v61 = vpack.c.bf16 %v514_v53, %v512_v52  ;;  %v516_v0 = vld [vmem:[%s6592_s11 + $0xa8] sm:$0xff]  ;;  %v515_v11 = vld [vmem:[%s6592_s11 + $0xa0] sm:$0xff] }
  0x1c   :  { %3531 = vmatprep.subr.bf16.mxu1 %v4488_v37  ;;  %v518_v1 = vld [vmem:[%s6592_s11 + $0xb8] sm:$0xff]  ;;  %v3482_v4 = vpack.c.bf16 %v95_v60, %v93_v58  ;;  %v97_v7 = vld [vmem:[%s6590_s1 + $0xe8] sm:$0xff]  ;;  %v517_v12 = vld [vmem:[%s6592_s11 + $0xb0] sm:$0xff] }
  0x1d   :  { %3453 = vmatpush1.bf16.msra.mxu0 %v3452_v55  ;;  %v99_v9 = vld [vmem:[%s6590_s1 + $0xf8] sm:$0xff]  ;;  %v4582_v10 = vpack.c.bf16 %v518_v1, %v516_v0  ;;  %v96_v17 = vld [vmem:[%s6590_s1 + $0xe0] sm:$0xff]  ;;  %v2912_v20 = vld [vmem:[%s6590_s1 + $0x208] sm:$0xff]  ;;  %v4606_v21 = vpack.c.bf16 %v517_v12, %v515_v11 }
  0x1e   :  { %3455 = vmatprep.subr.bf16.mxu0 %v3454_v57  ;;  %v88_v57 = vld [vmem:[%s6590_s1 + $0xa0] sm:$0xff]  ;;  %v522_v14 = vld [vmem:[%s6592_s11 + $0xd8] sm:$0xff]  ;;  %v3486_v16 = vpack.c.bf16 %v99_v9, %v97_v7  ;;  %v521_v27 = vld [vmem:[%s6592_s11 + $0xd0] sm:$0xff] }
  0x1f   :  { %3533 = vmatpush1.bf16.msra.mxu1 %v4514_v47  ;;  %v2914_v22 = vld [vmem:[%s6590_s1 + $0x218] sm:$0xff]  ;;  %v519_v26 = vld [vmem:[%s6592_s11 + $0xc0] sm:$0xff]  ;;  %v524_v28 = vld [vmem:[%s6592_s11 + $0xe8] sm:$0xff] }
  0x20   :  { %3535 = vmatprep.subr.bf16.mxu1 %v4520_v49  ;;  %v526_v29 = vld [vmem:[%s6592_s11 + $0xf8] sm:$0xff]  ;;  %v2911_v32 = vld [vmem:[%s6590_s1 + $0x200] sm:$0xff]  ;;  %v2913_v33 = vld [vmem:[%s6590_s1 + $0x210] sm:$0xff] }
  0x21   :  { %3457 = vmatpush1.bf16.msra.mxu0 %v3456_v62  ;;  %v511_v62 = vld [vmem:[%s6592_s11 + $0x80] sm:$0xff]  ;;  %v2918_v38 = vld [vmem:[%s6590_s1 + $0x238] sm:$0xff]  ;;  %v4642_v39 = vpack.c.bf16 %v526_v29, %v524_v28  ;;  %v525_v41 = vld [vmem:[%s6592_s11 + $0xf0] sm:$0xff] }
  0x22   :  { %3459 = vmatprep.subr.bf16.mxu0 %v3458_v63  ;;  %v513_v63 = vld [vmem:[%s6592_s11 + $0x90] sm:$0xff]  ;;  %v523_v40 = vld [vmem:[%s6592_s11 + $0xe0] sm:$0xff]  ;;  %v2920_v51 = vld [vmem:[%s6590_s1 + $0x248] sm:$0xff] }
  0x23   :  { %3537 = vmatpush1.bf16.msra.mxu1 %v4546_v59  ;;  %v4576_v8 = vpack.c.bf16 %v513_v63, %v511_v62  ;;  %v2917_v50 = vld [vmem:[%s6590_s1 + $0x230] sm:$0xff]  ;;  %v4666_v52 = vpack.c.bf16 %v525_v41, %v523_v40  ;;  %v2922_v53 = vld [vmem:[%s6590_s1 + $0x258] sm:$0xff]  ;;  %v65_v58 = vld [vmem:[#allocation2 + $0x8] sm:$0xff] }
  0x24   :  { %202 = vmatmul.mubr.f32.vlgmr.msra.gmra.mrb[0].mxu0 %v52_v34  ;;  %v85_v34 = vld [vmem:[%s6590_s1 + $0x88] sm:$0xff]  ;;  %3539 = vmatprep.subr.bf16.mxu1 %v4552_v61  ;;  %v3498_v60 = vpack.c.bf16 %v2922_v53, %v2920_v51  ;;  %v2919_v62 = vld [vmem:[%s6590_s1 + $0x240] sm:$0xff]  ;;  %v2921_v63 = vld [vmem:[%s6590_s1 + $0x250] sm:$0xff] }
  0x25   :  { %3461 = vmatpush1.bf16.msra.mxu0 %v3460_v5  ;;  %207 = vmatprep.mubr.f32.mxu0 %v6604_v3  ;;  %v3474_v43 = vpack.c.bf16 %v87_v36, %v85_v34  ;;  %v92_v5 = vld [vmem:[%s6590_s1 + $0xc0] sm:$0xff]  ;;  %v2916_v34 = vld [vmem:[%s6590_s1 + $0x228] sm:$0xff]  ;;  %v4636_v36 = vpack.c.bf16 %v521_v27, %v519_v26  ;;  %v2925_v9 = vld [vmem:[%s6590_s1 + $0x270] sm:$0xff] }
  0x26   :  { %3463 = vmatprep.subr.bf16.mxu0 %v3462_v6  ;;  %v94_v6 = vld [vmem:[%s6590_s1 + $0xd0] sm:$0xff]  ;;  %v2924_v1 = vld [vmem:[%s6590_s1 + $0x268] sm:$0xff]  ;;  %v2923_v7 = vld [vmem:[%s6590_s1 + $0x260] sm:$0xff] }
  0x27   :  { %v3484_v15 = vpack.c.bf16 %v94_v6, %v92_v5  ;;  %3541 = vmatpush1.bf16.msra.mxu1 %v4576_v8  ;;  %v66_v5 = vld [vmem:[#allocation2 + $0x18] sm:$0xff]  ;;  %v2928_v11 = vld [vmem:[%s6590_s1 + $0x288] sm:$0xff]  ;;  %v2931_v27 = vld [vmem:[%s6590_s1 + $0x2a0] sm:$0xff] }
  0x28   :  { %208 = vmatmul.mubr.f32.gmra.mrb[2].mxu0 %v53_v48  ;;  %v91_v48 = vld [vmem:[%s6590_s1 + $0xb8] sm:$0xff]  ;;  %3543 = vmatprep.subr.bf16.mxu1 %v4582_v10  ;;  %v2933_v28 = vld [vmem:[%s6590_s1 + $0x2b0] sm:$0xff]  ;;  %v2936_v29 = vld [vmem:[%s6590_s1 + $0x2c8] sm:$0xff] }
  0x29   :  { %3465 = vmatpush1.bf16.msra.mxu0 %v3464_v13  ;;  %213 = vmatprep.mubr.f32.mxu0 %v6604_v3  ;;  %v3478_v55 = vpack.c.bf16 %v91_v48, %v89_v46  ;;  %v520_v13 = vld [vmem:[%s6592_s11 + $0xc8] sm:$0xff]  ;;  %v3494_v46 = vpack.c.bf16 %v2918_v38, %v2916_v34  ;;  %v2915_v48 = vld [vmem:[%s6590_s1 + $0x220] sm:$0xff]  ;;  %v2930_v12 = vld [vmem:[%s6590_s1 + $0x298] sm:$0xff] }
  0x2a   :  { %3467 = vmatprep.subr.bf16.mxu0 %v3466_v18  ;;  %v98_v18 = vld [vmem:[%s6590_s1 + $0xf0] sm:$0xff]  ;;  %v4612_v23 = vpack.c.bf16 %v522_v14, %v520_v13  ;;  %v3504_v13 = vpack.c.bf16 %v2925_v9, %v2923_v7  ;;  %v67_v14 = vld [vmem:[#allocation2 + $0x20] sm:$0xff]  ;;  %v2940_v38 = vld [vmem:[%s6590_s1 + $0x2e8] sm:$0xff] }
  0x2b   :  { %3545 = vmatpush1.bf16.msra.mxu1 %v4606_v21  ;;  %v2937_v34 = vld [vmem:[%s6590_s1 + $0x2d0] sm:$0xff]  ;;  %v2942_v40 = vld [vmem:[%s6590_s1 + $0x2f8] sm:$0xff]  ;;  %v318_v51 = vld [vmem:[#allocation2 + $0x22] sm:$0xff] }
  0x2c   :  { %214 = vmatmul.mubr.f32.gmra.mrb[4].mxu0 %v4379_v54  ;;  %v3476_v54 = vpack.c.bf16 %v86_v45, %v84_v44  ;;  %3547 = vmatprep.subr.bf16.mxu1 %v4612_v23  ;;  %v64_v44 = vld [vmem:[#allocation2] sm:$0xff]  ;;  %v3492_v45 = vpack.c.bf16 %v2913_v33, %v2911_v32  ;;  %v532_v53 = vld [vmem:[%s6592_s11 + $0x128] sm:$0xff]  ;;  %v542_v7 = vld [vmem:[%s6592_s11 + $0x178] sm:$0xff] }
  0x2d   :  { %3469 = vmatpush1.bf16.msra.mxu0 %v3468_v30  ;;  %219 = vmatprep.mubr.f32.mxu0 %v6604_v3  ;;  %v3488_v30 = vpack.c.bf16 %v98_v18, %v96_v17  ;;  %v2929_v17 = vld [vmem:[%s6590_s1 + $0x290] sm:$0xff]  ;;  %v2932_v18 = vld [vmem:[%s6590_s1 + $0x2a8] sm:$0xff]  ;;  %v2935_v33 = vld [vmem:[%s6590_s1 + $0x2c0] sm:$0xff] }
  0x2e   :  { %3471 = vmatprep.subr.bf16.mxu0 %v3470_v31  ;;  %v3490_v31 = vpack.c.bf16 %v2914_v22, %v2912_v20  ;;  %v2934_v20 = vld [vmem:[%s6590_s1 + $0x2b8] sm:$0xff]  ;;  %v3516_v41 = vpack.c.bf16 %v2937_v34, %v2935_v33  ;;  %v551_v34 = vld [vmem:[%s6592_s11 + $0x1c0] sm:$0xff] }
  0x2f   :  { %3549 = vmatpush1.bf16.msra.mxu1 %v4636_v36  ;;  %v3510_v26 = vpack.c.bf16 %v2934_v20, %v2932_v18  ;;  %v545_v18 = vld [vmem:[%s6592_s11 + $0x190] sm:$0xff] }
  0x30   :  { %220 = vmatmul.mubr.f32.gmra.mrb[6].mxu0 %v4381_v56  ;;  %v90_v56 = vld [vmem:[%s6590_s1 + $0xb0] sm:$0xff]  ;;  %3551 = vmatprep.subr.bf16.mxu1 %v4642_v39 }
  0x31   :  { %3473 = vmatpush1.bf16.msra.mxu0 %v3472_v42  ;;  %290 = vmatprep.mubr.f32.mxu0 %v6604_v3  ;;  %v3480_v2 = vpack.c.bf16 %v90_v56, %v88_v57  ;;  %v528_v42 = vld [vmem:[%s6592_s11 + $0x108] sm:$0xff]  ;;  %v529_v57 = vld [vmem:[%s6592_s11 + $0x110] sm:$0xff]  ;;  %v3496_v56 = vpack.c.bf16 %v2917_v50, %v2915_v48  ;;  %v317_v50 = vld [vmem:[#allocation2 + $0x1a] sm:$0xff] }
  0x32   :  { %3475 = vmatprep.subr.bf16.mxu0 %v3474_v43  ;;  %v530_v43 = vld [vmem:[%s6592_s11 + $0x118] sm:$0xff]  ;;  %v316_v48 = vld [vmem:[#allocation2 + $0xa] sm:$0xff] }
  0x33   :  { %3553 = vmatpush1.bf16.msra.mxu1 %v4666_v52 }
  0x35   :  { %3477 = vmatpush1.bf16.msra.mxu0 %v3476_v54  ;;  %v4672_v54 = vpack.c.bf16 %v530_v43, %v528_v42  ;;  %v3518_v42 = vpack.c.bf16 %v2942_v40, %v2940_v38  ;;  %v2939_v43 = vld [vmem:[%s6590_s1 + $0x2e0] sm:$0xff]  ;;  %v553_v38 = vld [vmem:[%s6592_s11 + $0x1d0] sm:$0xff] }
  0x36   :  { %3479 = vmatprep.subr.bf16.mxu0 %v3478_v55  ;;  %v527_v55 = vld [vmem:[%s6592_s11 + $0x100] sm:$0xff]  ;;  %v4862_v40 = vpack.c.bf16 %v553_v38, %v551_v34 }
  0x37   :  { %v4688_v0 = vpack.c.bf16 %v529_v57, %v527_v55  ;;  %3555 = vmatprep.subr.bf16.mxu1 %v4672_v54  ;;  %v534_v55 = vld [vmem:[%s6592_s11 + $0x138] sm:$0xff] }
  0x38   :  { %v4764_v57 = vpack.c.bf16 %v534_v55, %v532_v53 }
  0x39   :  { %3481 = vmatpush1.bf16.msra.mxu0 %v3480_v2  ;;  %v2926_v2 = vld [vmem:[%s6590_s1 + $0x278] sm:$0xff]  ;;  %3557 = vmatpush1.bf16.msra.mxu1 %v4688_v0 }
  0x3a   :  { %3483 = vmatprep.subr.bf16.mxu0 %v3482_v4  ;;  %v3500_v4 = vpack.c.bf16 %v2921_v63, %v2919_v62  ;;  %v3502_v6 = vpack.c.bf16 %v2926_v2, %v2924_v1  ;;  %3559 = vmatprep.subr.bf16.mxu1 %v4764_v57  ;;  %v536_v62 = vld [vmem:[%s6592_s11 + $0x148] sm:$0xff]  ;;  %v538_v63 = vld [vmem:[%s6592_s11 + $0x158] sm:$0xff]  ;;  %v535_v2 = vld [vmem:[%s6592_s11 + $0x140] sm:$0xff] }
  0x3b   :  { %v4782_v1 = vpack.c.bf16 %v538_v63, %v536_v62 }
  0x3d   :  { %3485 = vmatpush1.bf16.msra.mxu0 %v3484_v15  ;;  %v3506_v15 = vpack.c.bf16 %v2930_v12, %v2928_v11  ;;  %v539_v11 = vld [vmem:[%s6592_s11 + $0x160] sm:$0xff]  ;;  %v541_v12 = vld [vmem:[%s6592_s11 + $0x170] sm:$0xff] }
  0x3e   :  { %3487 = vmatprep.subr.bf16.mxu0 %v3486_v16  ;;  %v2927_v16 = vld [vmem:[%s6590_s1 + $0x280] sm:$0xff] }
  0x3f   :  { %v3508_v22 = vpack.c.bf16 %v2929_v17, %v2927_v16  ;;  %v543_v17 = vld [vmem:[%s6592_s11 + $0x180] sm:$0xff] }
  0x40   :  { %v4826_v20 = vpack.c.bf16 %v545_v18, %v543_v17 }
  0x41   :  { %3489 = vmatpush1.bf16.msra.mxu0 %v3488_v30  ;;  %v2938_v30 = vld [vmem:[%s6590_s1 + $0x2d8] sm:$0xff] }
  0x42   :  { %3491 = vmatprep.subr.bf16.mxu0 %v3490_v31  ;;  %v3512_v31 = vpack.c.bf16 %v2933_v28, %v2931_v27  ;;  %v3514_v32 = vpack.c.bf16 %v2938_v30, %v2936_v29  ;;  %v547_v28 = vld [vmem:[%s6592_s11 + $0x1a0] sm:$0xff]  ;;  %v549_v29 = vld [vmem:[%s6592_s11 + $0x1b0] sm:$0xff] }
  0x43   :  { %v4844_v30 = vpack.c.bf16 %v549_v29, %v547_v28 }
  0x44   :  { %291 = vmatmul.mubr.f32.vlgmr.msra.gmra.mrb[0].mxu0 %v64_v44  ;;  %v2941_v44 = vld [vmem:[%s6590_s1 + $0x2f0] sm:$0xff] }
  0x45   :  { %3493 = vmatpush1.bf16.msra.mxu0 %v3492_v45  ;;  %296 = vmatprep.mubr.f32.mxu0 %v6604_v3  ;;  %v3520_v45 = vpack.c.bf16 %v2941_v44, %v2939_v43  ;;  %v555_v43 = vld [vmem:[%s6592_s11 + $0x1e0] sm:$0xff] }
  0x46   :  { %3495 = vmatprep.subr.bf16.mxu0 %v3494_v46  ;;  %v315_v46 = vld [vmem:[#allocation2 + $0x2] sm:$0xff] }
  0x48   :  { %297 = vmatmul.mubr.f32.gmra.mrb[2].mxu0 %v65_v58  ;;  %v533_v58 = vld [vmem:[%s6592_s11 + $0x130] sm:$0xff] }
  0x49   :  { %3497 = vmatpush1.bf16.msra.mxu0 %v3496_v56  ;;  %302 = vmatprep.mubr.f32.mxu0 %v6604_v3  ;;  %v531_v56 = vld [vmem:[%s6592_s11 + $0x120] sm:$0xff] }
  0x4a   :  { %3499 = vmatprep.subr.bf16.mxu0 %v3498_v60  ;;  %v4772_v60 = vpack.c.bf16 %v533_v58, %v531_v56 }
  0x4c   :  { %303 = vmatmul.mubr.f32.gmra.mrb[4].mxu0 %v66_v5  ;;  %3561 = vmatpush1.bf16.msra.mxu1 %v4772_v60 }
  0x4d   :  { %3501 = vmatpush1.bf16.msra.mxu0 %v3500_v4  ;;  %308 = vmatprep.mubr.f32.mxu0 %v6604_v3  ;;  %v537_v4 = vld [vmem:[%s6592_s11 + $0x150] sm:$0xff] }
  0x4e   :  { %3503 = vmatprep.subr.bf16.mxu0 %v3502_v6  ;;  %v4790_v5 = vpack.c.bf16 %v537_v4, %v535_v2  ;;  %3563 = vmatprep.subr.bf16.mxu1 %v4782_v1  ;;  %v540_v6 = vld [vmem:[%s6592_s11 + $0x168] sm:$0xff] }
  0x4f   :  { %v4800_v9 = vpack.c.bf16 %v542_v7, %v540_v6 }
  0x50   :  { %309 = vmatmul.mubr.f32.gmra.mrb[6].mxu0 %v67_v14  ;;  %3565 = vmatpush1.bf16.msra.mxu1 %v4790_v5  ;;  %v544_v14 = vld [vmem:[%s6592_s11 + $0x188] sm:$0xff] }
  0x51   :  { %3505 = vmatpush1.bf16.msra.mxu0 %v3504_v13  ;;  %416 = vmatprep.mubr.f32.mxu0 %v6604_v3  ;;  %v4808_v13 = vpack.c.bf16 %v541_v12, %v539_v11 }
  0x52   :  { %3507 = vmatprep.subr.bf16.mxu0 %v3506_v15  ;;  %3567 = vmatprep.subr.bf16.mxu1 %v4800_v9  ;;  %v546_v15 = vld [vmem:[%s6592_s11 + $0x198] sm:$0xff] }
  0x53   :  { %v4818_v16 = vpack.c.bf16 %v546_v15, %v544_v14 }
  0x54   :  { %3569 = vmatpush1.bf16.msra.mxu1 %v4808_v13 }
  0x55   :  { %3509 = vmatpush1.bf16.msra.mxu0 %v3508_v22  ;;  %3571 = vmatprep.subr.bf16.mxu1 %v4818_v16  ;;  %v548_v22 = vld [vmem:[%s6592_s11 + $0x1a8] sm:$0xff] }
  0x56   :  { %3511 = vmatprep.subr.bf16.mxu0 %v3510_v26  ;;  %v550_v26 = vld [vmem:[%s6592_s11 + $0x1b8] sm:$0xff] }
  0x57   :  { %v4836_v27 = vpack.c.bf16 %v550_v26, %v548_v22 }
  0x58   :  { %3573 = vmatpush1.bf16.msra.mxu1 %v4826_v20 }
  0x59   :  { %3513 = vmatpush1.bf16.msra.mxu0 %v3512_v31  ;;  %3575 = vmatprep.subr.bf16.mxu1 %v4836_v27  ;;  %v552_v31 = vld [vmem:[%s6592_s11 + $0x1c8] sm:$0xff] }
  0x5a   :  { %3515 = vmatprep.subr.bf16.mxu0 %v3514_v32  ;;  %v554_v32 = vld [vmem:[%s6592_s11 + $0x1d8] sm:$0xff] }
  0x5b   :  { %v4854_v33 = vpack.c.bf16 %v554_v32, %v552_v31 }
  0x5c   :  { %3577 = vmatpush1.bf16.msra.mxu1 %v4844_v30 }
  0x5d   :  { %3517 = vmatpush1.bf16.msra.mxu0 %v3516_v41  ;;  %3579 = vmatprep.subr.bf16.mxu1 %v4854_v33  ;;  %v556_v41 = vld [vmem:[%s6592_s11 + $0x1e8] sm:$0xff] }
  0x5e   :  { %3519 = vmatprep.subr.bf16.mxu0 %v3518_v42  ;;  %v558_v42 = vld [vmem:[%s6592_s11 + $0x1f8] sm:$0xff] }
  0x5f   :  { %v4875_v44 = vpack.c.bf16 %v558_v42, %v556_v41 }
  0x60   :  { %3581 = vmatpush1.bf16.msra.mxu1 %v4862_v40 }
  0x61   :  { %3521 = vmatpush1.bf16.msra.mxu0 %v3520_v45  ;;  %v557_v45 = vld [vmem:[%s6592_s11 + $0x1f0] sm:$0xff]  ;;  %3583 = vmatprep.subr.bf16.mxu1 %v4875_v44 }
  0x64   :  { %417 = vmatmul.mubr.f32.vlgmr.msra.gmra.mrb[0].mxu0 %v315_v46  ;;  %v4880_v46 = vpack.c.bf16 %v557_v45, %v555_v43 }
  0x65   :  { %422 = vmatprep.mubr.f32.mxu0 %v6604_v3 }
  0x66   :  { %3585 = vmatpush1.bf16.msra.mxu1 %v4880_v46 }
  0x67   :  { %3587 = vmatprep.subr.bf16.mxu1 %v4440_v19 }
  0x68   :  { %423 = vmatmul.mubr.f32.gmra.mrb[2].mxu0 %v316_v48 }
  0x69   :  { %428 = vmatprep.mubr.f32.mxu0 %v6604_v3 }
  0x6c   :  { %429 = vmatmul.mubr.f32.gmra.mrb[4].mxu0 %v317_v50 }
  0x6d   :  { %434 = vmatprep.mubr.f32.mxu0 %v6604_v3 }
  0x70   :  { %435 = vmatmul.mubr.f32.gmra.mrb[6].mxu0 %v318_v51 }
 0x137   :  { %v4885_v48 = vpop.f32.mrb[0].mxu0 }
 0x138   :  { %v4887_v50 = vpop.f32.mrb[1].mxu0  ;;  %v469_v53 = vmul.f32 %v4885_v48, %v4885_v48 }
 0x139   :  { %v470_v19 = vmul.f32 %v4887_v50, %v4887_v50 }
 0x13b   :  { %v4889_v51 = vpop.f32.mrb[2].mxu0 }
 0x13c   :  { %v451_v55 = vadd.f32 %v4889_v51, %v4885_v48  ;;  %v471_v56 = vmul.f32 %v4889_v51, %v4889_v51  ;;  %v4897_v58 = vpop.f32.mrb[3].mxu0 }
 0x13d   :  { %v460_v62 = vadd.f32 %v4897_v58, %v4887_v50  ;;  %v472_v63 = vmul.f32 %v4897_v58, %v4897_v58 }
 0x13e   :  { %v477_v2 = vadd.f32 %v471_v56, %v469_v53 }
 0x13f   :  { %v486_v4 = vadd.f32 %v472_v63, %v470_v19  ;;  %v4905_v6 = vpop.f32.mrb[4].mxu0 }
 0x140   :  { %v452_v7 = vadd.f32 %v451_v55, %v4905_v6  ;;  %v473_v11 = vmul.f32 %v4905_v6, %v4905_v6  ;;  %v4910_v12 = vpop.f32.mrb[5].mxu0 }
 0x141   :  { %v461_v14 = vadd.f32 %v460_v62, %v4910_v12  ;;  %v474_v15 = vmul.f32 %v4910_v12, %v4910_v12 }
 0x142   :  { %v478_v17 = vadd.f32 %v477_v2, %v473_v11 }
 0x143   :  { %v487_v18 = vadd.f32 %v486_v4, %v474_v15  ;;  %v4915_v22 = vpop.f32.mrb[6].mxu0 }
 0x144   :  { %v453_v26 = vadd.f32 %v452_v7, %v4915_v22  ;;  %v475_v28 = vmul.f32 %v4915_v22, %v4915_v22  ;;  %v4920_v29 = vpop.f32.mrb[7].mxu0 }
 0x145   :  { %6614 = vst [vmem:[#allocation5_spill] sm:$0xff] %v4920_v29  ;;  %v462_v31 = vadd.f32 %v461_v14, %v4920_v29  ;;  %v476_v32 = vmul.f32 %v4920_v29, %v4920_v29 }
 0x146   :  { %v454_v34 = vrot.slane %v453_v26, 4  ;;  %v479_v38 = vadd.f32 %v478_v17, %v475_v28 }
 0x147   :  { %v463_v41 = vrot.slane %v462_v31, 4  ;;  %v488_v42 = vadd.f32 %v487_v18, %v476_v32  ;;  %v2959_v18 = vld [vmem:[%s6593_s4 + $0x280] sm:$0xff] }
 0x148   :  { %v455_v43 = vadd.f32 %v454_v34, %v453_v26  ;;  %v2961_v26 = vld [vmem:[%s6593_s4 + $0x290] sm:$0xff]  ;;  %v2963_v34 = vld [vmem:[%s6593_s4 + $0x2a0] sm:$0xff] }
 0x149   :  { %v489_v45 = vrot.slane %v488_v42, 4  ;;  %v464_v53 = vadd.f32 %v463_v41, %v462_v31  ;;  %v3668_v28 = vpack.c.bf16 %v2961_v26, %v2959_v18  ;;  %v2966_v31 = vld [vmem:[%s6593_s4 + $0x2b8] sm:$0xff]  ;;  %v3000_v26 = vld [vmem:[%s6593_s4 + $0x3c8] sm:$0xff] }
 0x14a   :  { %v456_v55 = vrot.slane %v455_v43, 2 }
 0x14b   :  { %v490_v56 = vadd.f32 %v489_v45, %v488_v42  ;;  %v465_v19 = vrot.slane %v464_v53, 2  ;;  %v2968_v42 = vld [vmem:[%s6593_s4 + $0x2c8] sm:$0xff] }
 0x14c   :  { %v457_v62 = vadd.f32 %v456_v55, %v455_v43  ;;  %v2970_v43 = vld [vmem:[%s6593_s4 + $0x2d8] sm:$0xff]  ;;  %v2969_v55 = vld [vmem:[%s6593_s4 + $0x2d0] sm:$0xff] }
 0x14d   :  { %v466_v63 = vadd.f32 %v465_v19, %v464_v53  ;;  %v491_v2 = vrot.slane %v490_v56, 2  ;;  %v3674_v45 = vpack.c.bf16 %v2970_v43, %v2968_v42  ;;  %v2967_v53 = vld [vmem:[%s6593_s4 + $0x2c0] sm:$0xff]  ;;  %v2972_v19 = vld [vmem:[%s6593_s4 + $0x2e8] sm:$0xff]  ;;  %v3006_v42 = vld [vmem:[%s6593_s4 + $0x3f8] sm:$0xff] }
 0x14e   :  { %v458_v4 = vrot.slane %v457_v62, 1  ;;  %v3003_v43 = vld [vmem:[%s6593_s4 + $0x3e0] sm:$0xff] }
 0x14f   :  { %v467_v7 = vrot.slane %v466_v63, 1  ;;  %v492_v11 = vadd.f32 %v491_v2, %v490_v56  ;;  %v3676_v56 = vpack.c.bf16 %v2969_v55, %v2967_v53  ;;  %v2971_v2 = vld [vmem:[%s6593_s4 + $0x2e0] sm:$0xff] }
 0x150   :  { %v459_v3 = vadd.f32 %v458_v4, %v457_v62  ;;  %v2974_v62 = vld [vmem:[%s6593_s4 + $0x2f8] sm:$0xff]  ;;  %v2973_v4 = vld [vmem:[%s6593_s4 + $0x2f0] sm:$0xff] }
 0x151   :  { %v468_v14 = vadd.f32 %v467_v7, %v466_v63  ;;  %v493_v15 = vrot.slane %v492_v11, 1  ;;  %v3678_v63 = vpack.c.bf16 %v2974_v62, %v2972_v19  ;;  %v3680_v7 = vpack.c.bf16 %v2973_v4, %v2971_v2  ;;  %v868_v19 = vld [vmem:[%s6593_s4 + $0x18] sm:$0xff] }
 0x153   :  { %623 = vmatprep.mubr.f32.mxu1 %v468_v14  ;;  %v494_v29 = vadd.f32 %v493_v15, %v492_v11  ;;  %v2976_v11 = vld [vmem:[%s6593_s4 + $0x308] sm:$0xff]  ;;  %v2978_v14 = vld [vmem:[%s6593_s4 + $0x318] sm:$0xff] }
 0x154   :  { %624 = vmatmul.mubr.f32.vlgmr.msra.gmra.mrb[0].mxu1 %v459_v3  ;;  %v480_v3 = vrot.slane %v479_v38, 4  ;;  %v3682_v15 = vpack.c.bf16 %v2978_v14, %v2976_v11 }
 0x155   :  { %3589 = vmatpush1.bf16.msra.mxu1 %v4454_v24  ;;  %694 = vmatprep.mubr.f32.mxu1 %v494_v29  ;;  %v2964_v29 = vld [vmem:[%s6593_s4 + $0x2a8] sm:$0xff] }
 0x156   :  { %3591 = vmatprep.subr.bf16.mxu1 %v4456_v25  ;;  %v481_v24 = vadd.f32 %v480_v3, %v479_v38  ;;  %v3670_v32 = vpack.c.bf16 %v2966_v31, %v2964_v29  ;;  %v2965_v38 = vld [vmem:[%s6593_s4 + $0x2b0] sm:$0xff]  ;;  %v2975_v3 = vld [vmem:[%s6593_s4 + $0x300] sm:$0xff] }
 0x157   :  { %v3672_v41 = vpack.c.bf16 %v2965_v38, %v2963_v34  ;;  %v2999_v31 = vld [vmem:[%s6593_s4 + $0x3c0] sm:$0xff]  ;;  %v3004_v34 = vld [vmem:[%s6593_s4 + $0x3e8] sm:$0xff]  ;;  %v6615_v38 = vmov 0.0  }
 0x158   :  { %v482_v25 = vrot.slane %v481_v24, 2  ;;  %v3710_v53 = vpack.c.bf16 %v3006_v42, %v3004_v34 }
 0x159   :  { %3593 = vmatpush1.bf16.msra.mxu1 %v4482_v35 }
 0x15a   :  { %3595 = vmatprep.subr.bf16.mxu1 %v4488_v37  ;;  %v483_v35 = vadd.f32 %v482_v25, %v481_v24  ;;  %v2977_v24 = vld [vmem:[%s6593_s4 + $0x310] sm:$0xff] }
 0x15b   :  { %v3684_v25 = vpack.c.bf16 %v2977_v24, %v2975_v3 }
 0x15c   :  { %v484_v37 = vrot.slane %v483_v35, 1 }
 0x15d   :  { %3597 = vmatpush1.bf16.msra.mxu1 %v4514_v47 }
 0x15e   :  { %3599 = vmatprep.subr.bf16.mxu1 %v4520_v49  ;;  %v485_v47 = vadd.f32 %v484_v37, %v483_v35  ;;  %v2944_v49 = vld [vmem:[%s6593_s4 + $0x208] sm:$0xff]  ;;  %v2982_v37 = vld [vmem:[%s6593_s4 + $0x338] sm:$0xff] }
 0x15f   :  { %v2980_v35 = vld [vmem:[%s6593_s4 + $0x328] sm:$0xff] }
 0x161   :  { %3601 = vmatpush1.bf16.msra.mxu1 %v4546_v59  ;;  %v2946_v59 = vld [vmem:[%s6593_s4 + $0x218] sm:$0xff] }
 0x162   :  { %3603 = vmatprep.subr.bf16.mxu1 %v4552_v61  ;;  %v2943_v61 = vld [vmem:[%s6593_s4 + $0x200] sm:$0xff] }
 0x165   :  { %3605 = vmatpush1.bf16.msra.mxu1 %v4576_v8  ;;  %v3650_v8 = vpack.c.bf16 %v2946_v59, %v2944_v49  ;;  %v2979_v49 = vld [vmem:[%s6593_s4 + $0x320] sm:$0xff]  ;;  %v2981_v59 = vld [vmem:[%s6593_s4 + $0x330] sm:$0xff] }
 0x166   :  { %3607 = vmatprep.subr.bf16.mxu1 %v4582_v10  ;;  %v2945_v10 = vld [vmem:[%s6593_s4 + $0x210] sm:$0xff] }
 0x167   :  { %3651 = vmatprep.subr.bf16.mxu0 %v3650_v8  ;;  %v2984_v8 = vld [vmem:[%s6593_s4 + $0x348] sm:$0xff] }
 0x169   :  { %3609 = vmatpush1.bf16.msra.mxu1 %v4606_v21  ;;  %v2948_v21 = vld [vmem:[%s6593_s4 + $0x228] sm:$0xff] }
 0x16a   :  { %3611 = vmatprep.subr.bf16.mxu1 %v4612_v23  ;;  %v2950_v23 = vld [vmem:[%s6593_s4 + $0x238] sm:$0xff] }
 0x16d   :  { %3613 = vmatpush1.bf16.msra.mxu1 %v4636_v36  ;;  %v3652_v36 = vpack.c.bf16 %v2945_v10, %v2943_v61  ;;  %v3688_v61 = vpack.c.bf16 %v2981_v59, %v2979_v49  ;;  %v2986_v10 = vld [vmem:[%s6593_s4 + $0x358] sm:$0xff]  ;;  %v6617_v49 = vld [vmem:[#allocation5_spill] sm:$0xff] }
 0x16e   :  { %3615 = vmatprep.subr.bf16.mxu1 %v4642_v39  ;;  %v3654_v39 = vpack.c.bf16 %v2950_v23, %v2948_v21  ;;  %v3690_v21 = vpack.c.bf16 %v2986_v10, %v2984_v8  ;;  %v2983_v23 = vld [vmem:[%s6593_s4 + $0x340] sm:$0xff] }
 0x16f   :  { %3653 = vmatpush1.bf16.msra.mxu0 %v3652_v36  ;;  %v2985_v36 = vld [vmem:[%s6593_s4 + $0x350] sm:$0xff] }
 0x170   :  { %3655 = vmatprep.subr.bf16.mxu0 %v3654_v39  ;;  %v3692_v39 = vpack.c.bf16 %v2985_v36, %v2983_v23 }
 0x171   :  { %3617 = vmatpush1.bf16.msra.mxu1 %v4666_v52  ;;  %v2947_v52 = vld [vmem:[%s6593_s4 + $0x220] sm:$0xff] }
 0x172   :  { %3619 = vmatprep.subr.bf16.mxu1 %v4672_v54  ;;  %v2949_v54 = vld [vmem:[%s6593_s4 + $0x230] sm:$0xff] }
 0x175   :  { %3621 = vmatpush1.bf16.msra.mxu1 %v4688_v0  ;;  %v2952_v0 = vld [vmem:[%s6593_s4 + $0x248] sm:$0xff] }
 0x176   :  { %3623 = vmatprep.subr.bf16.mxu1 %v4764_v57  ;;  %v2954_v57 = vld [vmem:[%s6593_s4 + $0x258] sm:$0xff] }
 0x179   :  { %3625 = vmatpush1.bf16.msra.mxu1 %v4772_v60  ;;  %v3656_v60 = vpack.c.bf16 %v2949_v54, %v2947_v52  ;;  %v2988_v52 = vld [vmem:[%s6593_s4 + $0x368] sm:$0xff]  ;;  %v2990_v54 = vld [vmem:[%s6593_s4 + $0x378] sm:$0xff] }
 0x17a   :  { %3627 = vmatprep.subr.bf16.mxu1 %v4782_v1  ;;  %v3658_v1 = vpack.c.bf16 %v2954_v57, %v2952_v0  ;;  %v3694_v0 = vpack.c.bf16 %v2990_v54, %v2988_v52  ;;  %v2987_v57 = vld [vmem:[%s6593_s4 + $0x360] sm:$0xff] }
 0x17b   :  { %3657 = vmatpush1.bf16.msra.mxu0 %v3656_v60  ;;  %v2989_v60 = vld [vmem:[%s6593_s4 + $0x370] sm:$0xff] }
 0x17c   :  { %3659 = vmatprep.subr.bf16.mxu0 %v3658_v1  ;;  %v3696_v1 = vpack.c.bf16 %v2989_v60, %v2987_v57 }
 0x17d   :  { %3629 = vmatpush1.bf16.msra.mxu1 %v4790_v5  ;;  %v2951_v5 = vld [vmem:[%s6593_s4 + $0x240] sm:$0xff] }
 0x17e   :  { %3631 = vmatprep.subr.bf16.mxu1 %v4800_v9  ;;  %v2953_v9 = vld [vmem:[%s6593_s4 + $0x250] sm:$0xff] }
 0x181   :  { %3633 = vmatpush1.bf16.msra.mxu1 %v4808_v13  ;;  %v2956_v13 = vld [vmem:[%s6593_s4 + $0x268] sm:$0xff] }
 0x182   :  { %3635 = vmatprep.subr.bf16.mxu1 %v4818_v16  ;;  %v2958_v16 = vld [vmem:[%s6593_s4 + $0x278] sm:$0xff] }
 0x185   :  { %3637 = vmatpush1.bf16.msra.mxu1 %v4826_v20  ;;  %v3660_v20 = vpack.c.bf16 %v2953_v9, %v2951_v5  ;;  %v2992_v5 = vld [vmem:[%s6593_s4 + $0x388] sm:$0xff]  ;;  %v2994_v9 = vld [vmem:[%s6593_s4 + $0x398] sm:$0xff] }
 0x186   :  { %3639 = vmatprep.subr.bf16.mxu1 %v4836_v27  ;;  %v3662_v27 = vpack.c.bf16 %v2958_v16, %v2956_v13  ;;  %v3698_v13 = vpack.c.bf16 %v2994_v9, %v2992_v5  ;;  %v2991_v16 = vld [vmem:[%s6593_s4 + $0x380] sm:$0xff] }
 0x187   :  { %3661 = vmatpush1.bf16.msra.mxu0 %v3660_v20  ;;  %v2993_v20 = vld [vmem:[%s6593_s4 + $0x390] sm:$0xff] }
 0x188   :  { %3663 = vmatprep.subr.bf16.mxu0 %v3662_v27  ;;  %v3700_v27 = vpack.c.bf16 %v2993_v20, %v2991_v16 }
 0x189   :  { %3641 = vmatpush1.bf16.msra.mxu1 %v4844_v30  ;;  %v2955_v30 = vld [vmem:[%s6593_s4 + $0x260] sm:$0xff] }
 0x18a   :  { %3643 = vmatprep.subr.bf16.mxu1 %v4854_v33  ;;  %v2957_v33 = vld [vmem:[%s6593_s4 + $0x270] sm:$0xff] }
 0x18d   :  { %3645 = vmatpush1.bf16.msra.mxu1 %v4862_v40  ;;  %v2960_v40 = vld [vmem:[%s6593_s4 + $0x288] sm:$0xff] }
 0x18e   :  { %3647 = vmatprep.subr.bf16.mxu1 %v4875_v44  ;;  %v2962_v44 = vld [vmem:[%s6593_s4 + $0x298] sm:$0xff] }
 0x18f   :  { %v3666_v17 = vpack.c.bf16 %v2962_v44, %v2960_v40  ;;  %v2995_v44 = vld [vmem:[%s6593_s4 + $0x3a0] sm:$0xff] }
 0x191   :  { %3649 = vmatpush1.bf16.msra.mxu1 %v4880_v46  ;;  %v3664_v46 = vpack.c.bf16 %v2957_v33, %v2955_v30  ;;  %v2996_v30 = vld [vmem:[%s6593_s4 + $0x3a8] sm:$0xff]  ;;  %v2998_v33 = vld [vmem:[%s6593_s4 + $0x3b8] sm:$0xff] }
 0x192   :  { %v3702_v40 = vpack.c.bf16 %v2998_v33, %v2996_v30 }
 0x193   :  { %3665 = vmatpush1.bf16.msra.mxu0 %v3664_v46  ;;  %v2997_v46 = vld [vmem:[%s6593_s4 + $0x3b0] sm:$0xff] }
 0x194   :  { %695 = vmatmul.mubr.f32.vlgmr.msra.gmra.mrb[2].mxu1 %v485_v47  ;;  %3667 = vmatprep.subr.bf16.mxu0 %v3666_v17  ;;  %v3686_v47 = vpack.c.bf16 %v2982_v37, %v2980_v35  ;;  %v6607_v17 = vlaneseq  ;;  %v3704_v18 = vpack.c.bf16 %v2997_v46, %v2995_v44 }
 0x196   :  { %vm799_vm0 = vcmp.lt.s32.totalorder %v6607_v17, 256 }
 0x197   :  { %3669 = vmatpush1.bf16.msra.mxu0 %v3668_v28  ;;  %v3002_v28 = vld [vmem:[%s6593_s4 + $0x3d8] sm:$0xff]  ;;  %801 = vst.msk [vmem:[#allocation3] ss:$8 sm:$0x3] %vm799_vm0, %v6615_v38 }
 0x198   :  { %3671 = vmatprep.subr.bf16.mxu0 %v3670_v32  ;;  %v3706_v29 = vpack.c.bf16 %v3002_v28, %v3000_v26  ;;  %v3001_v32 = vld [vmem:[%s6593_s4 + $0x3d0] sm:$0xff]  ;;  %804 = vst.msk [vmem:[#allocation3 + $0x30] ss:$8 sm:$0x3] %vm799_vm0, %v6615_v38 }
 0x199   :  { %807 = vst.msk [vmem:[#allocation3 + $0x21] ss:$8 sm:$0x3] %vm799_vm0, %v6615_v38  ;;  %810 = vst.msk [vmem:[#allocation3 + $0x51] ss:$8 sm:$0x3] %vm799_vm0, %v6615_v38 }
 0x19b   :  { %3673 = vmatpush1.bf16.msra.mxu0 %v3672_v41  ;;  %v3708_v41 = vpack.c.bf16 %v3001_v32, %v2999_v31 }
 0x19c   :  { %3675 = vmatprep.subr.bf16.mxu0 %v3674_v45  ;;  %v3005_v45 = vld [vmem:[%s6593_s4 + $0x3f0] sm:$0xff] }
 0x19d   :  { %v3712_v55 = vpack.c.bf16 %v3005_v45, %v3003_v43 }
 0x19f   :  { %3677 = vmatpush1.bf16.msra.mxu0 %v3676_v56  ;;  %v866_v56 = vld [vmem:[%s6593_s4 + $0x8] sm:$0xff] }
 0x1a0   :  { %3679 = vmatprep.subr.bf16.mxu0 %v3678_v63  ;;  %v3714_v62 = vpack.c.bf16 %v868_v19, %v866_v56  ;;  %v5160_v63 = vshrl.u32 %v6607_v17, 7 }
 0x1a2   :  { %6616 = vst [vmem:[#allocation6_spill] sm:$0xff] %v5160_v63  ;;  %v5163_v2 = vsub.s32 0, %v5160_v63 }
 0x1a3   :  { %3681 = vmatpush1.bf16.msra.mxu0 %v3680_v7 }
 0x1a4   :  { %3683 = vmatprep.subr.bf16.mxu0 %v3682_v15 }
 0x1a7   :  { %3685 = vmatpush1.bf16.msra.mxu0 %v3684_v25 }
 0x1a8   :  { %3687 = vmatprep.subr.bf16.mxu0 %v3686_v47 }
 0x1ab   :  { %3689 = vmatpush1.bf16.msra.mxu0 %v3688_v61 }
 0x1ac   :  { %3691 = vmatprep.subr.bf16.mxu0 %v3690_v21 }
 0x1af   :  { %3693 = vmatpush1.bf16.msra.mxu0 %v3692_v39 }
 0x1b0   :  { %3695 = vmatprep.subr.bf16.mxu0 %v3694_v0 }
 0x1b3   :  { %3697 = vmatpush1.bf16.msra.mxu0 %v3696_v1 }
 0x1b4   :  { %3699 = vmatprep.subr.bf16.mxu0 %v3698_v13 }
 0x1b7   :  { %3701 = vmatpush1.bf16.msra.mxu0 %v3700_v27 }
 0x1b8   :  { %3703 = vmatprep.subr.bf16.mxu0 %v3702_v40 }
 0x1bb   :  { %3705 = vmatpush1.bf16.msra.mxu0 %v3704_v18 }
 0x1bc   :  { %3707 = vmatprep.subr.bf16.mxu0 %v3706_v29 }
 0x1bf   :  { %3709 = vmatpush1.bf16.msra.mxu0 %v3708_v41 }
 0x1c0   :  { %3711 = vmatprep.subr.bf16.mxu0 %v3710_v53 }
 0x1c3   :  { %3713 = vmatpush1.bf16.msra.mxu0 %v3712_v55 }
 0x1c4   :  { %3715 = vmatprep.subr.bf16.mxu0 %v3714_v62 }
 0x227   :  { %v625_v4 = vpop.f32.mrb[0].mxu1 }
 0x228   :  { %v710_v7 = vrot.slane %v625_v4, %v5163_v2  ;;  %v627_v11 = vpop.f32.mrb[1].mxu1  ;;  %v701_v61 = vmul.f32 %v625_v4, %v625_v4 }
 0x229   :  { %v714_v14 = vrot.slane %v627_v11, %v5163_v2  ;;  %v702_v8 = vmul.f32 %v627_v11, %v627_v11 }
 0x22a   :  { %v715_v15 = vsub.f32 %v4885_v48, %v710_v7  ;;  %v717_v3 = vsub.f32 %v4889_v51, %v710_v7  ;;  %v719_v24 = vsub.f32 %v4905_v6, %v710_v7  ;;  %v721_v25 = vsub.f32 %v4915_v22, %v710_v7 }
 0x22b   :  { %v716_v35 = vsub.f32 %v4887_v50, %v714_v14  ;;  %v718_v37 = vsub.f32 %v4897_v58, %v714_v14  ;;  %v720_v47 = vsub.f32 %v4910_v12, %v714_v14  ;;  %v722_v59 = vsub.f32 %v6617_v49, %v714_v14  ;;  %v449_v50 = vld [vmem:[%s6594_s2] sm:$0x3] }
 0x22c   :  { %v5179_v58 = vsub.s32 1, %v5160_v63  ;;  %v450_v12 = vld [vmem:[%s6595_s3] sm:$0x3]  ;;  %v747_v0 = vrot.slane %v449_v50, %v5163_v2 }
 0x22d   :  { %v766_v57 = vrot.slane %v450_v12, %v5163_v2 }
 0x22e   :  { %6618 = vst [vmem:[#allocation5_spill] sm:$0xff] %v5179_v58  ;;  %v751_v1 = vrot.slane %v449_v50, %v5179_v58  ;;  %v770_v5 = vrot.slane %v450_v12, %v5179_v58 }
 0x267   :  { %v696_v10 = vpop.f32.mrb[2].mxu1 }
 0x268   :  { %v703_v21 = vsub.f32 %v696_v10, %v701_v61  ;;  %v698_v23 = vpop.f32.mrb[3].mxu1 }
 0x269   :  { %v704_v48 = vsub.f32 %v698_v23, %v702_v8 }
 0x26a   :  { %v705_v36 = vmax.f32 %v703_v21, 0.0 }
 0x26b   :  { %v706_v51 = vmax.f32 %v704_v48, 0.0 }
 0x26c   :  { %v723_v39 = vadd.f32 1e-05, %v705_v36 }
 0x26d   :  { %v724_v6 = vadd.f32 1e-05, %v706_v51 }
 0x26e   :  { %4183 = vrsqrt.f32 %v723_v39 }
 0x26f   :  { %4185 = vrsqrt.f32 %v724_v6 }
 0x278   :  { %v4184_v22 = vpop.eup %4183 }
 0x279   :  { %v4186_v52 = vpop.eup %4185  ;;  %v730_v54 = vrot.slane %v4184_v22, %v5163_v2 }
 0x27a   :  { %v734_v60 = vrot.slane %v4186_v52, %v5163_v2  ;;  %v865_v52 = vld [vmem:[%s6593_s4] sm:$0xff] }
 0x27b   :  { %v735_v9 = vmul.f32 %v730_v54, %v715_v15  ;;  %v737_v13 = vmul.f32 %v730_v54, %v717_v3  ;;  %v739_v16 = vmul.f32 %v730_v54, %v719_v24  ;;  %v741_v20 = vmul.f32 %v730_v54, %v721_v25 }
 0x27c   :  { %v736_v27 = vmul.f32 %v734_v60, %v716_v35  ;;  %v738_v30 = vmul.f32 %v734_v60, %v718_v37  ;;  %v740_v33 = vmul.f32 %v734_v60, %v720_v47  ;;  %v742_v40 = vmul.f32 %v734_v60, %v722_v59 }
 0x27d   :  { %v754_v44 = vmul.f32 %v747_v0, %v735_v9  ;;  %v756_v46 = vmul.f32 %v747_v0, %v737_v13  ;;  %v758_v18 = vmul.f32 %v747_v0, %v739_v16  ;;  %v760_v26 = vmul.f32 %v747_v0, %v741_v20  ;;  %v867_v0 = vld [vmem:[%s6593_s4 + $0x10] sm:$0xff]  ;;  %v872_v9 = vld [vmem:[%s6593_s4 + $0x38] sm:$0xff] }
 0x27e   :  { %v755_v28 = vmul.f32 %v751_v1, %v736_v27  ;;  %v757_v29 = vmul.f32 %v751_v1, %v738_v30  ;;  %v759_v31 = vmul.f32 %v751_v1, %v740_v33  ;;  %v761_v32 = vmul.f32 %v751_v1, %v742_v40 }
 0x27f   :  { %v773_v34 = vadd.f32 %v766_v57, %v754_v44  ;;  %v775_v41 = vadd.f32 %v766_v57, %v756_v46  ;;  %v777_v42 = vadd.f32 %v766_v57, %v758_v18  ;;  %v779_v43 = vadd.f32 %v766_v57, %v760_v26  ;;  %v870_v57 = vld [vmem:[%s6593_s4 + $0x28] sm:$0xff]  ;;  %v869_v18 = vld [vmem:[%s6593_s4 + $0x20] sm:$0xff]  ;;  %v871_v26 = vld [vmem:[%s6593_s4 + $0x30] sm:$0xff] }
 0x280   :  { %v774_v45 = vadd.f32 %v770_v5, %v755_v28  ;;  %v776_v53 = vadd.f32 %v770_v5, %v757_v29  ;;  %v778_v55 = vadd.f32 %v770_v5, %v759_v31  ;;  %v780_v56 = vadd.f32 %v770_v5, %v761_v32  ;;  %v874_v31 = vld [vmem:[%s6593_s4 + $0x48] sm:$0xff]  ;;  %v876_v32 = vld [vmem:[%s6593_s4 + $0x58] sm:$0xff] }
 0x281   :  { %v781_v19 = vmul.f32 0.01, %v773_v34  ;;  %v783_v62 = vmul.f32 0.01, %v775_v41  ;;  %v785_v4 = vmul.f32 0.01, %v777_v42  ;;  %v3716_v33 = vpack.c.bf16 %v867_v0, %v865_v52 }
 0x282   :  { %v787_v7 = vmul.f32 0.01, %v779_v43  ;;  %v782_v11 = vmul.f32 0.01, %v774_v45  ;;  %v784_v14 = vmul.f32 0.01, %v776_v53  ;;  %v3718_v46 = vpack.c.bf16 %v872_v9, %v870_v57 }
 0x283   :  { %v789_v15 = vmax.f32 %v773_v34, %v781_v19  ;;  %v791_v3 = vmax.f32 %v775_v41, %v783_v62  ;;  %v793_v24 = vmax.f32 %v777_v42, %v785_v4  ;;  %v786_v25 = vmul.f32 0.01, %v778_v55  ;;  %v875_v19 = vld [vmem:[%s6593_s4 + $0x50] sm:$0xff]  ;;  %v886_v52 = vld [vmem:[%s6593_s4 + $0xa8] sm:$0xff]  ;;  %v885_v0 = vld [vmem:[%s6593_s4 + $0xa0] sm:$0xff] }
 0x284   :  { %v795_v35 = vmax.f32 %v779_v43, %v787_v7  ;;  %v788_v37 = vmul.f32 0.01, %v780_v56  ;;  %v790_v47 = vmax.f32 %v774_v45, %v782_v11  ;;  %v792_v49 = vmax.f32 %v776_v53, %v784_v14  ;;  %v878_v7 = vld [vmem:[%s6593_s4 + $0x68] sm:$0xff]  ;;  %v880_v11 = vld [vmem:[%s6593_s4 + $0x78] sm:$0xff]  ;;  %v887_v57 = vld [vmem:[%s6593_s4 + $0xb0] sm:$0xff] }
 0x285   :  { %v821_v59 = vrot.slane %v789_v15, 7  ;;  %v823_v61 = vrot.slane %v791_v3, 7  ;;  %v827_v8 = vrot.slane %v793_v24, 7  ;;  %v794_v10 = vmax.f32 %v778_v55, %v786_v25 }
 0x286   :  { %v829_v21 = vrot.slane %v795_v35, 7  ;;  %v796_v23 = vmax.f32 %v780_v56, %v788_v37  ;;  %v822_v48 = vrot.slane %v790_v47, 7  ;;  %v825_v36 = vrot.slane %v792_v49, 7  ;;  %v873_v56 = vld [vmem:[%s6593_s4 + $0x40] sm:$0xff]  ;;  %v879_v47 = vld [vmem:[%s6593_s4 + $0x70] sm:$0xff] }
 0x287   :  { %v5191_v51 = vsel %vm820_vm1, %v821_v59, %v823_v61  ;;  %845 = vst [vmem:[#allocation3] sm:$0xfe] %v821_v59  ;;  %849 = vst [vmem:[#allocation3 + $0x20] sm:$0x1] %v823_v61  ;;  %v828_v39 = vrot.slane %v794_v10, 7  ;;  %v3720_v43 = vpack.c.bf16 %v871_v26, %v869_v18  ;;  %v3722_v55 = vpack.c.bf16 %v876_v32, %v874_v31  ;;  %v877_v37 = vld [vmem:[%s6593_s4 + $0x60] sm:$0xff] }
 0x288   :  { %851 = vst [vmem:[#allocation3 + $0x30] sm:$0xfe] %v827_v8  ;;  %v5194_v6 = vsel %vm820_vm1, %v827_v8, %v829_v21  ;;  %855 = vst [vmem:[#allocation3 + $0x50] sm:$0x1] %v829_v21  ;;  %v5197_v50 = vsel %vm820_vm1, %v822_v48, %v825_v36  ;;  %v831_v12 = vrot.slane %v796_v23, 7  ;;  %v951_v30 = vrot.slane %v5191_v51, 1 }
 0x289   :  { %846 = vst [vmem:[#allocation3 + $0x8] sm:$0xfe] %v822_v48  ;;  %850 = vst [vmem:[#allocation3 + $0x28] sm:$0x1] %v825_v36  ;;  %v954_v16 = vrot.slane %v5197_v50, 1  ;;  %v961_v24 = vrot.slane %v5194_v6, 1  ;;  %v3724_v25 = vpack.c.bf16 %v875_v19, %v873_v56  ;;  %v3726_v35 = vpack.c.bf16 %v880_v11, %v878_v7 }
 0x28a   :  { %852 = vst [vmem:[#allocation3 + $0x38] sm:$0xfe] %v828_v39  ;;  %v5200_v22 = vsel %vm820_vm1, %v828_v39, %v831_v12  ;;  %856 = vst [vmem:[#allocation3 + $0x58] sm:$0x1] %v831_v12  ;;  %v882_v61 = vld [vmem:[%s6593_s4 + $0x88] sm:$0xff]  ;;  %v884_v8 = vld [vmem:[%s6593_s4 + $0x98] sm:$0xff]  ;;  %v3728_v21 = vpack.c.bf16 %v879_v47, %v877_v37  ;;  %v3736_v32 = vpack.c.bf16 %v887_v57, %v885_v0 }
 0x28b   :  { %v964_v53 = vrot.slane %v5200_v22, 1  ;;  %v3730_v23 = vpack.c.bf16 %v884_v8, %v882_v61  ;;  %v881_v48 = vld [vmem:[%s6593_s4 + $0x80] sm:$0xff]  ;;  %v883_v36 = vld [vmem:[%s6593_s4 + $0x90] sm:$0xff]  ;;  %v1483_v18 = vld [vmem:[%s6592_s11 + $0x48] sm:$0xff] }
 0x28c   :  { %v3732_v9 = vpack.c.bf16 %v883_v36, %v881_v48  ;;  %v890_v26 = vld [vmem:[%s6593_s4 + $0xc8] sm:$0xff]  ;;  %v1489_v56 = vld [vmem:[%s6592_s11 + $0x78] sm:$0xff]  ;;  %v893_v11 = vld [vmem:[%s6593_s4 + $0xe0] sm:$0xff] }
 0x28d   :  { %v894_v19 = vld [vmem:[%s6593_s4 + $0xe8] sm:$0xff]  ;;  %v1493_v37 = vld [vmem:[%s6592_s11 + $0x98] sm:$0xff]  ;;  %v897_v8 = vld [vmem:[%s6593_s4 + $0x100] sm:$0xff] }
 0x28e   :  { %v929_v54 = vld [vmem:[#allocation3] sm:$0xfe]  ;;  %v931_v27 = vld [vmem:[#allocation3 + $0x20] sm:$0x1]  ;;  %v898_v47 = vld [vmem:[%s6593_s4 + $0x108] sm:$0xff] }
 0x28f   :  { %v950_v1 = vrot.slane %v929_v54, 1  ;;  %v956_v29 = vrot.slane %v931_v27, 1  ;;  %v933_v42 = vld [vmem:[#allocation3 + $0x30] sm:$0xfe]  ;;  %v935_v3 = vld [vmem:[#allocation3 + $0x50] sm:$0x1] }
 0x290   :  { %v930_v60 = vld [vmem:[#allocation3 + $0x8] sm:$0xfe]  ;;  %v932_v5 = vld [vmem:[#allocation3 + $0x28] sm:$0x1]  ;;  %v960_v4 = vrot.slane %v933_v42, 1  ;;  %v966_v59 = vrot.slane %v935_v3, 1 }
 0x291   :  { %v953_v13 = vrot.slane %v930_v60, 1  ;;  %v958_v20 = vrot.slane %v932_v5, 1  ;;  %v934_v40 = vld [vmem:[#allocation3 + $0x38] sm:$0xfe]  ;;  %v952_v28 = vsel %vm949_vm2, %v950_v1, %v951_v30  ;;  %v936_v45 = vld [vmem:[#allocation3 + $0x58] sm:$0x1]  ;;  %v957_v62 = vsel %vm949_vm2, %v951_v30, %v956_v29 }
 0x292   :  { %v963_v41 = vrot.slane %v934_v40, 1  ;;  %v968_v15 = vrot.slane %v936_v45, 1  ;;  %v962_v49 = vsel %vm949_vm2, %v960_v4, %v961_v24  ;;  %v967_v39 = vsel %vm949_vm2, %v961_v24, %v966_v59  ;;  %v858_v12 = vld [vmem:[#allocation3 + $0x8] sm:$0xff]  ;;  %v1475_v60 = vld [vmem:[%s6592_s11 + $0x8] sm:$0xff]  ;;  %v1474_v5 = vld [vmem:[%s6592_s11] sm:$0xff] }
 0x293   :  { %v955_v44 = vsel %vm949_vm2, %v953_v13, %v954_v16  ;;  %v959_v34 = vsel %vm949_vm2, %v954_v16, %v958_v20  ;;  %v888_v54 = vld [vmem:[%s6593_s4 + $0xb8] sm:$0xff]  ;;  %v1476_v16 = vld [vmem:[%s6592_s11 + $0x10] sm:$0xff]  ;;  %v1479_v20 = vld [vmem:[%s6592_s11 + $0x28] sm:$0xff] }
 0x294   :  { %1107 = vmatprep.mubr.f32.mxu0 %v955_v44  ;;  %v965_v14 = vsel %vm949_vm2, %v963_v41, %v964_v53  ;;  %v969_v10 = vsel %vm949_vm2, %v964_v53, %v968_v15  ;;  %v1477_v1 = vld [vmem:[%s6592_s11 + $0x18] sm:$0xff]  ;;  %v3734_v30 = vpack.c.bf16 %v888_v54, %v886_v52  ;;  %v1478_v44 = vld [vmem:[%s6592_s11 + $0x20] sm:$0xff]  ;;  %v891_v53 = vld [vmem:[%s6593_s4 + $0xd0] sm:$0xff] }
 0x295   :  { %1108 = vmatmul.mubr.f32.vlgmr.msra.gmra.mrb[8].mxu0 %v952_v28  ;;  %v5289_v13 = vpack.c.bf16 %v1477_v1, %v1475_v60  ;;  %v1481_v27 = vld [vmem:[%s6592_s11 + $0x38] sm:$0xff]  ;;  %v1482_v42 = vld [vmem:[%s6592_s11 + $0x40] sm:$0xff]  ;;  %v1488_v3 = vld [vmem:[%s6592_s11 + $0x70] sm:$0xff] }
 0x296   :  { %3717 = vmatpush1.bf16.msra.mxu0 %v3716_v33  ;;  %1113 = vmatprep.mubr.f32.mxu0 %v959_v34  ;;  %v5300_v33 = vpack.c.bf16 %v1476_v16, %v1474_v5  ;;  %v5302_v40 = vpack.c.bf16 %v1481_v27, %v1479_v20  ;;  %v892_v28 = vld [vmem:[%s6593_s4 + $0xd8] sm:$0xff]  ;;  %v889_v34 = vld [vmem:[%s6593_s4 + $0xc0] sm:$0xff]  ;;  %v899_v36 = vld [vmem:[%s6593_s4 + $0x110] sm:$0xff] }
 0x297   :  { %3719 = vmatprep.subr.bf16.mxu0 %v3718_v46  ;;  %v1480_v46 = vld [vmem:[%s6592_s11 + $0x30] sm:$0xff]  ;;  %3843 = vmatprep.subr.bf16.mxu1 %v5289_v13  ;;  %v1485_v29 = vld [vmem:[%s6592_s11 + $0x58] sm:$0xff]  ;;  %v3738_v45 = vpack.c.bf16 %v892_v28, %v890_v26  ;;  %v3740_v7 = vpack.c.bf16 %v891_v53, %v889_v34  ;;  %v1486_v15 = vld [vmem:[%s6592_s11 + $0x60] sm:$0xff]  ;;  %v3748_v57 = vpack.c.bf16 %v899_v36, %v897_v8 }
 0x298   :  { %3845 = vmatpush1.bf16.msra.mxu1 %v5300_v33  ;;  %v5324_v31 = vpack.c.bf16 %v1480_v46, %v1478_v44  ;;  %v5330_v41 = vpack.c.bf16 %v1485_v29, %v1483_v18  ;;  %v5384_v59 = vpack.c.bf16 %v1488_v3, %v1486_v15  ;;  %v902_v52 = vld [vmem:[%s6593_s4 + $0x128] sm:$0xff]  ;;  %v904_v54 = vld [vmem:[%s6593_s4 + $0x138] sm:$0xff]  ;;  %v901_v60 = vld [vmem:[%s6593_s4 + $0x120] sm:$0xff] }
 0x299   :  { %1114 = vmatmul.mubr.f32.gmra.mrb[10].mxu0 %v957_v62  ;;  %3847 = vmatprep.subr.bf16.mxu1 %v5302_v40  ;;  %v896_v62 = vld [vmem:[%s6593_s4 + $0xf8] sm:$0xff]  ;;  %v1494_v5 = vld [vmem:[%s6592_s11 + $0xa0] sm:$0xff]  ;;  %v3750_v16 = vpack.c.bf16 %v904_v54, %v902_v52  ;;  %v903_v20 = vld [vmem:[%s6593_s4 + $0x130] sm:$0xff] }
 0x29a   :  { %3721 = vmatpush1.bf16.msra.mxu0 %v3720_v43  ;;  %1119 = vmatprep.mubr.f32.mxu0 %v965_v14  ;;  %v1484_v43 = vld [vmem:[%s6592_s11 + $0x50] sm:$0xff]  ;;  %v3742_v24 = vpack.c.bf16 %v896_v62, %v894_v19  ;;  %v1499_v27 = vld [vmem:[%s6592_s11 + $0xc8] sm:$0xff]  ;;  %v908_v46 = vld [vmem:[%s6593_s4 + $0x158] sm:$0xff]  ;;  %v3752_v26 = vpack.c.bf16 %v903_v20, %v901_v60 }
 0x29b   :  { %3723 = vmatprep.subr.bf16.mxu0 %v3722_v55  ;;  %v1487_v55 = vld [vmem:[%s6592_s11 + $0x68] sm:$0xff]  ;;  %v5354_v4 = vpack.c.bf16 %v1484_v43, %v1482_v42  ;;  %v905_v28 = vld [vmem:[%s6593_s4 + $0x140] sm:$0xff]  ;;  %v1500_v34 = vld [vmem:[%s6592_s11 + $0xd0] sm:$0xff] }
 0x29c   :  { %3849 = vmatpush1.bf16.msra.mxu1 %v5324_v31  ;;  %v5360_v14 = vpack.c.bf16 %v1489_v56, %v1487_v55  ;;  %v906_v44 = vld [vmem:[%s6593_s4 + $0x148] sm:$0xff]  ;;  %v907_v43 = vld [vmem:[%s6593_s4 + $0x150] sm:$0xff]  ;;  %v1505_v53 = vld [vmem:[%s6592_s11 + $0xf8] sm:$0xff] }
 0x29d   :  { %1120 = vmatmul.mubr.f32.gmra.mrb[12].mxu0 %v962_v49  ;;  %3851 = vmatprep.subr.bf16.mxu1 %v5330_v41  ;;  %v900_v49 = vld [vmem:[%s6593_s4 + $0x118] sm:$0xff]  ;;  %v3754_v42 = vpack.c.bf16 %v908_v46, %v906_v44  ;;  %v910_v55 = vld [vmem:[%s6593_s4 + $0x168] sm:$0xff]  ;;  %v3756_v62 = vpack.c.bf16 %v907_v43, %v905_v28  ;;  %v1502_v15 = vld [vmem:[%s6592_s11 + $0xe0] sm:$0xff] }
 0x29e   :  { %3725 = vmatpush1.bf16.msra.mxu0 %v3724_v25  ;;  %1125 = vmatprep.mubr.f32.mxu0 %v969_v10  ;;  %v895_v25 = vld [vmem:[%s6593_s4 + $0xf0] sm:$0xff]  ;;  %v3746_v48 = vpack.c.bf16 %v900_v49, %v898_v47  ;;  %v912_v56 = vld [vmem:[%s6593_s4 + $0x178] sm:$0xff]  ;;  %v914_v47 = vld [vmem:[%s6593_s4 + $0x188] sm:$0xff] }
 0x29f   :  { %3727 = vmatprep.subr.bf16.mxu0 %v3726_v35  ;;  %v1491_v35 = vld [vmem:[%s6592_s11 + $0x88] sm:$0xff]  ;;  %v3744_v61 = vpack.c.bf16 %v895_v25, %v893_v11  ;;  %v1504_v3 = vld [vmem:[%s6592_s11 + $0xf0] sm:$0xff]  ;;  %v916_v49 = vld [vmem:[%s6593_s4 + $0x198] sm:$0xff] }
 0x2a0   :  { %3853 = vmatpush1.bf16.msra.mxu1 %v5354_v4  ;;  %v5390_v10 = vpack.c.bf16 %v1493_v37, %v1491_v35  ;;  %v911_v25 = vld [vmem:[%s6593_s4 + $0x170] sm:$0xff]  ;;  %v1507_v35 = vld [vmem:[%s6592_s11 + $0x108] sm:$0xff]  ;;  %v1509_v37 = vld [vmem:[%s6592_s11 + $0x118] sm:$0xff]  ;;  %v3762_v36 = vpack.c.bf16 %v916_v49, %v914_v47 }
 0x2a1   :  { %1126 = vmatmul.mubr.f32.gmra.mrb[14].mxu0 %v967_v39  ;;  %3855 = vmatprep.subr.bf16.mxu1 %v5360_v14  ;;  %v1495_v39 = vld [vmem:[%s6592_s11 + $0xa8] sm:$0xff]  ;;  %v920_v54 = vld [vmem:[%s6593_s4 + $0x1b8] sm:$0xff]  ;;  %v921_v46 = vld [vmem:[%s6593_s4 + $0x1c0] sm:$0xff] }
 0x2a2   :  { %3729 = vmatpush1.bf16.msra.mxu0 %v3728_v21  ;;  %1196 = vmatprep.mubr.f32.mxu0 %v858_v12  ;;  %v1490_v21 = vld [vmem:[%s6592_s11 + $0x80] sm:$0xff]  ;;  %v1497_v12 = vld [vmem:[%s6592_s11 + $0xb8] sm:$0xff]  ;;  %v918_v52 = vld [vmem:[%s6593_s4 + $0x1a8] sm:$0xff] }
 0x2a3   :  { %3731 = vmatprep.subr.bf16.mxu0 %v3730_v23  ;;  %v1492_v23 = vld [vmem:[%s6592_s11 + $0x90] sm:$0xff]  ;;  %v5420_v1 = vpack.c.bf16 %v1497_v12, %v1495_v39  ;;  %v913_v39 = vld [vmem:[%s6593_s4 + $0x180] sm:$0xff]  ;;  %v922_v20 = vld [vmem:[%s6593_s4 + $0x1c8] sm:$0xff] }
 0x2a4   :  { %3857 = vmatpush1.bf16.msra.mxu1 %v5384_v59  ;;  %v5414_v0 = vpack.c.bf16 %v1492_v23, %v1490_v21  ;;  %v5507_v21 = vpack.c.bf16 %v1509_v37, %v1507_v35  ;;  %v1506_v23 = vld [vmem:[%s6592_s11 + $0x100] sm:$0xff]  ;;  %v915_v12 = vld [vmem:[%s6593_s4 + $0x190] sm:$0xff]  ;;  %v926_v28 = vld [vmem:[%s6593_s4 + $0x1e8] sm:$0xff] }
 0x2a5   :  { %3859 = vmatprep.subr.bf16.mxu1 %v5390_v10  ;;  %v3764_v60 = vpack.c.bf16 %v915_v12, %v913_v39  ;;  %v925_v43 = vld [vmem:[%s6593_s4 + $0x1e0] sm:$0xff]  ;;  %v3013_v47 = vld [vmem:[%s6593_s4 + $0x430] sm:$0xff] }
 0x2a6   :  { %3733 = vmatpush1.bf16.msra.mxu0 %v3732_v9  ;;  %v1496_v9 = vld [vmem:[%s6592_s11 + $0xb0] sm:$0xff]  ;;  %v3011_v37 = vld [vmem:[%s6593_s4 + $0x420] sm:$0xff] }
 0x2a7   :  { %3735 = vmatprep.subr.bf16.mxu0 %v3734_v30  ;;  %v1501_v30 = vld [vmem:[%s6592_s11 + $0xd8] sm:$0xff]  ;;  %v5444_v18 = vpack.c.bf16 %v1496_v9, %v1494_v5  ;;  %v3766_v5 = vpack.c.bf16 %v920_v54, %v918_v52  ;;  %v917_v9 = vld [vmem:[%s6593_s4 + $0x1a0] sm:$0xff]  ;;  %v857_v49 = vld [vmem:[#allocation3] sm:$0xff] }
 0x2a8   :  { %3861 = vmatpush1.bf16.msra.mxu1 %v5414_v0  ;;  %v5450_v29 = vpack.c.bf16 %v1501_v30, %v1499_v27  ;;  %v924_v27 = vld [vmem:[%s6593_s4 + $0x1d8] sm:$0xff]  ;;  %v3015_v39 = vld [vmem:[%s6593_s4 + $0x440] sm:$0xff]  ;;  %v3017_v12 = vld [vmem:[%s6593_s4 + $0x450] sm:$0xff] }
 0x2a9   :  { %3863 = vmatprep.subr.bf16.mxu1 %v5420_v1  ;;  %v3770_v44 = vpack.c.bf16 %v924_v27, %v922_v20  ;;  %v3020_v52 = vld [vmem:[%s6593_s4 + $0x468] sm:$0xff]  ;;  %v3022_v54 = vld [vmem:[%s6593_s4 + $0x478] sm:$0xff]  ;;  %v3019_v20 = vld [vmem:[%s6593_s4 + $0x460] sm:$0xff] }
 0x2aa   :  { %3737 = vmatpush1.bf16.msra.mxu0 %v3736_v32  ;;  %v1498_v32 = vld [vmem:[%s6592_s11 + $0xc0] sm:$0xff]  ;;  %v3021_v27 = vld [vmem:[%s6593_s4 + $0x470] sm:$0xff] }
 0x2ab   :  { %3739 = vmatprep.subr.bf16.mxu0 %v3738_v45  ;;  %v1503_v45 = vld [vmem:[%s6592_s11 + $0xe8] sm:$0xff]  ;;  %v5474_v19 = vpack.c.bf16 %v1500_v34, %v1498_v32  ;;  %v928_v32 = vld [vmem:[%s6593_s4 + $0x1f8] sm:$0xff] }
 0x2ac   :  { %3865 = vmatpush1.bf16.msra.mxu1 %v5444_v18  ;;  %v5480_v11 = vpack.c.bf16 %v1505_v53, %v1503_v45  ;;  %v927_v45 = vld [vmem:[%s6593_s4 + $0x1f0] sm:$0xff]  ;;  %v3008_v53 = vld [vmem:[%s6593_s4 + $0x408] sm:$0xff] }
 0x2ad   :  { %3867 = vmatprep.subr.bf16.mxu1 %v5450_v29 }
 0x2ae   :  { %3741 = vmatpush1.bf16.msra.mxu0 %v3740_v7  ;;  %v909_v7 = vld [vmem:[%s6593_s4 + $0x160] sm:$0xff] }
 0x2af   :  { %3743 = vmatprep.subr.bf16.mxu0 %v3742_v24  ;;  %v3758_v24 = vpack.c.bf16 %v912_v56, %v910_v55  ;;  %v3760_v8 = vpack.c.bf16 %v911_v25, %v909_v7  ;;  %v3010_v55 = vld [vmem:[%s6593_s4 + $0x418] sm:$0xff]  ;;  %v3776_v56 = vpack.c.bf16 %v927_v45, %v925_v43  ;;  %v3007_v7 = vld [vmem:[%s6593_s4 + $0x400] sm:$0xff]  ;;  %v3025_v43 = vld [vmem:[%s6593_s4 + $0x490] sm:$0xff] }
 0x2b0   :  { %3869 = vmatpush1.bf16.msra.mxu1 %v5474_v19  ;;  %v3028_v45 = vld [vmem:[%s6593_s4 + $0x4a8] sm:$0xff] }
 0x2b1   :  { %3871 = vmatprep.subr.bf16.mxu1 %v5480_v11 }
 0x2b2   :  { %3745 = vmatpush1.bf16.msra.mxu0 %v3744_v61  ;;  %v5504_v61 = vpack.c.bf16 %v1504_v3, %v1502_v15  ;;  %v3009_v15 = vld [vmem:[%s6593_s4 + $0x410] sm:$0xff]  ;;  %v3012_v3 = vld [vmem:[%s6593_s4 + $0x428] sm:$0xff] }
 0x2b3   :  { %3747 = vmatprep.subr.bf16.mxu0 %v3746_v48  ;;  %v1508_v48 = vld [vmem:[%s6592_s11 + $0x110] sm:$0xff]  ;;  %v3780_v25 = vpack.c.bf16 %v3009_v15, %v3007_v7  ;;  %v3027_v7 = vld [vmem:[%s6593_s4 + $0x4a0] sm:$0xff] }
 0x2b4   :  { %3873 = vmatpush1.bf16.msra.mxu1 %v5504_v61  ;;  %v3029_v15 = vld [vmem:[%s6593_s4 + $0x4b0] sm:$0xff] }
 0x2b5   :  { %3875 = vmatprep.subr.bf16.mxu1 %v5507_v21 }
 0x2b6   :  { %3749 = vmatpush1.bf16.msra.mxu0 %v3748_v57  ;;  %v5528_v57 = vpack.c.bf16 %v1508_v48, %v1506_v23  ;;  %v3018_v23 = vld [vmem:[%s6593_s4 + $0x458] sm:$0xff]  ;;  %v3784_v48 = vpack.c.bf16 %v3013_v47, %v3011_v37  ;;  %v3031_v37 = vld [vmem:[%s6593_s4 + $0x4c0] sm:$0xff]  ;;  %v3033_v47 = vld [vmem:[%s6593_s4 + $0x4d0] sm:$0xff] }
 0x2b7   :  { %3751 = vmatprep.subr.bf16.mxu0 %v3750_v16  ;;  %v919_v16 = vld [vmem:[%s6593_s4 + $0x1b0] sm:$0xff] }
 0x2b8   :  { %3877 = vmatpush1.bf16.msra.mxu1 %v5528_v57  ;;  %v3768_v30 = vpack.c.bf16 %v919_v16, %v917_v9  ;;  %v1222_v9 = vld [vmem:[#allocation3 + $0x8] sm:$0xfc]  ;;  %v3790_v16 = vpack.c.bf16 %v3022_v54, %v3020_v52 }
 0x2b9   :  { %v3042_v52 = vld [vmem:[%s6593_s4 + $0x518] sm:$0xff] }
 0x2ba   :  { %3753 = vmatpush1.bf16.msra.mxu0 %v3752_v26  ;;  %v923_v26 = vld [vmem:[%s6593_s4 + $0x1d0] sm:$0xff] }
 0x2bb   :  { %3755 = vmatprep.subr.bf16.mxu0 %v3754_v42  ;;  %v3772_v34 = vpack.c.bf16 %v923_v26, %v921_v46  ;;  %v3774_v42 = vpack.c.bf16 %v928_v32, %v926_v28  ;;  %v3026_v46 = vld [vmem:[%s6593_s4 + $0x498] sm:$0xff]  ;;  %v1241_v26 = vrot.slane %v1222_v9, 2  ;;  %v3792_v28 = vpack.c.bf16 %v3021_v27, %v3019_v20  ;;  %v3041_v9 = vld [vmem:[%s6593_s4 + $0x510] sm:$0xff] }
 0x2bc   :  { %v1242_v32 = vrot.slane %v5197_v50, 2  ;;  %v3046_v20 = vld [vmem:[%s6593_s4 + $0x538] sm:$0xff] }
 0x2be   :  { %3757 = vmatpush1.bf16.msra.mxu0 %v3756_v62  ;;  %v3778_v62 = vpack.c.bf16 %v3010_v55, %v3008_v53  ;;  %v3030_v53 = vld [vmem:[%s6593_s4 + $0x4b8] sm:$0xff]  ;;  %v1243_v55 = vsel %vm1237_vm3, %v1241_v26, %v1242_v32  ;;  %v3048_v26 = vld [vmem:[%s6593_s4 + $0x548] sm:$0xff] }
 0x2bf   :  { %3759 = vmatprep.subr.bf16.mxu0 %v3758_v24  ;;  %v3014_v24 = vld [vmem:[%s6593_s4 + $0x438] sm:$0xff] }
 0x2c0   :  { %v3782_v35 = vpack.c.bf16 %v3014_v24, %v3012_v3  ;;  %v3032_v3 = vld [vmem:[%s6593_s4 + $0x4c8] sm:$0xff]  ;;  %v3034_v24 = vld [vmem:[%s6593_s4 + $0x4d8] sm:$0xff] }
 0x2c2   :  { %3761 = vmatpush1.bf16.msra.mxu0 %v3760_v8  ;;  %v3016_v8 = vld [vmem:[%s6593_s4 + $0x448] sm:$0xff] }
 0x2c3   :  { %3763 = vmatprep.subr.bf16.mxu0 %v3762_v36  ;;  %v3786_v36 = vpack.c.bf16 %v3018_v23, %v3016_v8  ;;  %v3038_v8 = vld [vmem:[%s6593_s4 + $0x4f8] sm:$0xff]  ;;  %v3804_v23 = vpack.c.bf16 %v3033_v47, %v3031_v37  ;;  %v3055_v37 = vld [vmem:[%s6593_s4 + $0x580] sm:$0xff]  ;;  %v3057_v47 = vld [vmem:[%s6593_s4 + $0x590] sm:$0xff] }
 0x2c6   :  { %3765 = vmatpush1.bf16.msra.mxu0 %v3764_v60  ;;  %v862_v60 = vld [vmem:[#allocation3 + $0x38] sm:$0xff] }
 0x2c7   :  { %3767 = vmatprep.subr.bf16.mxu0 %v3766_v5  ;;  %v3788_v5 = vpack.c.bf16 %v3017_v12, %v3015_v39  ;;  %v3037_v39 = vld [vmem:[%s6593_s4 + $0x4f0] sm:$0xff]  ;;  %v3040_v12 = vld [vmem:[%s6593_s4 + $0x508] sm:$0xff] }
 0x2ca   :  { %3769 = vmatpush1.bf16.msra.mxu0 %v3768_v30  ;;  %v861_v30 = vld [vmem:[#allocation3 + $0x30] sm:$0xff] }
 0x2cb   :  { %3771 = vmatprep.subr.bf16.mxu0 %v3770_v44  ;;  %v3024_v44 = vld [vmem:[%s6593_s4 + $0x488] sm:$0xff] }
 0x2ce   :  { %3773 = vmatpush1.bf16.msra.mxu0 %v3772_v34  ;;  %v3794_v34 = vpack.c.bf16 %v3026_v46, %v3024_v44  ;;  %v3043_v44 = vld [vmem:[%s6593_s4 + $0x520] sm:$0xff]  ;;  %v3045_v46 = vld [vmem:[%s6593_s4 + $0x530] sm:$0xff] }
 0x2cf   :  { %3775 = vmatprep.subr.bf16.mxu0 %v3774_v42  ;;  %v3023_v42 = vld [vmem:[%s6593_s4 + $0x480] sm:$0xff] }
 0x2d2   :  { %3777 = vmatpush1.bf16.msra.mxu0 %v3776_v56  ;;  %v3796_v56 = vpack.c.bf16 %v3025_v43, %v3023_v42  ;;  %v3047_v43 = vld [vmem:[%s6593_s4 + $0x540] sm:$0xff] }
 0x2d3   :  { %3779 = vmatprep.subr.bf16.mxu0 %v3778_v62  ;;  %v3798_v62 = vpack.c.bf16 %v3030_v53, %v3028_v45  ;;  %v3049_v45 = vld [vmem:[%s6593_s4 + $0x550] sm:$0xff]  ;;  %v3052_v53 = vld [vmem:[%s6593_s4 + $0x568] sm:$0xff] }
 0x2d5   :  { %1197 = vmatmul.mubr.f32.vlgmr.msra.gmra.mrb[8].mxu0 %v857_v49  ;;  %v3036_v49 = vld [vmem:[%s6593_s4 + $0x4e8] sm:$0xff] }
 0x2d6   :  { %1202 = vmatprep.mubr.f32.mxu0 %v5197_v50  ;;  %3781 = vmatpush1.bf16.msra.mxu0 %v3780_v25  ;;  %v3800_v25 = vpack.c.bf16 %v3029_v15, %v3027_v7  ;;  %v3051_v7 = vld [vmem:[%s6593_s4 + $0x560] sm:$0xff]  ;;  %v3053_v15 = vld [vmem:[%s6593_s4 + $0x570] sm:$0xff] }
 0x2d7   :  { %3783 = vmatprep.subr.bf16.mxu0 %v3782_v35  ;;  %v3802_v35 = vpack.c.bf16 %v3034_v24, %v3032_v3  ;;  %v3056_v3 = vld [vmem:[%s6593_s4 + $0x588] sm:$0xff]  ;;  %v3058_v24 = vld [vmem:[%s6593_s4 + $0x598] sm:$0xff] }
 0x2d9   :  { %1203 = vmatmul.mubr.f32.gmra.mrb[10].mxu0 %v5191_v51 }
 0x2da   :  { %1208 = vmatprep.mubr.f32.mxu0 %v862_v60  ;;  %3785 = vmatpush1.bf16.msra.mxu0 %v3784_v48  ;;  %v3806_v48 = vpack.c.bf16 %v3038_v8, %v3036_v49  ;;  %v3810_v60 = vpack.c.bf16 %v3042_v52, %v3040_v12  ;;  %v3060_v49 = vld [vmem:[%s6593_s4 + $0x5a8] sm:$0xff]  ;;  %v3062_v8 = vld [vmem:[%s6593_s4 + $0x5b8] sm:$0xff] }
 0x2db   :  { %3787 = vmatprep.subr.bf16.mxu0 %v3786_v36  ;;  %v3035_v36 = vld [vmem:[%s6593_s4 + $0x4e0] sm:$0xff]  ;;  %v3064_v12 = vld [vmem:[%s6593_s4 + $0x5c8] sm:$0xff]  ;;  %v3066_v52 = vld [vmem:[%s6593_s4 + $0x5d8] sm:$0xff] }
 0x2dc   :  { %v3808_v54 = vpack.c.bf16 %v3037_v39, %v3035_v36  ;;  %v3059_v36 = vld [vmem:[%s6593_s4 + $0x5a0] sm:$0xff]  ;;  %v3061_v39 = vld [vmem:[%s6593_s4 + $0x5b0] sm:$0xff] }
 0x2dd   :  { %1209 = vmatmul.mubr.f32.gmra.mrb[12].mxu0 %v861_v30 }
 0x2de   :  { %1214 = vmatprep.mubr.f32.mxu0 %v5200_v22  ;;  %3789 = vmatpush1.bf16.msra.mxu0 %v3788_v5  ;;  %v3039_v5 = vld [vmem:[%s6593_s4 + $0x500] sm:$0xff] }
 0x2df   :  { %3791 = vmatprep.subr.bf16.mxu0 %v3790_v16  ;;  %v3044_v16 = vld [vmem:[%s6593_s4 + $0x528] sm:$0xff]  ;;  %v3812_v27 = vpack.c.bf16 %v3041_v9, %v3039_v5  ;;  %v3063_v5 = vld [vmem:[%s6593_s4 + $0x5c0] sm:$0xff]  ;;  %v3065_v9 = vld [vmem:[%s6593_s4 + $0x5d0] sm:$0xff] }
 0x2e0   :  { %v3814_v30 = vpack.c.bf16 %v3046_v20, %v3044_v16  ;;  %v3068_v16 = vld [vmem:[%s6593_s4 + $0x5e8] sm:$0xff]  ;;  %v3070_v20 = vld [vmem:[%s6593_s4 + $0x5f8] sm:$0xff] }
 0x2e1   :  { %1215 = vmatmul.mubr.f32.gmra.mrb[14].mxu0 %v5194_v6 }
 0x2e2   :  { %3793 = vmatpush1.bf16.msra.mxu0 %v3792_v28  ;;  %1395 = vmatprep.mubr.f32.mxu0 %v1243_v55  ;;  %v3050_v28 = vld [vmem:[%s6593_s4 + $0x558] sm:$0xff] }
 0x2e3   :  { %3795 = vmatprep.subr.bf16.mxu0 %v3794_v34  ;;  %v3816_v34 = vpack.c.bf16 %v3045_v46, %v3043_v44  ;;  %v3818_v42 = vpack.c.bf16 %v3050_v28, %v3048_v26  ;;  %v3054_v55 = vld [vmem:[%s6593_s4 + $0x578] sm:$0xff]  ;;  %v3067_v44 = vld [vmem:[%s6593_s4 + $0x5e0] sm:$0xff]  ;;  %v3069_v46 = vld [vmem:[%s6593_s4 + $0x5f0] sm:$0xff] }
 0x2e4   :  { %v1221_v26 = vld [vmem:[#allocation3] sm:$0xfc]  ;;  %v3840_v28 = vpack.c.bf16 %v3069_v46, %v3067_v44  ;;  %v1518_v46 = vld [vmem:[%s6592_s11 + $0x160] sm:$0xff] }
 0x2e6   :  { %3797 = vmatpush1.bf16.msra.mxu0 %v3796_v56  ;;  %v3820_v56 = vpack.c.bf16 %v3049_v45, %v3047_v43  ;;  %v1223_v45 = vld [vmem:[#allocation3 + $0x20] sm:$0x3] }
 0x2e7   :  { %3799 = vmatprep.subr.bf16.mxu0 %v3798_v62  ;;  %v3822_v62 = vpack.c.bf16 %v3054_v55, %v3052_v53  ;;  %v1239_v53 = vrot.slane %v5191_v51, 2  ;;  %v1226_v55 = vld [vmem:[#allocation3 + $0x38] sm:$0xfc] }
 0x2ea   :  { %3801 = vmatpush1.bf16.msra.mxu0 %v3800_v25  ;;  %v3824_v25 = vpack.c.bf16 %v3053_v15, %v3051_v7  ;;  %v1251_v15 = vrot.slane %v1226_v55, 2 }
 0x2eb   :  { %3803 = vmatprep.subr.bf16.mxu0 %v3802_v35  ;;  %v3826_v35 = vpack.c.bf16 %v3058_v24, %v3056_v3  ;;  %v1225_v3 = vld [vmem:[#allocation3 + $0x30] sm:$0xfc]  ;;  %v1228_v24 = vld [vmem:[#allocation3 + $0x58] sm:$0x3] }
 0x2ee   :  { %3805 = vmatpush1.bf16.msra.mxu0 %v3804_v23  ;;  %v3828_v23 = vpack.c.bf16 %v3057_v47, %v3055_v37  ;;  %v1248_v37 = vrot.slane %v1225_v3, 2  ;;  %v1256_v47 = vrot.slane %v1228_v24, 2  ;;  %v1528_v3 = vld [vmem:[%s6592_s11 + $0x1b0] sm:$0xff]  ;;  %v1531_v24 = vld [vmem:[%s6592_s11 + $0x1c8] sm:$0xff] }
 0x2ef   :  { %3807 = vmatprep.subr.bf16.mxu0 %v3806_v48  ;;  %v3830_v48 = vpack.c.bf16 %v3062_v8, %v3060_v49  ;;  %v1227_v49 = vld [vmem:[#allocation3 + $0x50] sm:$0x3]  ;;  %v1249_v8 = vrot.slane %v5194_v6, 2 }
 0x2f0   :  { %v1510_v6 = vld [vmem:[%s6592_s11 + $0x120] sm:$0xff] }
 0x2f1   :  { %v1250_v50 = vsel %vm1237_vm3, %v1248_v37, %v1249_v8  ;;  %v1530_v37 = vld [vmem:[%s6592_s11 + $0x1c0] sm:$0xff] }
 0x2f2   :  { %3809 = vmatpush1.bf16.msra.mxu0 %v3808_v54  ;;  %v3832_v54 = vpack.c.bf16 %v3061_v39, %v3059_v36  ;;  %v1513_v36 = vld [vmem:[%s6592_s11 + $0x138] sm:$0xff] }
 0x2f3   :  { %3811 = vmatprep.subr.bf16.mxu0 %v3810_v60  ;;  %v3834_v60 = vpack.c.bf16 %v3066_v52, %v3064_v12  ;;  %v1512_v12 = vld [vmem:[%s6592_s11 + $0x130] sm:$0xff] }
 0x2f4   :  { %v5788_v52 = vpack.c.bf16 %v1512_v12, %v1510_v6 }
 0x2f6   :  { %3813 = vmatpush1.bf16.msra.mxu0 %v3812_v27  ;;  %v3836_v27 = vpack.c.bf16 %v3065_v9, %v3063_v5  ;;  %v1514_v9 = vld [vmem:[%s6592_s11 + $0x140] sm:$0xff] }
 0x2f7   :  { %3815 = vmatprep.subr.bf16.mxu0 %v3814_v30  ;;  %v3838_v30 = vpack.c.bf16 %v3070_v20, %v3068_v16  ;;  %v1516_v16 = vld [vmem:[%s6592_s11 + $0x150] sm:$0xff] }
 0x2f8   :  { %v5806_v20 = vpack.c.bf16 %v1516_v16, %v1514_v9 }
 0x2fa   :  { %3817 = vmatpush1.bf16.msra.mxu0 %v3816_v34  ;;  %v1224_v34 = vld [vmem:[#allocation3 + $0x28] sm:$0x3] }
 0x2fb   :  { %3819 = vmatprep.subr.bf16.mxu0 %v3818_v42  ;;  %v1238_v42 = vrot.slane %v1221_v26, 2  ;;  %v1246_v43 = vrot.slane %v1224_v34, 2  ;;  %v1520_v26 = vld [vmem:[%s6592_s11 + $0x170] sm:$0xff]  ;;  %v1523_v34 = vld [vmem:[%s6592_s11 + $0x188] sm:$0xff] }
 0x2fd   :  { %v1247_v7 = vsel %vm1237_vm3, %v1242_v32, %v1246_v43  ;;  %v1254_v32 = vrot.slane %v1227_v49, 2  ;;  %v1535_v49 = vld [vmem:[%s6592_s11 + $0x1e8] sm:$0xff] }
 0x2fe   :  { %3821 = vmatpush1.bf16.msra.mxu0 %v3820_v56  ;;  %v1240_v56 = vsel %vm1237_vm3, %v1238_v42, %v1239_v53  ;;  %v1525_v42 = vld [vmem:[%s6592_s11 + $0x198] sm:$0xff] }
 0x2ff   :  { %3823 = vmatprep.subr.bf16.mxu0 %v3822_v62  ;;  %v1244_v62 = vrot.slane %v1223_v45, 2  ;;  %v5834_v43 = vpack.c.bf16 %v1525_v42, %v1523_v34  ;;  %v1522_v45 = vld [vmem:[%s6592_s11 + $0x180] sm:$0xff] }
 0x302   :  { %3825 = vmatpush1.bf16.msra.mxu0 %v3824_v25  ;;  %v1252_v25 = vrot.slane %v5200_v22, 2  ;;  %v1255_v22 = vsel %vm1237_vm3, %v1249_v8, %v1254_v32  ;;  %v1537_v8 = vld [vmem:[%s6592_s11 + $0x1f8] sm:$0xff] }
 0x303   :  { %3827 = vmatprep.subr.bf16.mxu0 %v3826_v35  ;;  %v1245_v35 = vsel %vm1237_vm3, %v1239_v53, %v1244_v62  ;;  %v1524_v53 = vld [vmem:[%s6592_s11 + $0x190] sm:$0xff]  ;;  %v1529_v62 = vld [vmem:[%s6592_s11 + $0x1b8] sm:$0xff]  ;;  %v5887_v32 = vpack.c.bf16 %v1537_v8, %v1535_v49 }
 0x304   :  { %v1253_v51 = vsel %vm1237_vm3, %v1251_v15, %v1252_v25  ;;  %v5842_v55 = vpack.c.bf16 %v1524_v53, %v1522_v45  ;;  %v1526_v15 = vld [vmem:[%s6592_s11 + $0x1a0] sm:$0xff] }
 0x306   :  { %3829 = vmatpush1.bf16.msra.mxu0 %v3828_v23  ;;  %v1257_v23 = vsel %vm1237_vm3, %v1252_v25, %v1256_v47  ;;  %v5863_v25 = vpack.c.bf16 %v1528_v3, %v1526_v15 }
 0x307   :  { %3831 = vmatprep.subr.bf16.mxu0 %v3830_v48  ;;  %v1511_v48 = vld [vmem:[%s6592_s11 + $0x128] sm:$0xff] }
 0x308   :  { %v5780_v39 = vpack.c.bf16 %v1513_v36, %v1511_v48 }
 0x30a   :  { %3833 = vmatpush1.bf16.msra.mxu0 %v3832_v54  ;;  %3879 = vmatprep.subr.bf16.mxu1 %v5780_v39  ;;  %v1515_v54 = vld [vmem:[%s6592_s11 + $0x148] sm:$0xff] }
 0x30b   :  { %3835 = vmatprep.subr.bf16.mxu0 %v3834_v60  ;;  %3881 = vmatpush1.bf16.msra.mxu1 %v5788_v52  ;;  %v1517_v60 = vld [vmem:[%s6592_s11 + $0x158] sm:$0xff] }
 0x30c   :  { %v5798_v5 = vpack.c.bf16 %v1517_v60, %v1515_v54 }
 0x30e   :  { %3837 = vmatpush1.bf16.msra.mxu0 %v3836_v27  ;;  %3883 = vmatprep.subr.bf16.mxu1 %v5798_v5  ;;  %v1519_v27 = vld [vmem:[%s6592_s11 + $0x168] sm:$0xff] }
 0x30f   :  { %3839 = vmatprep.subr.bf16.mxu0 %v3838_v30  ;;  %3885 = vmatpush1.bf16.msra.mxu1 %v5806_v20  ;;  %v1521_v30 = vld [vmem:[%s6592_s11 + $0x178] sm:$0xff] }
 0x310   :  { %v5816_v44 = vpack.c.bf16 %v1521_v30, %v1519_v27 }
 0x312   :  { %3841 = vmatpush1.bf16.msra.mxu0 %v3840_v28  ;;  %v5824_v28 = vpack.c.bf16 %v1520_v26, %v1518_v46  ;;  %3887 = vmatprep.subr.bf16.mxu1 %v5816_v44 }
 0x314   :  { %3889 = vmatpush1.bf16.msra.mxu1 %v5824_v28 }
 0x315   :  { %1396 = vmatmul.mubr.f32.vlgmr.msra.gmra.mrb[8].mxu0 %v1240_v56  ;;  %3891 = vmatprep.subr.bf16.mxu1 %v5834_v43  ;;  %v1527_v56 = vld [vmem:[%s6592_s11 + $0x1a8] sm:$0xff] }
 0x316   :  { %1401 = vmatprep.mubr.f32.mxu0 %v1247_v7  ;;  %v5852_v7 = vpack.c.bf16 %v1529_v62, %v1527_v56 }
 0x318   :  { %3893 = vmatpush1.bf16.msra.mxu1 %v5842_v55 }
 0x319   :  { %1402 = vmatmul.mubr.f32.gmra.mrb[10].mxu0 %v1245_v35  ;;  %v1533_v35 = vld [vmem:[%s6592_s11 + $0x1d8] sm:$0xff]  ;;  %3895 = vmatprep.subr.bf16.mxu1 %v5852_v7 }
 0x31a   :  { %1407 = vmatprep.mubr.f32.mxu0 %v1253_v51  ;;  %v1532_v51 = vld [vmem:[%s6592_s11 + $0x1d0] sm:$0xff]  ;;  %v5875_v47 = vpack.c.bf16 %v1533_v35, %v1531_v24 }
 0x31c   :  { %3897 = vmatpush1.bf16.msra.mxu1 %v5863_v25 }
 0x31d   :  { %1408 = vmatmul.mubr.f32.gmra.mrb[12].mxu0 %v1250_v50  ;;  %v5884_v50 = vpack.c.bf16 %v1532_v51, %v1530_v37  ;;  %3899 = vmatprep.subr.bf16.mxu1 %v5875_v47 }
 0x31e   :  { %1413 = vmatprep.mubr.f32.mxu0 %v1257_v23  ;;  %v1534_v23 = vld [vmem:[%s6592_s11 + $0x1e0] sm:$0xff] }
 0x320   :  { %3901 = vmatpush1.bf16.msra.mxu1 %v5884_v50 }
 0x321   :  { %1414 = vmatmul.mubr.f32.gmra.mrb[14].mxu0 %v1255_v22  ;;  %v1536_v22 = vld [vmem:[%s6592_s11 + $0x1f0] sm:$0xff]  ;;  %3903 = vmatprep.subr.bf16.mxu1 %v5887_v32 }
 0x322   :  { %v5896_v48 = vpack.c.bf16 %v1536_v22, %v1534_v23 }
 0x324   :  { %3905 = vmatpush1.bf16.msra.mxu1 %v5896_v48 }
 0x325   :  { %3907 = vmatprep.subr.bf16.mxu1 %v5289_v13 }
 0x3e8   :  { %v5901_v36 = vpop.f32.mrb[8].mxu0 }
 0x3e9   :  { %v5903_v6 = vpop.f32.mrb[9].mxu0  ;;  %v1448_v54 = vmul.f32 %v5901_v36, %v5901_v36 }
 0x3ea   :  { %v1449_v13 = vmul.f32 %v5903_v6, %v5903_v6 }
 0x3ec   :  { %v5905_v12 = vpop.f32.mrb[10].mxu0 }
 0x3ed   :  { %v1430_v60 = vadd.f32 %v5905_v12, %v5901_v36  ;;  %v1450_v9 = vmul.f32 %v5905_v12, %v5905_v12  ;;  %v5913_v16 = vpop.f32.mrb[11].mxu0 }
 0x3ee   :  { %v1439_v27 = vadd.f32 %v5913_v16, %v5903_v6  ;;  %v1451_v30 = vmul.f32 %v5913_v16, %v5913_v16 }
 0x3ef   :  { %v1456_v46 = vadd.f32 %v1450_v9, %v1448_v54 }
 0x3f0   :  { %v1465_v26 = vadd.f32 %v1451_v30, %v1449_v13  ;;  %v5921_v34 = vpop.f32.mrb[12].mxu0 }
 0x3f1   :  { %v1431_v42 = vadd.f32 %v1430_v60, %v5921_v34  ;;  %v1452_v45 = vmul.f32 %v5921_v34, %v5921_v34  ;;  %v5926_v53 = vpop.f32.mrb[13].mxu0 }
 0x3f2   :  { %6619 = vst [vmem:[#allocation7_spill] sm:$0xff] %v5926_v53  ;;  %v1440_v56 = vadd.f32 %v1439_v27, %v5926_v53  ;;  %v1453_v62 = vmul.f32 %v5926_v53, %v5926_v53 }
 0x3f3   :  { %v1457_v15 = vadd.f32 %v1456_v46, %v1452_v45 }
 0x3f4   :  { %v1466_v3 = vadd.f32 %v1465_v26, %v1453_v62  ;;  %v5931_v24 = vpop.f32.mrb[14].mxu0 }
 0x3f5   :  { %v1432_v35 = vadd.f32 %v1431_v42, %v5931_v24  ;;  %v1454_v37 = vmul.f32 %v5931_v24, %v5931_v24  ;;  %v5936_v51 = vpop.f32.mrb[15].mxu0 }
 0x3f6   :  { %6620 = vst [vmem:[#allocation8_spill] sm:$0xff] %v5936_v51  ;;  %v1441_v49 = vadd.f32 %v1440_v56, %v5936_v51  ;;  %v1455_v8 = vmul.f32 %v5936_v51, %v5936_v51 }
 0x3f7   :  { %v1433_v23 = vrot.slane %v1432_v35, 4  ;;  %v1458_v22 = vadd.f32 %v1457_v15, %v1454_v37  ;;  %v1765_v15 = vld [vmem:[%s6596_s7 + $0x28] sm:$0xff]  ;;  %v3075_v37 = vld [vmem:[%s6596_s7 + $0x120] sm:$0xff] }
 0x3f8   :  { %v1442_v54 = vrot.slane %v1441_v49, 4  ;;  %v1467_v60 = vadd.f32 %v1466_v3, %v1455_v8  ;;  %v1782_v8 = vld [vmem:[%s6596_s7 + $0xb0] sm:$0xff] }
 0x3f9   :  { %v1434_v9 = vadd.f32 %v1433_v23, %v1432_v35  ;;  %v1783_v23 = vld [vmem:[%s6596_s7 + $0xb8] sm:$0xff] }
 0x3fa   :  { %v1443_v13 = vadd.f32 %v1442_v54, %v1441_v49  ;;  %v1468_v27 = vrot.slane %v1467_v60, 4  ;;  %v3982_v54 = vpack.c.bf16 %v1783_v23, %v1782_v8  ;;  %v3086_v8 = vld [vmem:[%s6596_s7 + $0x178] sm:$0xff] }
 0x3fb   :  { %v1435_v30 = vrot.slane %v1434_v9, 2 }
 0x3fc   :  { %v1444_v46 = vrot.slane %v1443_v13, 2  ;;  %v1469_v26 = vadd.f32 %v1468_v27, %v1467_v60  ;;  %v3094_v60 = vld [vmem:[%s6596_s7 + $0x1b8] sm:$0xff] }
 0x3fd   :  { %v1436_v42 = vadd.f32 %v1435_v30, %v1434_v9  ;;  %v1766_v9 = vld [vmem:[%s6596_s7 + $0x30] sm:$0xff] }
 0x3fe   :  { %v1445_v45 = vadd.f32 %v1444_v46, %v1443_v13  ;;  %v1470_v62 = vrot.slane %v1469_v26, 2  ;;  %v1767_v13 = vld [vmem:[%s6596_s7 + $0x38] sm:$0xff]  ;;  %v3077_v46 = vld [vmem:[%s6596_s7 + $0x130] sm:$0xff] }
 0x3ff   :  { %v1437_v17 = vrot.slane %v1436_v42, 1  ;;  %v3984_v30 = vpack.c.bf16 %v1767_v13, %v1766_v9  ;;  %v2316_v13 = vld [vmem:[%s6597_s8] sm:$0xff] }
 0x400   :  { %v1446_v38 = vrot.slane %v1445_v45, 1  ;;  %v1471_v58 = vadd.f32 %v1470_v62, %v1469_v26  ;;  %v3078_v26 = vld [vmem:[%s6596_s7 + $0x138] sm:$0xff]  ;;  %v1785_v62 = vld [vmem:[%s6596_s7 + $0xc8] sm:$0xff] }
 0x401   :  { %v1438_v53 = vadd.f32 %v1437_v17, %v1436_v42  ;;  %v1459_v17 = vrot.slane %v1458_v22, 4  ;;  %v4016_v42 = vpack.c.bf16 %v3078_v26, %v3077_v46 }
 0x402   :  { %v1447_v56 = vadd.f32 %v1446_v38, %v1445_v45  ;;  %v1472_v63 = vrot.slane %v1471_v58, 1  ;;  %v1784_v45 = vld [vmem:[%s6596_s7 + $0xc0] sm:$0xff] }
 0x403   :  { %v1460_v38 = vadd.f32 %v1459_v17, %v1458_v22  ;;  %v3093_v22 = vld [vmem:[%s6596_s7 + $0x1b0] sm:$0xff]  ;;  %v3986_v17 = vpack.c.bf16 %v1785_v62, %v1784_v45 }
 0x404   :  { %1602 = vmatprep.mubr.f32.mxu1 %v1447_v56  ;;  %v1473_v51 = vadd.f32 %v1472_v63, %v1471_v58  ;;  %v4014_v27 = vpack.c.bf16 %v3094_v60, %v3093_v22  ;;  %v3095_v56 = vld [vmem:[%s6596_s7 + $0x1c0] sm:$0xff]  ;;  %v3120_v60 = vld [vmem:[%s6596_s7 + $0x288] sm:$0xff] }
 0x405   :  { %1603 = vmatmul.mubr.f32.vlgmr.msra.gmra.mrb[4].mxu1 %v1438_v53  ;;  %v1461_v63 = vrot.slane %v1460_v38, 2  ;;  %v1764_v53 = vld [vmem:[%s6596_s7 + $0x20] sm:$0xff] }
 0x406   :  { %3909 = vmatpush1.bf16.msra.mxu1 %v5300_v33  ;;  %1673 = vmatprep.mubr.f32.mxu1 %v1473_v51  ;;  %v3980_v35 = vpack.c.bf16 %v1765_v15, %v1764_v53  ;;  %v3076_v51 = vld [vmem:[%s6596_s7 + $0x128] sm:$0xff]  ;;  %v3101_v15 = vld [vmem:[%s6596_s7 + $0x1f0] sm:$0xff] }
 0x407   :  { %3911 = vmatprep.subr.bf16.mxu1 %v5302_v40  ;;  %v1462_v58 = vadd.f32 %v1461_v63, %v1460_v38  ;;  %v4012_v49 = vpack.c.bf16 %v3076_v51, %v3075_v37  ;;  %v3096_v38 = vld [vmem:[%s6596_s7 + $0x1c8] sm:$0xff]  ;;  %v1768_v63 = vld [vmem:[%s6596_s7 + $0x40] sm:$0xff]  ;;  %v1775_v51 = vld [vmem:[%s6596_s7 + $0x78] sm:$0xff] }
 0x409   :  { %v1463_v33 = vrot.slane %v1462_v58, 1 }
 0x40a   :  { %3913 = vmatpush1.bf16.msra.mxu1 %v5324_v31  ;;  %v1776_v31 = vld [vmem:[%s6596_s7 + $0x80] sm:$0xff] }
 0x40b   :  { %3915 = vmatprep.subr.bf16.mxu1 %v5330_v41  ;;  %v1464_v40 = vadd.f32 %v1463_v33, %v1462_v58  ;;  %v1777_v41 = vld [vmem:[%s6596_s7 + $0x88] sm:$0xff]  ;;  %v4018_v33 = vpack.c.bf16 %v3096_v38, %v3095_v56 }
 0x40c   :  { %v1769_v58 = vld [vmem:[%s6596_s7 + $0x48] sm:$0xff] }
 0x40e   :  { %3917 = vmatpush1.bf16.msra.mxu1 %v5354_v4  ;;  %v3087_v4 = vld [vmem:[%s6596_s7 + $0x180] sm:$0xff] }
 0x40f   :  { %3919 = vmatprep.subr.bf16.mxu1 %v5360_v14  ;;  %v3970_v14 = vpack.c.bf16 %v1777_v41, %v1776_v31  ;;  %v3079_v31 = vld [vmem:[%s6596_s7 + $0x140] sm:$0xff]  ;;  %v3080_v41 = vld [vmem:[%s6596_s7 + $0x148] sm:$0xff] }
 0x412   :  { %3921 = vmatpush1.bf16.msra.mxu1 %v5384_v59  ;;  %v3088_v59 = vld [vmem:[%s6596_s7 + $0x188] sm:$0xff] }
 0x413   :  { %3923 = vmatprep.subr.bf16.mxu1 %v5390_v10  ;;  %v1760_v10 = vld [vmem:[%s6596_s7] sm:$0xff] }
 0x416   :  { %3925 = vmatpush1.bf16.msra.mxu1 %v5414_v0  ;;  %v1761_v0 = vld [vmem:[%s6596_s7 + $0x8] sm:$0xff] }
 0x417   :  { %3927 = vmatprep.subr.bf16.mxu1 %v5420_v1  ;;  %v4002_v1 = vpack.c.bf16 %v3088_v59, %v3087_v4  ;;  %v4020_v4 = vpack.c.bf16 %v3080_v41, %v3079_v31  ;;  %v1787_v59 = vld [vmem:[%s6596_s7 + $0xd8] sm:$0xff] }
 0x418   :  { %v6622_v31 = vld [vmem:[#allocation8_spill] sm:$0xff] }
 0x419   :  { %4003 = vmatprep.subr.bf16.mxu0 %v4002_v1  ;;  %v3098_v1 = vld [vmem:[%s6596_s7 + $0x1d8] sm:$0xff] }
 0x41a   :  { %3929 = vmatpush1.bf16.msra.mxu1 %v5444_v18  ;;  %v3972_v18 = vpack.c.bf16 %v1761_v0, %v1760_v10  ;;  %v3097_v10 = vld [vmem:[%s6596_s7 + $0x1d0] sm:$0xff] }
 0x41b   :  { %3931 = vmatprep.subr.bf16.mxu1 %v5450_v29  ;;  %v3071_v29 = vld [vmem:[%s6596_s7 + $0x100] sm:$0xff] }
 0x41e   :  { %3933 = vmatpush1.bf16.msra.mxu1 %v5474_v19  ;;  %v3072_v19 = vld [vmem:[%s6596_s7 + $0x108] sm:$0xff] }
 0x41f   :  { %3935 = vmatprep.subr.bf16.mxu1 %v5480_v11  ;;  %v1778_v11 = vld [vmem:[%s6596_s7 + $0x90] sm:$0xff] }
 0x422   :  { %3937 = vmatpush1.bf16.msra.mxu1 %v5504_v61  ;;  %v4004_v61 = vpack.c.bf16 %v3072_v19, %v3071_v29  ;;  %v1771_v29 = vld [vmem:[%s6596_s7 + $0x58] sm:$0xff]  ;;  %v4022_v19 = vpack.c.bf16 %v3098_v1, %v3097_v10 }
 0x423   :  { %3939 = vmatprep.subr.bf16.mxu1 %v5507_v21  ;;  %v1779_v21 = vld [vmem:[%s6596_s7 + $0x98] sm:$0xff] }
 0x424   :  { %4005 = vmatpush3.bf16.msra.mxu0 %v4004_v61  ;;  %v3081_v61 = vld [vmem:[%s6596_s7 + $0x150] sm:$0xff] }
 0x426   :  { %3941 = vmatpush1.bf16.msra.mxu1 %v5528_v57  ;;  %v3089_v57 = vld [vmem:[%s6596_s7 + $0x190] sm:$0xff] }
 0x427   :  { %3943 = vmatprep.subr.bf16.mxu1 %v5780_v39  ;;  %v3090_v39 = vld [vmem:[%s6596_s7 + $0x198] sm:$0xff] }
 0x42a   :  { %3945 = vmatpush1.bf16.msra.mxu1 %v5788_v52  ;;  %v3974_v52 = vpack.c.bf16 %v1779_v21, %v1778_v11  ;;  %v3082_v21 = vld [vmem:[%s6596_s7 + $0x158] sm:$0xff] }
 0x42b   :  { %3947 = vmatprep.subr.bf16.mxu1 %v5798_v5  ;;  %v4006_v5 = vpack.c.bf16 %v3090_v39, %v3089_v57  ;;  %v1788_v57 = vld [vmem:[%s6596_s7 + $0xe0] sm:$0xff]  ;;  %v4024_v39 = vpack.c.bf16 %v3082_v21, %v3081_v61 }
 0x42d   :  { %4007 = vmatprep.subr.bf16.mxu0 %v4006_v5  ;;  %v3099_v5 = vld [vmem:[%s6596_s7 + $0x1e0] sm:$0xff] }
 0x42e   :  { %3949 = vmatpush1.bf16.msra.mxu1 %v5806_v20  ;;  %v1762_v20 = vld [vmem:[%s6596_s7 + $0x10] sm:$0xff] }
 0x42f   :  { %3951 = vmatprep.subr.bf16.mxu1 %v5816_v44  ;;  %v1763_v44 = vld [vmem:[%s6596_s7 + $0x18] sm:$0xff] }
 0x432   :  { %3953 = vmatpush1.bf16.msra.mxu1 %v5824_v28  ;;  %v3073_v28 = vld [vmem:[%s6596_s7 + $0x110] sm:$0xff] }
 0x433   :  { %3955 = vmatprep.subr.bf16.mxu1 %v5834_v43  ;;  %v3976_v43 = vpack.c.bf16 %v1763_v44, %v1762_v20  ;;  %v3100_v20 = vld [vmem:[%s6596_s7 + $0x1e8] sm:$0xff] }
 0x436   :  { %3957 = vmatpush1.bf16.msra.mxu1 %v5842_v55  ;;  %v3074_v55 = vld [vmem:[%s6596_s7 + $0x118] sm:$0xff] }
 0x437   :  { %3959 = vmatprep.subr.bf16.mxu1 %v5852_v7  ;;  %v4008_v7 = vpack.c.bf16 %v3074_v55, %v3073_v28  ;;  %v4026_v28 = vpack.c.bf16 %v3100_v20, %v3099_v5  ;;  %v1773_v55 = vld [vmem:[%s6596_s7 + $0x68] sm:$0xff] }
 0x439   :  { %4009 = vmatpush3.bf16.msra.mxu0 %v4008_v7  ;;  %v3083_v7 = vld [vmem:[%s6596_s7 + $0x160] sm:$0xff] }
 0x43a   :  { %3961 = vmatpush1.bf16.msra.mxu1 %v5863_v25  ;;  %v1780_v25 = vld [vmem:[%s6596_s7 + $0xa0] sm:$0xff] }
 0x43b   :  { %3963 = vmatprep.subr.bf16.mxu1 %v5875_v47  ;;  %v1781_v47 = vld [vmem:[%s6596_s7 + $0xa8] sm:$0xff] }
 0x43e   :  { %3965 = vmatpush1.bf16.msra.mxu1 %v5884_v50  ;;  %v3091_v50 = vld [vmem:[%s6596_s7 + $0x1a0] sm:$0xff] }
 0x43f   :  { %3967 = vmatprep.subr.bf16.mxu1 %v5887_v32  ;;  %v3978_v32 = vpack.c.bf16 %v1781_v47, %v1780_v25  ;;  %v3084_v47 = vld [vmem:[%s6596_s7 + $0x168] sm:$0xff] }
 0x442   :  { %3969 = vmatpush1.bf16.msra.mxu1 %v5896_v48  ;;  %v3092_v48 = vld [vmem:[%s6596_s7 + $0x1a8] sm:$0xff] }
 0x443   :  { %3971 = vmatprep.subr.bf16.mxu1 %v3970_v14  ;;  %v4010_v3 = vpack.c.bf16 %v3092_v48, %v3091_v50  ;;  %v1786_v14 = vld [vmem:[%s6596_s7 + $0xd0] sm:$0xff]  ;;  %v4028_v48 = vpack.c.bf16 %v3084_v47, %v3083_v7 }
 0x444   :  { %v3990_v0 = vpack.c.bf16 %v1787_v59, %v1786_v14  ;;  %v1790_v50 = vld [vmem:[%s6596_s7 + $0xf0] sm:$0xff] }
 0x445   :  { %1674 = vmatmul.mubr.f32.vlgmr.msra.gmra.mrb[6].mxu1 %v1464_v40  ;;  %4011 = vmatprep.subr.bf16.mxu0 %v4010_v3  ;;  %v3988_v40 = vpack.c.bf16 %v1769_v58, %v1768_v63  ;;  %v3102_v3 = vld [vmem:[%s6596_s7 + $0x1f8] sm:$0xff] }
 0x446   :  { %3973 = vmatpush3.bf16.msra.mxu1 %v3972_v18  ;;  %4013 = vmatpush3.bf16.msra.mxu0 %v4012_v49  ;;  %v1770_v18 = vld [vmem:[%s6596_s7 + $0x50] sm:$0xff]  ;;  %v4030_v37 = vpack.c.bf16 %v3102_v3, %v3101_v15 }
 0x447   :  { %3975 = vmatprep.subr.bf16.mxu1 %v3974_v52  ;;  %4015 = vmatprep.subr.bf16.mxu0 %v4014_v27  ;;  %v3992_v11 = vpack.c.bf16 %v1771_v29, %v1770_v18  ;;  %v1789_v52 = vld [vmem:[%s6596_s7 + $0xe8] sm:$0xff]  ;;  %v3085_v49 = vld [vmem:[%s6596_s7 + $0x170] sm:$0xff] }
 0x448   :  { %v3994_v44 = vpack.c.bf16 %v1789_v52, %v1788_v57  ;;  %v4032_v22 = vpack.c.bf16 %v3086_v8, %v3085_v49  ;;  %v2317_v27 = vld [vmem:[%s6597_s8 + $0x8] sm:$0xff]  ;;  %v1428_v57 = vld [vmem:[%s6598_s5] sm:$0x3] }
 0x44a   :  { %3977 = vmatpush3.bf16.msra.mxu1 %v3976_v43  ;;  %4017 = vmatpush3.bf16.msra.mxu0 %v4016_v42  ;;  %v1772_v43 = vld [vmem:[%s6596_s7 + $0x60] sm:$0xff] }
 0x44b   :  { %3979 = vmatprep.subr.bf16.mxu1 %v3978_v32  ;;  %4019 = vmatprep.subr.bf16.mxu0 %v4018_v33  ;;  %v3996_v25 = vpack.c.bf16 %v1773_v55, %v1772_v43  ;;  %v1791_v32 = vld [vmem:[%s6596_s7 + $0xf8] sm:$0xff]  ;;  %v6621_v33 = vld [vmem:[#allocation7_spill] sm:$0xff] }
 0x44c   :  { %v3998_v53 = vpack.c.bf16 %v1791_v32, %v1790_v50 }
 0x44e   :  { %3981 = vmatpush3.bf16.msra.mxu1 %v3980_v35  ;;  %4021 = vmatpush3.bf16.msra.mxu0 %v4020_v4  ;;  %v1774_v35 = vld [vmem:[%s6596_s7 + $0x70] sm:$0xff]  ;;  %v4198_v4 = vmov 1983009808  }
 0x44f   :  { %3983 = vmatprep.subr.bf16.mxu1 %v3982_v54  ;;  %4023 = vmatprep.subr.bf16.mxu0 %v4022_v19  ;;  %v4000_v23 = vpack.c.bf16 %v1775_v51, %v1774_v35  ;;  %v3119_v54 = vld [vmem:[%s6596_s7 + $0x280] sm:$0xff]  ;;  %v2162_v14 = vunpack.c.l.s4 %v4198_v4 }
 0x450   :  { %v4034_v9 = vpack.c.bf16 %v3120_v60, %v3119_v54  ;;  %v3103_v35 = vld [vmem:[%s6596_s7 + $0x200] sm:$0xff]  ;;  %v3121_v54 = vld [vmem:[%s6596_s7 + $0x290] sm:$0xff]  ;;  %v3122_v60 = vld [vmem:[%s6596_s7 + $0x298] sm:$0xff] }
 0x451   :  { %v2163_v18 = vunpack.c.0.s8 %v2162_v14  ;;  %v3123_v14 = vld [vmem:[%s6596_s7 + $0x2a0] sm:$0xff] }
 0x452   :  { %3985 = vmatpush3.bf16.msra.mxu1 %v3984_v30  ;;  %4025 = vmatpush3.bf16.msra.mxu0 %v4024_v39  ;;  %v6176_v30 = vpack.c.bf16 %v2317_v27, %v2316_v13  ;;  %v1429_v39 = vld [vmem:[%s6599_s6] sm:$0x3] }
 0x453   :  { %3987 = vmatprep.subr.bf16.mxu1 %v3986_v17  ;;  %4027 = vmatprep.subr.bf16.mxu0 %v4026_v28  ;;  %v6624_v28 = vld [vmem:[#allocation5_spill] sm:$0xff]  ;;  %v6210_v55 = vrot.slane %v1429_v39, %v5163_v2 }
 0x454   :  { %v6207_v43 = vrot.slane %v1428_v57, %v6624_v28  ;;  %v6214_v47 = vrot.slane %v1429_v39, %v6624_v28 }
 0x456   :  { %3989 = vmatpush3.bf16.msra.mxu1 %v3988_v40  ;;  %4029 = vmatpush3.bf16.msra.mxu0 %v4028_v48 }
 0x457   :  { %3991 = vmatprep.subr.bf16.mxu1 %v3990_v0  ;;  %4031 = vmatprep.subr.bf16.mxu0 %v4030_v37 }
 0x45a   :  { %3993 = vmatpush3.bf16.msra.mxu1 %v3992_v11  ;;  %4033 = vmatpush3.bf16.msra.mxu0 %v4032_v22 }
 0x45b   :  { %3995 = vmatprep.subr.bf16.mxu1 %v3994_v44  ;;  %4067 = vmatprep.subr.bf16.mxu0 %v6176_v30  ;;  %v6204_v44 = vrot.slane %v1428_v57, %v5163_v2  ;;  %v3108_v57 = vld [vmem:[%s6596_s7 + $0x228] sm:$0xff] }
 0x45e   :  { %3997 = vmatpush3.bf16.msra.mxu1 %v3996_v25 }
 0x45f   :  { %3999 = vmatprep.subr.bf16.mxu1 %v3998_v53 }
 0x462   :  { %4001 = vmatpush3.bf16.msra.mxu1 %v4000_v23  ;;  %v3104_v23 = vld [vmem:[%s6596_s7 + $0x208] sm:$0xff] }
 0x463   :  { %4035 = vmatprep.subr.bf16.mxu1 %v4034_v9 }
 0x4d8   :  { %v1604_v46 = vpop.f32.mrb[4].mxu1 }
 0x4d9   :  { %v1689_v26 = vrot.slane %v1604_v46, %v5163_v2  ;;  %v1606_v42 = vpop.f32.mrb[5].mxu1  ;;  %v1680_v59 = vmul.f32 %v1604_v46, %v1604_v46  ;;  %v2318_v46 = vld [vmem:[%s6597_s8 + $0x10] sm:$0xff] }
 0x4da   :  { %v1693_v45 = vrot.slane %v1606_v42, %v5163_v2  ;;  %v1681_v10 = vmul.f32 %v1606_v42, %v1606_v42  ;;  %v4194_v42 = vld [vmem:[%s6591_s0 + $0x8] sm:$0xff] }
 0x4db   :  { %v1694_v62 = vsub.f32 %v5901_v36, %v1689_v26  ;;  %v1696_v56 = vsub.f32 %v5905_v12, %v1689_v26  ;;  %v1698_v17 = vsub.f32 %v5921_v34, %v1689_v26  ;;  %v1700_v38 = vsub.f32 %v5931_v24, %v1689_v26  ;;  %v2319_v26 = vld [vmem:[%s6597_s8 + $0x18] sm:$0xff] }
 0x4dc   :  { %v1695_v63 = vsub.f32 %v5903_v6, %v1693_v45  ;;  %v1697_v58 = vsub.f32 %v5913_v16, %v1693_v45  ;;  %v1699_v40 = vsub.f32 %v6621_v33, %v1693_v45  ;;  %v1701_v41 = vsub.f32 %v6622_v31, %v1693_v45  ;;  %v6623_v6 = vld [vmem:[#allocation6_spill] sm:$0xff]  ;;  %v4193_v16 = vld [vmem:[%s6591_s0] sm:$0xff] }
 0x4dd   :  { %v6190_v11 = vsub.s32 %v2163_v18, %v6623_v6  ;;  %v2248_v21 = vcombine.high %v4193_v16, %v4193_v16  ;;  %v4070_v4 = vpack.c.bf16 %v2319_v26, %v2318_v46  ;;  %v2321_v18 = vld [vmem:[%s6597_s8 + $0x28] sm:$0xff]  ;;  %v3127_v46 = vld [vmem:[%s6596_s7 + $0x2c0] sm:$0xff] }
 0x4df   :  { %v2255_v61 = vrot.slane %v4193_v16, %v6190_v11  ;;  %v2262_v5 = vrot.slane %v2248_v21, %v6190_v11  ;;  %v2272_v45 = vrot.slane %v4194_v42, %v6190_v11  ;;  %v3107_v21 = vld [vmem:[%s6596_s7 + $0x220] sm:$0xff] }
 0x4e1   :  { %v2263_v52 = vcombine.high %v2255_v61, %v2255_v61  ;;  %v2335_v50 = vrot.slane %v2255_v61, %v5163_v2  ;;  %v2264_v53 = vcombine.high %v2262_v5, %v2262_v5  ;;  %v2343_v15 = vrot.slane %v2262_v5, %v5163_v2 }
 0x4e3   :  { %v2339_v32 = vrot.slane %v2263_v52, %v5163_v2  ;;  %v2347_v31 = vrot.slane %v2264_v53, %v5163_v2 }
 0x518   :  { %v1675_v0 = vpop.f32.mrb[6].mxu1 }
 0x519   :  { %v1682_v36 = vsub.f32 %v1675_v0, %v1680_v59  ;;  %v1677_v1 = vpop.f32.mrb[7].mxu1 }
 0x51a   :  { %v1683_v12 = vsub.f32 %v1677_v1, %v1681_v10  ;;  %v3124_v1 = vld [vmem:[%s6596_s7 + $0x2a8] sm:$0xff] }
 0x51b   :  { %v1684_v34 = vmax.f32 %v1682_v36, 0.0  ;;  %v4042_v52 = vpack.c.bf16 %v3124_v1, %v3123_v14 }
 0x51c   :  { %v1685_v29 = vmax.f32 %v1683_v12, 0.0  ;;  %v2320_v12 = vld [vmem:[%s6597_s8 + $0x20] sm:$0xff] }
 0x51d   :  { %v1702_v24 = vadd.f32 1e-05, %v1684_v34  ;;  %v2280_v34 = vcombine.high %v2272_v45, %v2272_v45  ;;  %v4074_v5 = vpack.c.bf16 %v2321_v18, %v2320_v12 }
 0x51e   :  { %v1703_v19 = vadd.f32 1e-05, %v1685_v29 }
 0x51f   :  { %4187 = vrsqrt.f32 %v1702_v24  ;;  %v2351_v24 = vrot.slane %v2272_v45, %v5163_v2  ;;  %v2324_v45 = vld [vmem:[%s6597_s8 + $0x40] sm:$0xff] }
 0x520   :  { %4189 = vrsqrt.f32 %v1703_v19  ;;  %v4195_v19 = vld [vmem:[%s6591_s0 + $0x10] sm:$0xff] }
 0x521   :  { %v6287_v6 = vrot.slane %v4195_v19, %v6190_v11 }
 0x523   :  { %v2297_v53 = vcombine.high %v6287_v6, %v6287_v6 }
 0x525   :  { %v2371_v26 = vrot.slane %v2297_v53, %v5163_v2  ;;  %v3115_v53 = vld [vmem:[%s6596_s7 + $0x260] sm:$0xff] }
 0x529   :  { %v4188_v20 = vpop.eup %4187 }
 0x52a   :  { %v4190_v7 = vpop.eup %4189  ;;  %v1709_v25 = vrot.slane %v4188_v20, %v5163_v2  ;;  %v2282_v20 = vcombine.high %v4195_v19, %v4195_v19 }
 0x52b   :  { %v1713_v48 = vrot.slane %v4190_v7, %v5163_v2 }
 0x52c   :  { %v1714_v3 = vmul.f32 %v1709_v25, %v1694_v62  ;;  %v1716_v37 = vmul.f32 %v1709_v25, %v1696_v56  ;;  %v1718_v51 = vmul.f32 %v1709_v25, %v1698_v17  ;;  %v6223_v49 = vmul.f32 %v1709_v25, %v1700_v38  ;;  %v3105_v17 = vld [vmem:[%s6596_s7 + $0x210] sm:$0xff]  ;;  %v3106_v38 = vld [vmem:[%s6596_s7 + $0x218] sm:$0xff] }
 0x52d   :  { %v1715_v8 = vmul.f32 %v1713_v48, %v1695_v63  ;;  %v1717_v22 = vmul.f32 %v1713_v48, %v1697_v58  ;;  %v1719_v9 = vmul.f32 %v1713_v48, %v1699_v40  ;;  %v6234_v13 = vmul.f32 %v1713_v48, %v1701_v41  ;;  %v3125_v25 = vld [vmem:[%s6596_s7 + $0x2b0] sm:$0xff] }
 0x52e   :  { %v1733_v27 = vmul.f32 %v6204_v44, %v1714_v3  ;;  %v2397_v62 = vsel %vm2396_vm4, %v2339_v32, %v2335_v50  ;;  %v2265_v63 = vcombine.high %v4194_v42, %v4194_v42  ;;  %v4036_v58 = vpack.c.bf16 %v3104_v23, %v3103_v35  ;;  %v2322_v35 = vld [vmem:[%s6597_s8 + $0x30] sm:$0xff] }
 0x52f   :  { %v1734_v56 = vmul.f32 %v6207_v43, %v1715_v8  ;;  %v1736_v33 = vmul.f32 %v6207_v43, %v1717_v22  ;;  %v4038_v40 = vpack.c.bf16 %v3122_v60, %v3121_v54  ;;  %v2399_v59 = vsel %vm2398_vm5, %v2343_v15, %v2397_v62  ;;  %v3109_v60 = vld [vmem:[%s6596_s7 + $0x230] sm:$0xff]  ;;  %v2325_v62 = vld [vmem:[%s6597_s8 + $0x48] sm:$0xff] }
 0x530   :  { %v6265_v10 = vadd.f32 %v6210_v55, %v1733_v27  ;;  %v1735_v0 = vmul.f32 %v6204_v44, %v1716_v37  ;;  %v4040_v36 = vpack.c.bf16 %v3106_v38, %v3105_v17  ;;  %v6280_v29 = vrot.slane %v2265_v63, %v6190_v11  ;;  %v2323_v37 = vld [vmem:[%s6597_s8 + $0x38] sm:$0xff] }
 0x531   :  { %v6258_v41 = vadd.f32 %v6214_v47, %v1734_v56  ;;  %v6292_v16 = vadd.f32 %v6214_v47, %v1736_v33  ;;  %v1738_v61 = vmul.f32 %v6207_v43, %v1719_v9  ;;  %v2401_v39 = vsel %vm2400_vm6, %v2347_v31, %v2399_v59  ;;  %v3110_v9 = vld [vmem:[%s6596_s7 + $0x238] sm:$0xff]  ;;  %v3111_v33 = vld [vmem:[%s6596_s7 + $0x240] sm:$0xff]  ;;  %v3129_v31 = vld [vmem:[%s6596_s7 + $0x2d0] sm:$0xff] }
 0x532   :  { %v6306_v28 = vadd.f32 %v6210_v55, %v1735_v0  ;;  %v1737_v7 = vmul.f32 %v6204_v44, %v1718_v51  ;;  %v2355_v50 = vrot.slane %v2280_v34, %v5163_v2  ;;  %v4044_v32 = vpack.c.bf16 %v3108_v57, %v3107_v21  ;;  %v2326_v59 = vld [vmem:[%s6597_s8 + $0x50] sm:$0xff]  ;;  %v2327_v0 = vld [vmem:[%s6597_s8 + $0x58] sm:$0xff]  ;;  %v3131_v57 = vld [vmem:[%s6596_s7 + $0x2e0] sm:$0xff] }
 0x533   :  { %1856 = vmatprep.mubr.f32.mxu1 %v6258_v41  ;;  %1974 = vmatprep.mubr.f32.mxu0 %v6258_v41  ;;  %v2403_v48 = vsel %vm2402_vm7, %v2351_v24, %v2401_v39  ;;  %v6322_v15 = vadd.f32 %v6214_v47, %v1738_v61  ;;  %v1740_v3 = vmul.f32 %v6207_v43, %v6234_v13  ;;  %v3113_v61 = vld [vmem:[%s6596_s7 + $0x250] sm:$0xff]  ;;  %v3114_v21 = vld [vmem:[%s6596_s7 + $0x258] sm:$0xff] }
 0x534   :  { %1857 = vmatmul.mubr.f32.vlgmr.msra.gmra.mrb[8].mxu1 %v6265_v10  ;;  %1975 = vmatmul.mubr.f32.vlgmr.msra.gmra.mrb[16].mxu0 %v6265_v10  ;;  %v2281_v51 = vcombine.high %v6280_v29, %v6280_v29  ;;  %v2359_v23 = vrot.slane %v6280_v29, %v5163_v2  ;;  %v2296_v22 = vrot.slane %v2282_v20, %v6190_v11 }
 0x535   :  { %4037 = vmatpush3.bf16.msra.mxu1 %v4036_v58  ;;  %4069 = vmatpush3.bf16.msra.mxu0 %v6176_v30  ;;  %v3126_v30 = vld [vmem:[%s6596_s7 + $0x2b8] sm:$0xff]  ;;  %v6340_v43 = vadd.f32 %v6210_v55, %v1737_v7  ;;  %v1739_v54 = vmul.f32 %v6204_v44, %v6223_v49  ;;  %v2405_v13 = vsel %vm2404_vm8, %v2355_v50, %v2403_v48  ;;  %v3128_v44 = vld [vmem:[%s6596_s7 + $0x2c8] sm:$0xff] }
 0x536   :  { %1861 = vmatprep.mubr.f32.mxu1 %v6292_v16  ;;  %1979 = vmatprep.mubr.f32.mxu0 %v6292_v16  ;;  %v4046_v8 = vpack.c.bf16 %v3126_v30, %v3125_v25  ;;  %v4078_v27 = vpack.c.bf16 %v2323_v37, %v2322_v35  ;;  %v2367_v49 = vrot.slane %v6287_v6, %v5163_v2  ;;  %v3133_v35 = vld [vmem:[%s6596_s7 + $0x2f0] sm:$0xff]  ;;  %v3134_v37 = vld [vmem:[%s6596_s7 + $0x2f8] sm:$0xff] }
 0x537   :  { %4039 = vmatprep.subr.bf16.mxu1 %v4038_v40  ;;  %4071 = vmatprep.subr.bf16.mxu0 %v4070_v4  ;;  %v6363_v42 = vadd.f32 %v6214_v47, %v1740_v3  ;;  %v2363_v56 = vrot.slane %v2281_v51, %v5163_v2  ;;  %v4048_v17 = vpack.c.bf16 %v3110_v9, %v3109_v60  ;;  %v3112_v40 = vld [vmem:[%s6596_s7 + $0x248] sm:$0xff]  ;;  %v2330_v51 = vld [vmem:[%s6597_s8 + $0x70] sm:$0xff] }
 0x538   :  { %1862 = vmatmul.mubr.f32.gmra.mrb[10].mxu1 %v6306_v28  ;;  %1980 = vmatmul.mubr.f32.gmra.mrb[18].mxu0 %v6306_v28  ;;  %v2407_v38 = vsel %vm2406_vm9, %v2359_v23, %v2405_v13  ;;  %v2298_v63 = vcombine.high %v2296_v22, %v2296_v22  ;;  %v6376_v47 = vadd.f32 %v6210_v55, %v1739_v54  ;;  %v3130_v55 = vld [vmem:[%s6596_s7 + $0x2d8] sm:$0xff]  ;;  %v3116_v3 = vld [vmem:[%s6596_s7 + $0x268] sm:$0xff] }
 0x539   :  { %4041 = vmatpush3.bf16.msra.mxu1 %v4040_v36  ;;  %4073 = vmatpush3.bf16.msra.mxu0 %v4070_v4  ;;  %v4050_v58 = vpack.c.bf16 %v3128_v44, %v3127_v46  ;;  %v2375_v4 = vrot.slane %v2296_v22, %v5163_v2  ;;  %v4082_v14 = vpack.c.bf16 %v2325_v62, %v2324_v45  ;;  %v4196_v36 = vld [vmem:[%s6591_s0 + $0x18] sm:$0xff] }
 0x53a   :  { %1866 = vmatprep.mubr.f32.mxu1 %v6322_v15  ;;  %1984 = vmatprep.mubr.f32.mxu0 %v6322_v15  ;;  %v2306_v1 = vrot.slane %v4196_v36, %v6190_v11  ;;  %v2410_v12 = vsel %vm2396_vm4, %v2371_v26, %v2367_v49  ;;  %v2409_v18 = vsel %vm2408_vm10, %v2363_v56, %v2407_v38  ;;  %v3118_v46 = vld [vmem:[%s6596_s7 + $0x278] sm:$0xff]  ;;  %v2512_v38 = vld [vmem:[%s6600_s12] sm:$0xff] }
 0x53b   :  { %4043 = vmatprep.subr.bf16.mxu1 %v4042_v52  ;;  %4075 = vmatprep.subr.bf16.mxu0 %v4074_v5  ;;  %v4052_v34 = vpack.c.bf16 %v3112_v40, %v3111_v33  ;;  %v2299_v29 = vcombine.high %v4196_v36, %v4196_v36  ;;  %v2379_v24 = vrot.slane %v2298_v63, %v5163_v2  ;;  %v2328_v52 = vld [vmem:[%s6597_s8 + $0x60] sm:$0xff]  ;;  %v2517_v63 = vld [vmem:[%s6600_s12 + $0x28] sm:$0xff]  ;;  %v2519_v33 = vld [vmem:[%s6600_s12 + $0x38] sm:$0xff] }
 0x53c   :  { %1867 = vmatmul.mubr.f32.gmra.mrb[12].mxu1 %v6340_v43  ;;  %1985 = vmatmul.mubr.f32.gmra.mrb[20].mxu0 %v6340_v43  ;;  %v4054_v19 = vpack.c.bf16 %v3130_v55, %v3129_v31  ;;  %v4086_v6 = vpack.c.bf16 %v2327_v0, %v2326_v59  ;;  %v2411_v39 = vsel %vm2398_vm5, %v2375_v4, %v2410_v12  ;;  %v2520_v31 = vld [vmem:[%s6600_s12 + $0x40] sm:$0xff]  ;;  %v2521_v4 = vld [vmem:[%s6600_s12 + $0x48] sm:$0xff]  ;;  %v2522_v55 = vld [vmem:[%s6600_s12 + $0x50] sm:$0xff] }
 0x53d   :  { %4045 = vmatpush3.bf16.msra.mxu1 %v4044_v32  ;;  %4077 = vmatpush3.bf16.msra.mxu0 %v4074_v5  ;;  %v2329_v5 = vld [vmem:[%s6597_s8 + $0x68] sm:$0xff]  ;;  %v2314_v20 = vcombine.high %v2306_v1, %v2306_v1  ;;  %v2383_v7 = vrot.slane %v2306_v1, %v5163_v2  ;;  %v4056_v25 = vpack.c.bf16 %v3114_v21, %v3113_v61  ;;  %v2523_v59 = vld [vmem:[%s6600_s12 + $0x58] sm:$0xff]  ;;  %v2524_v36 = vld [vmem:[%s6600_s12 + $0x60] sm:$0xff] }
 0x53e   :  { %1871 = vmatprep.mubr.f32.mxu1 %v6363_v42  ;;  %1989 = vmatprep.mubr.f32.mxu0 %v6363_v42  ;;  %v2313_v30 = vrot.slane %v2299_v29, %v6190_v11  ;;  %v2412_v50 = vsel %vm2400_vm6, %v2379_v24, %v2411_v39  ;;  %v4090_v48 = vpack.c.bf16 %v2329_v5, %v2328_v52  ;;  %v2525_v1 = vld [vmem:[%s6600_s12 + $0x68] sm:$0xff]  ;;  %v2527_v29 = vld [vmem:[%s6600_s12 + $0x78] sm:$0xff] }
 0x53f   :  { %4047 = vmatprep.subr.bf16.mxu1 %v4046_v8  ;;  %4079 = vmatprep.subr.bf16.mxu0 %v4078_v27  ;;  %v2331_v8 = vld [vmem:[%s6597_s8 + $0x78] sm:$0xff]  ;;  %v2387_v23 = vrot.slane %v2314_v20, %v5163_v2  ;;  %v2413_v22 = vsel %vm2402_vm7, %v2383_v7, %v2412_v50  ;;  %v4060_v54 = vpack.c.bf16 %v3116_v3, %v3115_v53 }
 0x540   :  { %1872 = vmatmul.mubr.f32.gmra.mrb[14].mxu1 %v6376_v47  ;;  %1990 = vmatmul.mubr.f32.gmra.mrb[22].mxu0 %v6376_v47  ;;  %v2315_v60 = vcombine.high %v2313_v30, %v2313_v30  ;;  %v4062_v9 = vpack.c.bf16 %v3134_v37, %v3133_v35  ;;  %v4094_v13 = vpack.c.bf16 %v2331_v8, %v2330_v51 }
 0x541   :  { %4049 = vmatpush3.bf16.msra.mxu1 %v4048_v17  ;;  %4081 = vmatpush3.bf16.msra.mxu0 %v4078_v27  ;;  %v3117_v27 = vld [vmem:[%s6596_s7 + $0x270] sm:$0xff]  ;;  %v2391_v44 = vrot.slane %v2313_v30, %v5163_v2  ;;  %v2414_v49 = vsel %vm2404_vm8, %v2387_v23, %v2413_v22  ;;  %v4199_v17 = vmov 0.0|0.0   ;;  %v4114_v0 = vpack.c.bf16 %v2523_v59, %v2522_v55 }
 0x542   :  { %2092 = vmatprep.mubr.f32.mxu1 %v6258_v41  ;;  %4051 = vmatprep.subr.bf16.mxu1 %v4050_v58  ;;  %v3132_v41 = vld [vmem:[%s6596_s7 + $0x2e8] sm:$0xff]  ;;  %v4064_v26 = vpack.c.bf16 %v3118_v46, %v3117_v27  ;;  %v2395_v45 = vrot.slane %v2315_v60, %v5163_v2  ;;  %v2518_v58 = vld [vmem:[%s6600_s12 + $0x30] sm:$0xff]  ;;  %v4117_v12 = vpack.c.bf16 %v2525_v1, %v2524_v36  ;;  %v6626_v46 = vlaneseq }
 0x543   :  { %4083 = vmatprep.subr.bf16.mxu0 %v4082_v14  ;;  %3353 = vmatprep.mubr.f32.mxu0 %v2409_v18  ;;  %v4058_v32 = vpack.c.bf16 %v3132_v41, %v3131_v57  ;;  %v2415_v62 = vsel %vm2406_vm9, %v2391_v44, %v2414_v49  ;;  %v4108_v40 = vpack.c.bf16 %v2519_v33, %v2518_v58  ;;  %v4200_v18 = vmov -inf  }
 0x544   :  { %v2416_v56 = vsel %vm2408_vm10, %v2395_v45, %v2415_v62  ;;  %2128 = vst [vmem:[#allocation4] sm:$0x1] %v4200_v18  ;;  %2129 = vst [vmem:[#allocation4 + $0x18] sm:$0x1] %v4200_v18  ;;  %v2114_v44 = vand.u32 127, %v6626_v46 }
 0x545   :  { %4053 = vmatpush3.bf16.msra.mxu1 %v4052_v34  ;;  %4085 = vmatpush3.bf16.msra.mxu0 %v4082_v14  ;;  %v4111_v14 = vpack.c.bf16 %v2521_v4, %v2520_v31  ;;  %2130 = vst [vmem:[#allocation4 + $0x11] sm:$0x1] %v4200_v18  ;;  %2131 = vst [vmem:[#allocation4 + $0x29] sm:$0x1] %v4200_v18  ;;  %v2526_v34 = vld [vmem:[%s6600_s12 + $0x70] sm:$0xff] }
 0x546   :  { %4055 = vmatprep.subr.bf16.mxu1 %v4054_v19  ;;  %4087 = vmatprep.subr.bf16.mxu0 %v4086_v6  ;;  %v4120_v24 = vpack.c.bf16 %v2527_v29, %v2526_v34  ;;  %v6625_v19 = vmov 0.0   ;;  %vm2115_vm12 = vcmp.lt.s32.totalorder %v2114_v44, 16 }
 0x549   :  { %4057 = vmatpush3.bf16.msra.mxu1 %v4056_v25  ;;  %4089 = vmatpush3.bf16.msra.mxu0 %v4086_v6 }
 0x54a   :  { %4059 = vmatprep.subr.bf16.mxu1 %v4058_v32  ;;  %4091 = vmatprep.subr.bf16.mxu0 %v4090_v48 }
 0x54d   :  { %4061 = vmatpush3.bf16.msra.mxu1 %v4060_v54  ;;  %4093 = vmatpush3.bf16.msra.mxu0 %v4090_v48 }
 0x54e   :  { %4063 = vmatprep.subr.bf16.mxu1 %v4062_v9  ;;  %4095 = vmatprep.subr.bf16.mxu0 %v4094_v13 }
 0x551   :  { %4065 = vmatpush3.bf16.msra.mxu1 %v4064_v26  ;;  %4097 = vmatpush3.bf16.msra.mxu0 %v4094_v13 }
 0x552   :  { %4098 = vmatprep.subr.bf16.mxu1 %v4199_v17  ;;  %4122 = vmatprep.subr.bf16.mxu0 %v4199_v17 }
 0x554   :  { %2093 = vmatmul.mubr.f32.vlgmr.msra.gmra.mrb[16].mxu1 %v6265_v10  ;;  %3354 = vmatmul.mubr.f32.vlgmr.msra.gmra.mrb[24].mxu0 %v2416_v56  ;;  %v2513_v10 = vld [vmem:[%s6600_s12 + $0x8] sm:$0xff] }
 0x555   :  { %2097 = vmatprep.mubr.f32.mxu1 %v6292_v16  ;;  %v2514_v16 = vld [vmem:[%s6600_s12 + $0x10] sm:$0xff]  ;;  %3423 = vmatprep.mubr.msk.f32.mxu0 %vm4201_vm11, %v6625_v19 }
 0x558   :  { %2098 = vmatmul.mubr.f32.gmra.mrb[18].mxu1 %v6306_v28  ;;  %v4099_v28 = vpack.c.bf16 %v2513_v10, %v2512_v38 }
 0x559   :  { %2102 = vmatprep.mubr.f32.mxu1 %v6322_v15  ;;  %v2515_v15 = vld [vmem:[%s6600_s12 + $0x18] sm:$0xff] }
 0x55a   :  { %4100 = vmatpush3.bf16.msra.mxu1 %v4099_v28  ;;  %4124 = vmatpush3.bf16.msra.mxu0 %v4099_v28 }
 0x55b   :  { %4101 = vmatprep.subr.bf16.mxu1 %v4199_v17  ;;  %4125 = vmatprep.subr.bf16.mxu0 %v4199_v17 }
 0x55c   :  { %2103 = vmatmul.mubr.f32.gmra.mrb[20].mxu1 %v6340_v43  ;;  %v4102_v43 = vpack.c.bf16 %v2515_v15, %v2514_v16 }
 0x55d   :  { %2107 = vmatprep.mubr.f32.mxu1 %v6363_v42  ;;  %v2516_v42 = vld [vmem:[%s6600_s12 + $0x20] sm:$0xff] }
 0x55e   :  { %4103 = vmatpush3.bf16.msra.mxu1 %v4102_v43  ;;  %4127 = vmatpush3.bf16.msra.mxu0 %v4102_v43 }
 0x55f   :  { %4104 = vmatprep.subr.bf16.mxu1 %v4199_v17  ;;  %4128 = vmatprep.subr.bf16.mxu0 %v4199_v17 }
 0x560   :  { %2108 = vmatmul.mubr.f32.gmra.mrb[22].mxu1 %v6376_v47  ;;  %v4105_v47 = vpack.c.bf16 %v2517_v63, %v2516_v42 }
 0x561   :  { %3388 = vmatprep.mubr.msk.f32.mxu1 %vm4201_vm11, %v6625_v19 }
 0x562   :  { %4106 = vmatpush3.bf16.msra.mxu1 %v4105_v47  ;;  %4130 = vmatpush3.bf16.msra.mxu0 %v4105_v47 }
 0x563   :  { %4107 = vmatprep.subr.bf16.mxu1 %v4199_v17  ;;  %4131 = vmatprep.subr.bf16.mxu0 %v4199_v17 }
 0x566   :  { %4109 = vmatpush3.bf16.msra.mxu1 %v4108_v40  ;;  %4133 = vmatpush3.bf16.msra.mxu0 %v4108_v40 }
 0x567   :  { %4110 = vmatprep.subr.bf16.mxu1 %v4199_v17  ;;  %4134 = vmatprep.subr.bf16.mxu0 %v4199_v17 }
 0x56a   :  { %4112 = vmatpush3.bf16.msra.mxu1 %v4111_v14  ;;  %4136 = vmatpush3.bf16.msra.mxu0 %v4111_v14 }
 0x56b   :  { %4113 = vmatprep.subr.bf16.mxu1 %v4199_v17  ;;  %4137 = vmatprep.subr.bf16.mxu0 %v4199_v17 }
 0x56e   :  { %4115 = vmatpush3.bf16.msra.mxu1 %v4114_v0  ;;  %4139 = vmatpush3.bf16.msra.mxu0 %v4114_v0 }
 0x56f   :  { %4116 = vmatprep.subr.bf16.mxu1 %v4199_v17  ;;  %4140 = vmatprep.subr.bf16.mxu0 %v4199_v17 }
 0x572   :  { %4118 = vmatpush3.bf16.msra.mxu1 %v4117_v12  ;;  %4142 = vmatpush3.bf16.msra.mxu0 %v4117_v12 }
 0x573   :  { %4119 = vmatprep.subr.bf16.mxu1 %v4199_v17  ;;  %4143 = vmatprep.subr.bf16.mxu0 %v4199_v17 }
 0x576   :  { %4121 = vmatpush3.bf16.msra.mxu1 %v4120_v24  ;;  %4145 = vmatpush3.bf16.msra.mxu0 %v4120_v24 }
 0x607   :  { %v3169_v6 = vpop.f32.mrb[8].mxu1  ;;  %v3213_v61 = vpop.f32.mrb[16].mxu0 }
 0x608   :  { %v3170_v21 = vpop.f32.mrb[9].mxu1  ;;  %v3214_v57 = vpop.f32.mrb[17].mxu0 }
 0x609   :  { %v3171_v39 = vadd.f32 %v3170_v21, %v3169_v6  ;;  %v3215_v41 = vadd.f32 %v3214_v57, %v3213_v61 }
 0x60b   :  { %v2120_v52 = vmax.f32 %v3171_v39, %v3215_v41  ;;  %v3172_v5 = vpop.f32.mrb[10].mxu1  ;;  %v3216_v20 = vpop.f32.mrb[18].mxu0 }
 0x60c   :  { %v3173_v7 = vpop.f32.mrb[11].mxu1  ;;  %v3217_v25 = vpop.f32.mrb[19].mxu0 }
 0x60d   :  { %v3174_v30 = vadd.f32 %v3173_v7, %v3172_v5  ;;  %v3218_v50 = vadd.f32 %v3217_v25, %v3216_v20 }
 0x60f   :  { %v2121_v32 = vmax.f32 %v3174_v30, %v3218_v50  ;;  %v3175_v48 = vpop.f32.mrb[12].mxu1  ;;  %v3219_v53 = vpop.f32.mrb[20].mxu0 }
 0x610   :  { %v3176_v3 = vpop.f32.mrb[13].mxu1  ;;  %v3220_v35 = vpop.f32.mrb[21].mxu0 }
 0x611   :  { %v3177_v37 = vadd.f32 %v3176_v3, %v3175_v48  ;;  %v3221_v51 = vadd.f32 %v3220_v35, %v3219_v53 }
 0x613   :  { %v2122_v8 = vmax.f32 %v3177_v37, %v3221_v51  ;;  %v3178_v23 = vpop.f32.mrb[14].mxu1  ;;  %v3222_v22 = vpop.f32.mrb[22].mxu0 }
 0x614   :  { %v3179_v54 = vpop.f32.mrb[15].mxu1  ;;  %v3223_v60 = vpop.f32.mrb[23].mxu0 }
 0x615   :  { %v3180_v9 = vadd.f32 %v3179_v54, %v3178_v23  ;;  %v3224_v13 = vadd.f32 %v3223_v60, %v3222_v22 }
 0x617   :  { %v2123_v27 = vmax.f32 %v3180_v9, %v3224_v13 }
 0x627   :  { %v3257_v49 = vpop.f32.mrb[16].mxu1  ;;  %v6518_v26 = vpop.f32.mrb[24].mxu0 }
 0x628   :  { %v2504_v45 = vmul.f32 %v6518_v26, %v6518_v26  ;;  %v3258_v62 = vpop.f32.mrb[17].mxu1  ;;  %v6522_v56 = vpop.f32.mrb[25].mxu0 }
 0x629   :  { %v3259_v17 = vadd.f32 %v3258_v62, %v3257_v49  ;;  %v2496_v38 = vadd.f32 %v6518_v26, %v6522_v56  ;;  %v2503_v10 = vmul.f32 %v6522_v56, %v6522_v56 }
 0x62b   :  { %v2116_v16 = vsel %vm2115_vm12, -inf, %v3259_v17  ;;  %v2497_v28 = vrot.slane %v2496_v38, 4  ;;  %v2505_v15 = vadd.f32 %v2504_v45, %v2503_v10  ;;  %v3260_v43 = vpop.f32.mrb[18].mxu1 }
 0x62c   :  { %v2124_v42 = vmax.f32 %v2120_v52, %v2116_v16  ;;  %v3261_v63 = vpop.f32.mrb[19].mxu1 }
 0x62d   :  { %v2498_v47 = vadd.f32 %v2497_v28, %v2496_v38  ;;  %v2506_v58 = vrot.slane %v2505_v15, 4  ;;  %v3262_v33 = vadd.f32 %v3261_v63, %v3260_v43  ;;  %v3135_v28 = vld [vmem:[%s6601_s9] ss:$0 sm:$0xff] }
 0x62e   :  { %2132 = vst [vmem:[#allocation4 + $0x1] sm:$0xff] %v2124_v42 }
 0x62f   :  { %v2499_v40 = vrot.slane %v2498_v47, 2  ;;  %v2507_v31 = vadd.f32 %v2506_v58, %v2505_v15  ;;  %v2117_v4 = vsel %vm2115_vm12, -inf, %v3262_v33  ;;  %v3263_v14 = vpop.f32.mrb[20].mxu1  ;;  %v3136_v33 = vld [vmem:[%s6602_s10] ss:$0 sm:$0xff] }
 0x630   :  { %v2125_v55 = vmax.f32 %v2121_v32, %v2117_v4  ;;  %v3264_v59 = vpop.f32.mrb[21].mxu1 }
 0x631   :  { %v2500_v0 = vadd.f32 %v2499_v40, %v2498_v47  ;;  %v2508_v36 = vrot.slane %v2507_v31, 2  ;;  %v3265_v1 = vadd.f32 %v3264_v59, %v3263_v14 }
 0x632   :  { %2133 = vst [vmem:[#allocation4 + $0x9] sm:$0xff] %v2125_v55 }
 0x633   :  { %v2501_v12 = vrot.slane %v2500_v0, 1  ;;  %v2118_v18 = vsel %vm2115_vm12, -inf, %v3265_v1  ;;  %v3266_v34 = vpop.f32.mrb[22].mxu1  ;;  %v2509_v29 = vadd.f32 %v2508_v36, %v2507_v31 }
 0x634   :  { %v2126_v24 = vmax.f32 %v2122_v8, %v2118_v18  ;;  %v3267_v19 = vpop.f32.mrb[23].mxu1 }
 0x635   :  { %v2502_v6 = vadd.f32 %v2501_v12, %v2500_v0  ;;  %v3268_v61 = vadd.f32 %v3267_v19, %v3266_v34  ;;  %v2510_v21 = vrot.slane %v2509_v29, 1  ;;  %v2136_v37 = vld [vmem:[#allocation4] sm:$0xff] }
 0x636   :  { %2134 = vst [vmem:[#allocation4 + $0x19] sm:$0xff] %v2126_v24  ;;  %v2144_v54 = vmax.f32 %v2136_v37, %v2124_v42 }
 0x637   :  { %v2119_v57 = vsel %vm2115_vm12, -inf, %v3268_v61  ;;  %3389 = vmatmul.mubr.f32.vlgmr.msra.gmra.mrb[24].mxu1 %v2502_v6  ;;  %v2511_v39 = vadd.f32 %v2510_v21, %v2509_v29 }
 0x638   :  { %v2127_v41 = vmax.f32 %v2123_v27, %v2119_v57 }
 0x639   :  { %3424 = vmatmul.mubr.f32.vlgmr.msra.gmra.mrb[26].mxu0 %v2511_v39  ;;  %v2137_v35 = vld [vmem:[#allocation4 + $0x8] sm:$0xff] }
 0x63a   :  { %2135 = vst [vmem:[#allocation4 + $0x21] sm:$0xff] %v2127_v41  ;;  %v2145_v8 = vmax.f32 %v2137_v35, %v2125_v55  ;;  %v2148_v22 = vld [vmem:[#allocation4 + $0x2] sm:$0xff]  ;;  %v2149_v9 = vld [vmem:[#allocation4 + $0xa] sm:$0xff] }
 0x63b   :  { %v2152_v46 = vmax.f32 %v2144_v54, %v2148_v22 }
 0x63c   :  { %v2153_v44 = vmax.f32 %v2145_v8, %v2149_v9 }
 0x63d   :  { %v2138_v23 = vld [vmem:[#allocation4 + $0x18] sm:$0xff]  ;;  %v2167_v42 = vrot.slane %v2152_v46, %v6190_v11 }
 0x63e   :  { %v2146_v27 = vmax.f32 %v2138_v23, %v2126_v24  ;;  %v2177_v17 = vcombine.high %v2153_v44, %v2153_v44  ;;  %v2184_v47 = vrot.slane %v2153_v44, %v6190_v11 }
 0x63f   :  { %v2175_v1 = vcombine.high %v2167_v42, %v2167_v42 }
 0x640   :  { %v2191_v58 = vrot.slane %v2177_v17, %v6190_v11  ;;  %v2192_v18 = vcombine.high %v2184_v47, %v2184_v47 }
 0x641   :  { %v2139_v51 = vld [vmem:[#allocation4 + $0x20] sm:$0xff] }
 0x642   :  { %v2147_v60 = vmax.f32 %v2139_v51, %v2127_v41  ;;  %v2150_v13 = vld [vmem:[#allocation4 + $0x1a] sm:$0xff]  ;;  %v2151_v49 = vld [vmem:[#allocation4 + $0x22] sm:$0xff]  ;;  %v2193_v34 = vcombine.high %v2191_v58, %v2191_v58 }
 0x644   :  { %v2155_v45 = vmax.f32 %v2147_v60, %v2151_v49 }
 0x646   :  { %v2211_v16 = vcombine.high %v2155_v45, %v2155_v45  ;;  %v2218_v55 = vrot.slane %v2155_v45, %v6190_v11 }
 0x648   :  { %v2225_v59 = vrot.slane %v2211_v16, %v6190_v11  ;;  %v2226_v57 = vcombine.high %v2218_v55, %v2218_v55 }
 0x64a   :  { %v2227_v39 = vcombine.high %v2225_v59, %v2225_v59 }
 0x70a   :  { %v2594_v52 = vpop.f32.mrb[24].mxu1 }
 0x70b   :  { %v2668_v5 = vmul.f32 %v2594_v52, %v2594_v52  ;;  %v2674_v20 = vrot.slane %v2594_v52, %v5163_v2  ;;  %v3390_v7 = vpop.f32.mrb[25].mxu1 }
 0x70c   :  { %v2664_v25 = vpop.f32.mrb[26].mxu0 }
 0x70d   :  { %v2675_v30 = vsub.f32 %v6522_v56, %v2674_v20  ;;  %v2676_v50 = vsub.f32 %v6518_v26, %v2674_v20  ;;  %v2669_v32 = vsub.f32 %v2664_v25, %v2668_v5  ;;  %v3425_v48 = vpop.f32.mrb[27].mxu0  ;;  %v2154_v26 = vmax.f32 %v2146_v27, %v2150_v13 }
 0x70e   :  { %v2160_v56 = vcombine.high %v2152_v46, %v2152_v46 }
 0x70f   :  { %v2670_v53 = vmax.f32 %v2669_v32, 0.0  ;;  %v2194_v10 = vcombine.high %v2154_v26, %v2154_v26  ;;  %v2201_v4 = vrot.slane %v2154_v26, %v6190_v11 }
 0x710   :  { %v2174_v63 = vrot.slane %v2160_v56, %v6190_v11 }
 0x711   :  { %v2677_v3 = vadd.f32 1e-05, %v2670_v53  ;;  %v2208_v14 = vrot.slane %v2194_v10, %v6190_v11  ;;  %v2209_v61 = vcombine.high %v2201_v4, %v2201_v4 }
 0x712   :  { %v2176_v12 = vcombine.high %v2174_v63, %v2174_v63 }
 0x713   :  { %4191 = vrsqrt.f32 %v2677_v3  ;;  %v2210_v21 = vcombine.high %v2208_v14, %v2208_v14 }
 0x71d   :  { %v4192_v62 = vpop.eup %4191 }
 0x71e   :  { %v2682_v38 = vrot.slane %v4192_v62, %v5163_v2 }
 0x720   :  { %v2683_v15 = vmul.f32 %v2682_v38, %v2675_v30  ;;  %v2684_v43 = vmul.f32 %v2682_v38, %v2676_v50 }
 0x722   :  { %v2691_v40 = vmul.f32 %v3135_v28, %v2683_v15  ;;  %v2692_v31 = vmul.f32 %v3135_v28, %v2684_v43 }
 0x724   :  { %v2699_v0 = vadd.f32 %v3136_v33, %v2691_v40  ;;  %v2700_v36 = vadd.f32 %v3136_v33, %v2692_v31 }
 0x726   :  { %v2703_v29 = vcombine.high %v2699_v0, %v2699_v0  ;;  %v2710_v24 = vrot.slane %v2699_v0, %v6190_v11  ;;  %v2720_v19 = vcombine.high %v2700_v36, %v2700_v36  ;;  %v2727_v6 = vrot.slane %v2700_v36, %v6190_v11 }
 0x728   :  { %v2717_v41 = vrot.slane %v2703_v29, %v6190_v11  ;;  %v2718_v52 = vcombine.high %v2710_v24, %v2710_v24  ;;  %v2734_v5 = vrot.slane %v2720_v19, %v6190_v11  ;;  %v2735_v20 = vcombine.high %v2727_v6, %v2727_v6 }
 0x729   :  { %v2737_v7 = vrot.slane %v2710_v24, 1  ;;  %v2741_v25 = vrot.slane %v2727_v6, 1  ;;  %v2761_v30 = vadd.f32 %v2710_v24, %v2167_v42  ;;  %v2769_v50 = vadd.f32 %v2727_v6, %v2201_v4 }
 0x72a   :  { %v2719_v32 = vcombine.high %v2717_v41, %v2717_v41  ;;  %v2736_v48 = vcombine.high %v2734_v5, %v2734_v5  ;;  %v2738_v53 = vrot.slane %v2718_v52, 1  ;;  %v2739_v3 = vrot.slane %v2717_v41, 1 }
 0x72b   :  { %v2742_v35 = vrot.slane %v2735_v20, 1  ;;  %v2743_v37 = vrot.slane %v2734_v5, 1  ;;  %v2762_v51 = vadd.f32 %v2737_v7, %v2175_v1  ;;  %v2763_v8 = vadd.f32 %v2718_v52, %v2174_v63 }
 0x72c   :  { %v2740_v23 = vrot.slane %v2719_v32, 1  ;;  %v2744_v22 = vrot.slane %v2736_v48, 1  ;;  %v2764_v54 = vadd.f32 %v2738_v53, %v2176_v12  ;;  %v2765_v60 = vadd.f32 %v2717_v41, %v2184_v47 }
 0x72d   :  { %v2766_v9 = vadd.f32 %v2739_v3, %v2192_v18  ;;  %v2767_v13 = vadd.f32 %v2719_v32, %v2191_v58  ;;  %v2770_v11 = vadd.f32 %v2741_v25, %v2209_v61  ;;  %v2771_v27 = vadd.f32 %v2735_v20, %v2208_v14 }
 0x72e   :  { %v2768_v46 = vadd.f32 %v2740_v23, %v2193_v34  ;;  %v2772_v44 = vadd.f32 %v2742_v35, %v2210_v21  ;;  %v2773_v49 = vadd.f32 %v2734_v5, %v2218_v55  ;;  %v2774_v26 = vadd.f32 %v2743_v37, %v2226_v57 }
 0x72f   :  { %v2775_v45 = vadd.f32 %v2736_v48, %v2225_v59  ;;  %v2776_v62 = vadd.f32 %v2744_v22, %v2227_v39  ;;  %v2800_v56 = vrot.slane %v2762_v51, %v5163_v2  ;;  %v2804_v17 = vrot.slane %v2763_v8, %v5163_v2 }
 0x730   :  { %v2796_v38 = vrot.slane %v2761_v30, %v5163_v2  ;;  %v2808_v10 = vrot.slane %v2764_v54, %v5163_v2  ;;  %v2828_v16 = vrot.slane %v2769_v50, %v5163_v2  ;;  %v2832_v28 = vrot.slane %v2770_v11, %v5163_v2 }
 0x731   :  { %v2836_v15 = vrot.slane %v2771_v27, %v5163_v2  ;;  %v2840_v43 = vrot.slane %v2772_v44, %v5163_v2  ;;  %v2812_v47 = vrot.slane %v2765_v60, %v5163_v2  ;;  %v2844_v58 = vrot.slane %v2773_v49, %v5163_v2 }
 0x732   :  { %v2857_v42 = vsel %vm2396_vm4, %v2800_v56, %v2796_v38  ;;  %v2864_v63 = vsel %vm2396_vm4, %v2832_v28, %v2828_v16  ;;  %v2816_v31 = vrot.slane %v2766_v9, %v5163_v2  ;;  %v2848_v4 = vrot.slane %v2774_v26, %v5163_v2 }
 0x733   :  { %v2858_v33 = vsel %vm2398_vm5, %v2804_v17, %v2857_v42  ;;  %v2865_v40 = vsel %vm2398_vm5, %v2836_v15, %v2864_v63  ;;  %v2820_v59 = vrot.slane %v2767_v13, %v5163_v2  ;;  %v2852_v0 = vrot.slane %v2775_v45, %v5163_v2 }
 0x734   :  { %v2859_v14 = vsel %vm2400_vm6, %v2808_v10, %v2858_v33  ;;  %v2866_v55 = vsel %vm2400_vm6, %v2840_v43, %v2865_v40  ;;  %v2824_v12 = vrot.slane %v2768_v46, %v5163_v2  ;;  %v2856_v18 = vrot.slane %v2776_v62, %v5163_v2 }
 0x735   :  { %v2860_v36 = vsel %vm2402_vm7, %v2812_v47, %v2859_v14  ;;  %v2867_v1 = vsel %vm2402_vm7, %v2844_v58, %v2866_v55 }
 0x736   :  { %v2861_v34 = vsel %vm2404_vm8, %v2816_v31, %v2860_v36  ;;  %v2868_v29 = vsel %vm2404_vm8, %v2848_v4, %v2867_v1 }
 0x737   :  { %v2862_v24 = vsel %vm2406_vm9, %v2820_v59, %v2861_v34  ;;  %v2869_v19 = vsel %vm2406_vm9, %v2852_v0, %v2868_v29 }
 0x738   :  { %v2863_v6 = vsel %vm2408_vm10, %v2824_v12, %v2862_v24  ;;  %v2870_v61 = vsel %vm2408_vm10, %v2856_v18, %v2869_v19 }
 0x739   :  { %2873 = vst [vmem:[%s6603_s13] sm:$0xff] %v2863_v6  ;;  %2874 = vst [vmem:[%s6603_s13 + $0x8] sm:$0xff] %v2870_v61 }

</bundles_post_ra>
